<compile_context>
chip_gen: v7x
topology: tpu7x:2x2x1
jax: 0.10.0
libtpu: 0.0.40
codegen_flags: <defaults>
</compile_context>

<pallas_src>
import functools
import math
from collections import namedtuple

import jax
import jax.numpy as jnp
from jax.experimental import pallas as pl
from jax.experimental.pallas import tpu as pltpu

# ----- module hyperparameters (globals in the original pokegan script) -------
NOISE_SIZE = 16     # noise_size
IMAGE_SIZE = 8      # image_size  -> channel widths 64, 32, 16, 8
NUM_CHANNELS = 3    # num_channels
BATCH = 2
BN_EPS = 1e-5

# (in_ch, out_ch, kernel, stride, padding, has_bn, activation)
LAYER_CFG = [
    (NOISE_SIZE,     IMAGE_SIZE * 8, 6, 1, 0, True,  "relu"),
    (IMAGE_SIZE * 8, IMAGE_SIZE * 4, 4, 2, 1, True,  "relu"),
    (IMAGE_SIZE * 4, IMAGE_SIZE * 2, 4, 2, 1, True,  "relu"),
    (IMAGE_SIZE * 2, IMAGE_SIZE,     4, 2, 0, True,  "relu"),
    (IMAGE_SIZE,     NUM_CHANNELS,   4, 2, 1, False, "tanh"),
]


# ------------------------------ Pallas kernels -------------------------------
def convT_fused_kernel(w_ref, x_ref, b_ref, *out_refs, act, with_stats):
    """One (phase, pixel-tile) step of a transposed-conv matmul.

    w_ref : (1, CO, KK)  bf16  per-phase sub-kernel (resident along the m axis)
    x_ref : (1, KK, TM)  bf16  im2col patch columns, pixels on the lane axis
    b_ref : (CO, 1)      f32
    out_refs: o_ref (1, CO, TM) f32
              [+ sum_ref, ssq_ref (1, CO, 1) f32, accumulated along the m axis]
    """
    o_ref = out_refs[0]
    y = jnp.dot(w_ref[0], x_ref[0],
                preferred_element_type=jnp.float32) + b_ref[...]
    if act == "relu":
        y = jnp.maximum(y, 0.0)
    elif act == "tanh":
        y = jnp.tanh(y)
    o_ref[0] = y

    if with_stats:
        sum_ref, ssq_ref = out_refs[1], out_refs[2]

        @pl.when(pl.program_id(1) == 0)
        def _zero():
            sum_ref[...] = jnp.zeros_like(sum_ref)
            ssq_ref[...] = jnp.zeros_like(ssq_ref)

        sum_ref[0] += jnp.sum(y, axis=1, keepdims=True)
        ssq_ref[0] += jnp.sum(y * y, axis=1, keepdims=True)


def bn_relu_kernel(x_ref, scale_ref, shift_ref, o_ref):
    # per-channel affine (scale/shift are (CO, 1)) + ReLU, lane-dense tiles.
    # Output is bf16: the next layer's matmul consumes bf16 patches anyway.
    y = jnp.maximum(x_ref[...] * scale_ref[...] + shift_ref[...], 0.0)
    o_ref[...] = y.astype(o_ref.dtype)


# ------------------------------ Pallas wrappers -------------------------------
def pallas_convT_matmul(w_all, patches, bias, act, with_stats):
    """(P, CO, KK) @ (P, KK, MP) + bias -> (P, CO, MP) [+ per-phase sum/sumsq]."""
    P, CO, KK = w_all.shape
    MP = patches.shape[2]
    TM = MP          # whole (128-padded) pixel extent per step; blocks < ~0.35 MiB

    in_specs = [
        pl.BlockSpec((1, CO, KK), lambda ph, m: (ph, 0, 0)),
        pl.BlockSpec((1, KK, TM), lambda ph, m: (ph, 0, m)),
        pl.BlockSpec((CO, 1), lambda ph, m: (0, 0)),
    ]
    o_spec = pl.BlockSpec((1, CO, TM), lambda ph, m: (ph, 0, m))
    o_shape = jax.ShapeDtypeStruct((P, CO, MP), jnp.float32)

    if with_stats:
        s_spec = pl.BlockSpec((1, CO, 1), lambda ph, m: (ph, 0, 0))
        out_specs = (o_spec, s_spec, s_spec)
        out_shape = (o_shape,
                     jax.ShapeDtypeStruct((P, CO, 1), jnp.float32),
                     jax.ShapeDtypeStruct((P, CO, 1), jnp.float32))
        # stats accumulate along the m axis -> "arbitrary"; phase axis stays
        # "parallel" so v7x can split the phases over its two TensorCores.
        sem = ("parallel", "arbitrary")
    else:
        out_specs = o_spec
        out_shape = o_shape
        sem = ("parallel", "parallel")

    return pl.pallas_call(
        functools.partial(convT_fused_kernel, act=act, with_stats=with_stats),
        out_shape=out_shape,
        grid=(P, MP // TM),
        in_specs=in_specs,
        out_specs=out_specs,
        compiler_params=pltpu.CompilerParams(dimension_semantics=sem),
    )(w_all, patches, bias)


def pallas_bn_relu(y, scale, shift):
    """relu(y * scale + shift), per-channel scale/shift; y: (P, CO, MP) f32 -> bf16."""
    P, CO, MP = y.shape
    return pl.pallas_call(
        bn_relu_kernel,
        out_shape=jax.ShapeDtypeStruct((P, CO, MP), jnp.bfloat16),
        grid=(P,),
        in_specs=[
            pl.BlockSpec((1, CO, MP), lambda ph: (ph, 0, 0)),
            pl.BlockSpec((CO, 1), lambda ph: (0, 0)),
            pl.BlockSpec((CO, 1), lambda ph: (0, 0)),
        ],
        out_specs=pl.BlockSpec((1, CO, MP), lambda ph: (ph, 0, 0)),
        compiler_params=pltpu.CompilerParams(
            dimension_semantics=("parallel",)),
    )(y, scale, shift)


# -------------------- sub-pixel (phase) ConvTranspose glue --------------------
AxisPhase = namedtuple("AxisPhase", "taps out_len pad base start khs")


def _axis_phases(in_len, k, stride, padding):
    """Sub-pixel decomposition of one spatial axis of a ConvTranspose2d."""
    phases = []
    for a in range(stride):
        taps = -(-(k - a) // stride)                    # ceil((k - a) / stride)
        u_min = -((a - padding) // stride)              # ceil((padding - a) / stride)
        u_max = in_len - 1 + (k - 1 - a - padding) // stride
        out_len = u_max - u_min + 1
        pad_lo = max(0, (taps - 1) - u_min)
        pad_hi = max(0, u_max - (in_len - 1))
        base = u_min + pad_lo - (taps - 1)
        start = stride * u_min + a - padding            # output offset of this phase
        khs = tuple(a + (taps - 1 - d) * stride for d in range(taps))
        phases.append(AxisPhase(taps, out_len, (pad_lo, pad_hi), base, start, khs))
    full = (in_len - 1) * stride - 2 * padding + k
    assert sorted(ph.start for ph in phases) == list(range(stride))
    assert sum(ph.out_len for ph in phases) == full
    return phases


def conv_transpose_layer(x, w_t, b, stride, padding, act, gamma=None, beta=None):
    """One ConvTranspose2d (+ train-mode BN + ReLU, or tanh).

    x   : (CI, N, H, W) f32/bf16 activations (channel-first flat layout)
    w_t : (CI, CO, K, K)  PyTorch ConvTranspose2d weight layout
    returns (CO, N, OH, OW)  (bf16 for BN layers, f32 for the final tanh layer)
    """
    CI, N, H, W = x.shape
    _, CO, K, _ = w_t.shape
    ph_h = _axis_phases(H, K, stride, padding)
    ph_w = _axis_phases(W, K, stride, padding)
    Th, Tw = ph_h[0].taps, ph_w[0].taps
    OHp, OWp = ph_h[0].out_len, ph_w[0].out_len
    assert all(ph.taps == Th and ph.out_len == OHp for ph in ph_h)
    assert all(ph.taps == Tw and ph.out_len == OWp for ph in ph_w)

    P = stride * stride
    KK = Th * Tw * CI
    M = N * OHp * OWp
    MP = -(-M // 128) * 128        # pad pixel axis to a lane-dense multiple of 128

    patch_list, w_list = [], []
    for pa in ph_h:
        for pb in ph_w:
            xp = jnp.pad(x, ((0, 0), (0, 0), pa.pad, pb.pad))
            slabs = [
                xp[:, :, pa.base + dh: pa.base + dh + OHp,
                       pb.base + dw: pb.base + dw + OWp]
                for dh in range(Th) for dw in range(Tw)
            ]
            patch_list.append(jnp.stack(slabs, axis=0).reshape(KK, M))
            # phase sub-kernel, rows ordered (dh, dw, ci) to match the patches
            wsub = jnp.stack(
                [jnp.stack([w_t[:, :, kh, kw] for kw in pb.khs], axis=-1)
                 for kh in pa.khs], axis=-2)            # (CI, CO, Th, Tw)
            w_list.append(jnp.transpose(wsub, (1, 2, 3, 0)).reshape(CO, KK))

    patches = jnp.pad(jnp.stack(patch_list, axis=0),
                      ((0, 0), (0, 0), (0, MP - M))).astype(jnp.bfloat16)
    w_all = jnp.stack(w_list, axis=0).astype(jnp.bfloat16)
    bias = b.reshape(CO, 1).astype(jnp.float32)

    with_bn = gamma is not None
    fuse_act = None if with_bn else act
    outs = pallas_convT_matmul(w_all, patches, bias, fuse_act, with_bn)

    if with_bn:
        y, ssum, ssq = outs
        count = P * M
        n_pad = P * (MP - M)
        b_col = b.reshape(CO, 1)
        # zero patch columns (lane padding) contribute exactly `bias` to the
        # per-phase sums; remove them before forming the batch statistics.
        s1 = jnp.sum(ssum, axis=0) - n_pad * b_col
        s2 = jnp.sum(ssq, axis=0) - n_pad * b_col * b_col
        mean = s1 / count
        var = jnp.maximum(s2 / count - mean * mean, 0.0)   # clamp E[x^2]-E[x]^2
        scale = gamma.reshape(CO, 1) * jax.lax.rsqrt(var + BN_EPS)
        shift = beta.reshape(CO, 1) - mean * scale
        # TODO(synk): running_mean/running_var buffer updates (a training-time
        # side effect) are not reproduced; they do not affect this output.
        y = pallas_bn_relu(y, scale, shift)               # bf16 out
    else:
        y = outs                                          # f32 (final tanh layer)

    # de-interleave the stride*stride output phases back into (CO, N, OH, OW)
    y = y[:, :, :M].reshape(P, CO, N, OHp, OWp)
    h_idx = {ph.start: i for i, ph in enumerate(ph_h)}
    w_idx = {ph.start: i for i, ph in enumerate(ph_w)}
    order = [h_idx[oa] * stride + w_idx[ob]
             for oa in range(stride) for ob in range(stride)]
    y = jnp.stack([y[i] for i in order], axis=0)
    y = y.reshape(stride, stride, CO, N, OHp, OWp)
    y = jnp.transpose(y, (2, 3, 4, 0, 5, 1))
    return y.reshape(CO, N, OHp * stride, OWp * stride)


# ------------------------------ model forward --------------------------------
def generator_forward(z_nchw, params):
    """z: (N, noise_size, 1, 1) NCHW -> (N, 3, 100, 100) NCHW (like nn.Module)."""
    x = jnp.transpose(z_nchw, (1, 0, 2, 3)).astype(jnp.float32)  # channel-first
    for idx, (_, _, _, stride, pd, has_bn, act) in enumerate(LAYER_CFG):
        gamma = params[f"gamma{idx}"] if has_bn else None
        beta = params[f"beta{idx}"] if has_bn else None
        x = conv_transpose_layer(x, params[f"w{idx}"], params[f"b{idx}"],
                                 stride, pd, act, gamma, beta)
    return jnp.transpose(x, (1, 0, 2, 3)).astype(jnp.float32)     # -> NCHW


def reference_forward(z_nchw, params):
    """Pure-JAX f32 reference (PyTorch ConvTranspose2d / train-mode BN semantics)."""
    x = z_nchw.astype(jnp.float32)
    for idx, (_, co, k, stride, pd, has_bn, _) in enumerate(LAYER_CFG):
        w = params[f"w{idx}"]
        wf = jnp.transpose(w[:, :, ::-1, ::-1], (1, 0, 2, 3))     # (CO, CI, K, K)
        x = jax.lax.conv_general_dilated(
            x, wf, window_strides=(1, 1),
            padding=[(k - 1 - pd, k - 1 - pd)] * 2,
            lhs_dilation=(stride, stride),
            dimension_numbers=("NCHW", "OIHW", "NCHW"),
        ) + params[f"b{idx}"].reshape(1, co, 1, 1)
        if has_bn:
            mean = jnp.mean(x, axis=(0, 2, 3), keepdims=True)
            var = jnp.mean((x - mean) ** 2, axis=(0, 2, 3), keepdims=True)
            x = (x - mean) * jax.lax.rsqrt(var + BN_EPS)
            x = (x * params[f"gamma{idx}"].reshape(1, co, 1, 1)
                 + params[f"beta{idx}"].reshape(1, co, 1, 1))
            x = jnp.maximum(x, 0.0)
        else:
            x = jnp.tanh(x)
    return x


def init_params(key):
    params = {}
    for idx, (ci, co, k, _, _, has_bn, _) in enumerate(LAYER_CFG):
        key, kw, kb = jax.random.split(key, 3)
        bound = 1.0 / math.sqrt(ci * k * k)
        params[f"w{idx}"] = jax.random.uniform(
            kw, (ci, co, k, k), jnp.float32, -bound, bound)       # PyTorch layout
        params[f"b{idx}"] = jax.random.uniform(
            kb, (co,), jnp.float32, -bound, bound)
        if has_bn:
            params[f"gamma{idx}"] = jnp.ones((co,), jnp.float32)
            params[f"beta{idx}"] = jnp.zeros((co,), jnp.float32)
    return params


if __name__ == "__main__":
    key = jax.random.PRNGKey(0)
    key, kz = jax.random.split(key)
    params = init_params(key)
    z = jax.random.normal(kz, (BATCH, NOISE_SIZE, 1, 1), jnp.float32)

    fwd = jax.jit(generator_forward)
    out = jax.block_until_ready(fwd(z, params))

    assert out.shape == (BATCH, NUM_CHANNELS, 100, 100), out.shape
    assert bool(jnp.all(jnp.isfinite(out)))
    assert bool(jnp.all(jnp.abs(out) <= 1.0 + 1e-6))              # tanh range

    # correctness vs. pure-JAX f32 reference (bf16 matmul operands -> loose tol)
    ref = jax.block_until_ready(jax.jit(reference_forward)(z, params))
    max_err = float(jnp.max(jnp.abs(out - ref)))
    mean_err = float(jnp.mean(jnp.abs(out - ref)))
    assert max_err < 0.3 and mean_err < 0.03, (max_err, mean_err)

    print("KERNEL_OK")
</pallas_src>

<mosaic_0001>
module attributes {stable_mosaic.version = 11 : i64} {
  func.func @convT_fused_kernel(%arg0: i32, %arg1: i32, %arg2: memref<1x64x576xbf16, #tpu.memory_space<vmem>>, %arg3: memref<1x576x128xbf16, #tpu.memory_space<vmem>>, %arg4: memref<64x1xf32, #tpu.memory_space<vmem>>, %arg5: memref<1x64x128xf32, #tpu.memory_space<vmem>>, %arg6: memref<1x64x1xf32, #tpu.memory_space<vmem>>, %arg7: memref<1x64x1xf32, #tpu.memory_space<vmem>>) attributes {dimension_semantics = [#tpu.dimension_semantics<parallel>, #tpu.dimension_semantics<arbitrary>], iteration_bounds = array<i64: 1, 1>, scalar_prefetch = 0 : i64, scratch_operands = 0 : i64, tpu.core_type = #tpu.core_type<tc>, window_params = [{transform_indices = @transform_0, window_bounds = array<i64: 1, 64, 576>}, {transform_indices = @transform_1, window_bounds = array<i64: 1, 576, 128>}, {pipeline_mode = #tpu.pipeline_mode<synchronous>, transform_indices = @transform_2, window_bounds = array<i64: 64, 1>}, {transform_indices = @transform_3, window_bounds = array<i64: 1, 64, 128>}, {transform_indices = @transform_4, window_bounds = array<i64: 1, 64, 1>}, {transform_indices = @transform_5, window_bounds = array<i64: 1, 64, 1>}]} {
    %c0 = arith.constant 0 : index
    %c0_0 = arith.constant 0 : index
    %c0_1 = arith.constant 0 : index
    %0 = vector.load %arg2[%c0, %c0_0, %c0_1] : memref<1x64x576xbf16, #tpu.memory_space<vmem>>, vector<1x64x576xbf16>
    %1 = vector.shape_cast %0 : vector<1x64x576xbf16> to vector<64x576xbf16>
    %c0_2 = arith.constant 0 : index
    %c0_3 = arith.constant 0 : index
    %c0_4 = arith.constant 0 : index
    %2 = vector.load %arg3[%c0_2, %c0_3, %c0_4] : memref<1x576x128xbf16, #tpu.memory_space<vmem>>, vector<1x576x128xbf16>
    %3 = vector.shape_cast %2 : vector<1x576x128xbf16> to vector<576x128xbf16>
    %cst = arith.constant dense<0.000000e+00> : vector<64x128xf32>
    %4 = tpu.matmul %1, %3, %cst {dimension_numbers = #tpu.dot_dimension_numbers<[1], [0], [0], [1], [0, 0, 1, 1], [], []>} : vector<64x576xbf16>, vector<576x128xbf16>, vector<64x128xf32> -> vector<64x128xf32>
    %c0_5 = arith.constant 0 : index
    %c0_6 = arith.constant 0 : index
    %5 = vector.load %arg4[%c0_5, %c0_6] : memref<64x1xf32, #tpu.memory_space<vmem>>, vector<64x1xf32>
    %6 = vector.broadcast %5 : vector<64x1xf32> to vector<64x128xf32>
    %7 = arith.addf %4, %6 : vector<64x128xf32>
    %c0_7 = arith.constant 0 : index
    %c0_8 = arith.constant 0 : index
    %c0_9 = arith.constant 0 : index
    %8 = vector.load %arg5[%c0_7, %c0_8, %c0_9] : memref<1x64x128xf32, #tpu.memory_space<vmem>>, vector<1x64x128xf32>
    %9 = vector.shape_cast %8 : vector<1x64x128xf32> to vector<64x128xf32>
    %10 = vector.shape_cast %7 : vector<64x128xf32> to vector<1x64x128xf32>
    tpu.vector_store %arg5[%c0_7, %c0_8, %c0_9], %10 {strides = array<i32>} : memref<1x64x128xf32, #tpu.memory_space<vmem>>, vector<1x64x128xf32>,
    %c0_i32 = arith.constant 0 : i32
    %11 = arith.cmpi eq, %arg1, %c0_i32 : i32
    %12 = arith.extui %11 : i1 to i32
    %c0_i32_10 = arith.constant 0 : i32
    %13 = arith.cmpi ne, %12, %c0_i32_10 : i32
    scf.if %13 {
      %cst_25 = arith.constant 0.000000e+00 : f32
      %31 = vector.broadcast %cst_25 : f32 to vector<1x64x1xf32>
      %c0_26 = arith.constant 0 : index
      %c0_27 = arith.constant 0 : index
      %c0_28 = arith.constant 0 : index
      %32 = vector.load %arg6[%c0_26, %c0_27, %c0_28] : memref<1x64x1xf32, #tpu.memory_space<vmem>>, vector<1x64x1xf32>
      tpu.vector_store %arg6[%c0_26, %c0_27, %c0_28], %31 {strides = array<i32>} : memref<1x64x1xf32, #tpu.memory_space<vmem>>, vector<1x64x1xf32>,
      %cst_29 = arith.constant 0.000000e+00 : f32
      %33 = vector.broadcast %cst_29 : f32 to vector<1x64x1xf32>
      %c0_30 = arith.constant 0 : index
      %c0_31 = arith.constant 0 : index
      %c0_32 = arith.constant 0 : index
      %34 = vector.load %arg7[%c0_30, %c0_31, %c0_32] : memref<1x64x1xf32, #tpu.memory_space<vmem>>, vector<1x64x1xf32>
      tpu.vector_store %arg7[%c0_30, %c0_31, %c0_32], %33 {strides = array<i32>} : memref<1x64x1xf32, #tpu.memory_space<vmem>>, vector<1x64x1xf32>,
    } else {
    }
    %c0_11 = arith.constant 0 : index
    %c0_12 = arith.constant 0 : index
    %c0_13 = arith.constant 0 : index
    %14 = vector.load %arg6[%c0_11, %c0_12, %c0_13] : memref<1x64x1xf32, #tpu.memory_space<vmem>>, vector<1x64x1xf32>
    %15 = vector.shape_cast %14 : vector<1x64x1xf32> to vector<64x1xf32>
    %cst_14 = arith.constant dense<0.000000e+00> : vector<64xf32>
    %16 = vector.multi_reduction <add>, %7, %cst_14 [1] : vector<64x128xf32> to vector<64xf32>
    %17 = vector.shape_cast %16 : vector<64xf32> to vector<64x1xf32>
    %18 = arith.addf %15, %17 : vector<64x1xf32>
    %c0_15 = arith.constant 0 : index
    %c0_16 = arith.constant 0 : index
    %c0_17 = arith.constant 0 : index
    %19 = vector.load %arg6[%c0_15, %c0_16, %c0_17] : memref<1x64x1xf32, #tpu.memory_space<vmem>>, vector<1x64x1xf32>
    %20 = vector.shape_cast %19 : vector<1x64x1xf32> to vector<64x1xf32>
    %21 = vector.shape_cast %18 : vector<64x1xf32> to vector<1x64x1xf32>
    tpu.vector_store %arg6[%c0_15, %c0_16, %c0_17], %21 {strides = array<i32>} : memref<1x64x1xf32, #tpu.memory_space<vmem>>, vector<1x64x1xf32>,
    %c0_18 = arith.constant 0 : index
    %c0_19 = arith.constant 0 : index
    %c0_20 = arith.constant 0 : index
    %22 = vector.load %arg7[%c0_18, %c0_19, %c0_20] : memref<1x64x1xf32, #tpu.memory_space<vmem>>, vector<1x64x1xf32>
    %23 = vector.shape_cast %22 : vector<1x64x1xf32> to vector<64x1xf32>
    %24 = arith.mulf %7, %7 : vector<64x128xf32>
    %cst_21 = arith.constant dense<0.000000e+00> : vector<64xf32>
    %25 = vector.multi_reduction <add>, %24, %cst_21 [1] : vector<64x128xf32> to vector<64xf32>
    %26 = vector.shape_cast %25 : vector<64xf32> to vector<64x1xf32>
    %27 = arith.addf %23, %26 : vector<64x1xf32>
    %c0_22 = arith.constant 0 : index
    %c0_23 = arith.constant 0 : index
    %c0_24 = arith.constant 0 : index
    %28 = vector.load %arg7[%c0_22, %c0_23, %c0_24] : memref<1x64x1xf32, #tpu.memory_space<vmem>>, vector<1x64x1xf32>
    %29 = vector.shape_cast %28 : vector<1x64x1xf32> to vector<64x1xf32>
    %30 = vector.shape_cast %27 : vector<64x1xf32> to vector<1x64x1xf32>
    tpu.vector_store %arg7[%c0_22, %c0_23, %c0_24], %30 {strides = array<i32>} : memref<1x64x1xf32, #tpu.memory_space<vmem>>, vector<1x64x1xf32>,
    return
  }
  func.func @transform_0(%arg0: i32, %arg1: i32) -> (i32, i32, i32) {
    %c0_i32 = arith.constant 0 : i32
    %c0_i32_0 = arith.constant 0 : i32
    %c0_i32_1 = arith.constant 0 : i32
    return %arg0, %c0_i32, %c0_i32_0 : i32, i32, i32
  }
  func.func @transform_1(%arg0: i32, %arg1: i32) -> (i32, i32, i32) {
    %c0_i32 = arith.constant 0 : i32
    %c0_i32_0 = arith.constant 0 : i32
    return %arg0, %c0_i32, %arg1 : i32, i32, i32
  }
  func.func @transform_2(%arg0: i32, %arg1: i32) -> (i32, i32) {
    %c0_i32 = arith.constant 0 : i32
    %c0_i32_0 = arith.constant 0 : i32
    %c0_i32_1 = arith.constant 0 : i32
    return %c0_i32, %c0_i32_0 : i32, i32
  }
  func.func @transform_3(%arg0: i32, %arg1: i32) -> (i32, i32, i32) {
    %c0_i32 = arith.constant 0 : i32
    %c0_i32_0 = arith.constant 0 : i32
    return %arg0, %c0_i32, %arg1 : i32, i32, i32
  }
  func.func @transform_4(%arg0: i32, %arg1: i32) -> (i32, i32, i32) {
    %c0_i32 = arith.constant 0 : i32
    %c0_i32_0 = arith.constant 0 : i32
    %c0_i32_1 = arith.constant 0 : i32
    return %arg0, %c0_i32, %c0_i32_0 : i32, i32, i32
  }
  func.func @transform_5(%arg0: i32, %arg1: i32) -> (i32, i32, i32) {
    %c0_i32 = arith.constant 0 : i32
    %c0_i32_0 = arith.constant 0 : i32
    %c0_i32_1 = arith.constant 0 : i32
    return %arg0, %c0_i32, %c0_i32_0 : i32, i32, i32
  }
}

module attributes {stable_mosaic.version = 11 : i64} {
  func.func @bn_relu_kernel(%arg0: i32, %arg1: memref<1x64x128xf32, #tpu.memory_space<vmem>>, %arg2: memref<64x1xf32, #tpu.memory_space<vmem>>, %arg3: memref<64x1xf32, #tpu.memory_space<vmem>>, %arg4: memref<1x64x128xbf16, #tpu.memory_space<vmem>>) attributes {dimension_semantics = [#tpu.dimension_semantics<parallel>], iteration_bounds = array<i64: 1>, scalar_prefetch = 0 : i64, scratch_operands = 0 : i64, tpu.core_type = #tpu.core_type<tc>, window_params = [{transform_indices = @transform_0, window_bounds = array<i64: 1, 64, 128>}, {pipeline_mode = #tpu.pipeline_mode<synchronous>, transform_indices = @transform_1, window_bounds = array<i64: 64, 1>}, {pipeline_mode = #tpu.pipeline_mode<synchronous>, transform_indices = @transform_2, window_bounds = array<i64: 64, 1>}, {transform_indices = @transform_3, window_bounds = array<i64: 1, 64, 128>}]} {
    %c0 = arith.constant 0 : index
    %c0_0 = arith.constant 0 : index
    %c0_1 = arith.constant 0 : index
    %0 = vector.load %arg1[%c0, %c0_0, %c0_1] : memref<1x64x128xf32, #tpu.memory_space<vmem>>, vector<1x64x128xf32>
    %c0_2 = arith.constant 0 : index
    %c0_3 = arith.constant 0 : index
    %1 = vector.load %arg2[%c0_2, %c0_3] : memref<64x1xf32, #tpu.memory_space<vmem>>, vector<64x1xf32>
    %2 = vector.shape_cast %1 : vector<64x1xf32> to vector<1x64x1xf32>
    %3 = vector.broadcast %2 : vector<1x64x1xf32> to vector<1x64x128xf32>
    %4 = arith.mulf %0, %3 : vector<1x64x128xf32>
    %c0_4 = arith.constant 0 : index
    %c0_5 = arith.constant 0 : index
    %5 = vector.load %arg3[%c0_4, %c0_5] : memref<64x1xf32, #tpu.memory_space<vmem>>, vector<64x1xf32>
    %6 = vector.shape_cast %5 : vector<64x1xf32> to vector<1x64x1xf32>
    %7 = vector.broadcast %6 : vector<1x64x1xf32> to vector<1x64x128xf32>
    %8 = arith.addf %4, %7 : vector<1x64x128xf32>
    %cst = arith.constant 0.000000e+00 : f32
    %9 = vector.broadcast %cst : f32 to vector<1x64x128xf32>
    %10 = arith.maximumf %8, %9 : vector<1x64x128xf32>
    %11 = arith.truncf %10 : vector<1x64x128xf32> to vector<1x64x128xbf16>
    %c0_6 = arith.constant 0 : index
    %c0_7 = arith.constant 0 : index
    %c0_8 = arith.constant 0 : index
    %12 = vector.load %arg4[%c0_6, %c0_7, %c0_8] : memref<1x64x128xbf16, #tpu.memory_space<vmem>>, vector<1x64x128xbf16>
    tpu.vector_store %arg4[%c0_6, %c0_7, %c0_8], %11 {strides = array<i32>} : memref<1x64x128xbf16, #tpu.memory_space<vmem>>, vector<1x64x128xbf16>,
    return
  }
  func.func @transform_0(%arg0: i32) -> (i32, i32, i32) {
    %c0_i32 = arith.constant 0 : i32
    %c0_i32_0 = arith.constant 0 : i32
    %c0_i32_1 = arith.constant 0 : i32
    return %arg0, %c0_i32, %c0_i32_0 : i32, i32, i32
  }
  func.func @transform_1(%arg0: i32) -> (i32, i32) {
    %c0_i32 = arith.constant 0 : i32
    %c0_i32_0 = arith.constant 0 : i32
    %c0_i32_1 = arith.constant 0 : i32
    return %c0_i32, %c0_i32_0 : i32, i32
  }
  func.func @transform_2(%arg0: i32) -> (i32, i32) {
    %c0_i32 = arith.constant 0 : i32
    %c0_i32_0 = arith.constant 0 : i32
    %c0_i32_1 = arith.constant 0 : i32
    return %c0_i32, %c0_i32_0 : i32, i32
  }
  func.func @transform_3(%arg0: i32) -> (i32, i32, i32) {
    %c0_i32 = arith.constant 0 : i32
    %c0_i32_0 = arith.constant 0 : i32
    %c0_i32_1 = arith.constant 0 : i32
    return %arg0, %c0_i32, %c0_i32_0 : i32, i32, i32
  }
}

module attributes {stable_mosaic.version = 11 : i64} {
  func.func @bn_relu_kernel(%arg0: i32, %arg1: memref<1x32x128xf32, #tpu.memory_space<vmem>>, %arg2: memref<32x1xf32, #tpu.memory_space<vmem>>, %arg3: memref<32x1xf32, #tpu.memory_space<vmem>>, %arg4: memref<1x32x128xbf16, #tpu.memory_space<vmem>>) attributes {dimension_semantics = [#tpu.dimension_semantics<parallel>], iteration_bounds = array<i64: 4>, scalar_prefetch = 0 : i64, scratch_operands = 0 : i64, tpu.core_type = #tpu.core_type<tc>, window_params = [{transform_indices = @transform_0, window_bounds = array<i64: 1, 32, 128>}, {pipeline_mode = #tpu.pipeline_mode<synchronous>, transform_indices = @transform_1, window_bounds = array<i64: 32, 1>}, {pipeline_mode = #tpu.pipeline_mode<synchronous>, transform_indices = @transform_2, window_bounds = array<i64: 32, 1>}, {transform_indices = @transform_3, window_bounds = array<i64: 1, 32, 128>}]} {
    %c0 = arith.constant 0 : index
    %c0_0 = arith.constant 0 : index
    %c0_1 = arith.constant 0 : index
    %0 = vector.load %arg1[%c0, %c0_0, %c0_1] : memref<1x32x128xf32, #tpu.memory_space<vmem>>, vector<1x32x128xf32>
    %c0_2 = arith.constant 0 : index
    %c0_3 = arith.constant 0 : index
    %1 = vector.load %arg2[%c0_2, %c0_3] : memref<32x1xf32, #tpu.memory_space<vmem>>, vector<32x1xf32>
    %2 = vector.shape_cast %1 : vector<32x1xf32> to vector<1x32x1xf32>
    %3 = vector.broadcast %2 : vector<1x32x1xf32> to vector<1x32x128xf32>
    %4 = arith.mulf %0, %3 : vector<1x32x128xf32>
    %c0_4 = arith.constant 0 : index
    %c0_5 = arith.constant 0 : index
    %5 = vector.load %arg3[%c0_4, %c0_5] : memref<32x1xf32, #tpu.memory_space<vmem>>, vector<32x1xf32>
    %6 = vector.shape_cast %5 : vector<32x1xf32> to vector<1x32x1xf32>
    %7 = vector.broadcast %6 : vector<1x32x1xf32> to vector<1x32x128xf32>
    %8 = arith.addf %4, %7 : vector<1x32x128xf32>
    %cst = arith.constant 0.000000e+00 : f32
    %9 = vector.broadcast %cst : f32 to vector<1x32x128xf32>
    %10 = arith.maximumf %8, %9 : vector<1x32x128xf32>
    %11 = arith.truncf %10 : vector<1x32x128xf32> to vector<1x32x128xbf16>
    %c0_6 = arith.constant 0 : index
    %c0_7 = arith.constant 0 : index
    %c0_8 = arith.constant 0 : index
    %12 = vector.load %arg4[%c0_6, %c0_7, %c0_8] : memref<1x32x128xbf16, #tpu.memory_space<vmem>>, vector<1x32x128xbf16>
    tpu.vector_store %arg4[%c0_6, %c0_7, %c0_8], %11 {strides = array<i32>} : memref<1x32x128xbf16, #tpu.memory_space<vmem>>, vector<1x32x128xbf16>,
    return
  }
  func.func @transform_0(%arg0: i32) -> (i32, i32, i32) {
    %c0_i32 = arith.constant 0 : i32
    %c0_i32_0 = arith.constant 0 : i32
    %c0_i32_1 = arith.constant 0 : i32
    return %arg0, %c0_i32, %c0_i32_0 : i32, i32, i32
  }
  func.func @transform_1(%arg0: i32) -> (i32, i32) {
    %c0_i32 = arith.constant 0 : i32
    %c0_i32_0 = arith.constant 0 : i32
    %c0_i32_1 = arith.constant 0 : i32
    return %c0_i32, %c0_i32_0 : i32, i32
  }
  func.func @transform_2(%arg0: i32) -> (i32, i32) {
    %c0_i32 = arith.constant 0 : i32
    %c0_i32_0 = arith.constant 0 : i32
    %c0_i32_1 = arith.constant 0 : i32
    return %c0_i32, %c0_i32_0 : i32, i32
  }
  func.func @transform_3(%arg0: i32) -> (i32, i32, i32) {
    %c0_i32 = arith.constant 0 : i32
    %c0_i32_0 = arith.constant 0 : i32
    %c0_i32_1 = arith.constant 0 : i32
    return %arg0, %c0_i32, %c0_i32_0 : i32, i32, i32
  }
}

module attributes {stable_mosaic.version = 11 : i64} {
  func.func @convT_fused_kernel(%arg0: i32, %arg1: i32, %arg2: memref<1x32x256xbf16, #tpu.memory_space<vmem>>, %arg3: memref<1x256x128xbf16, #tpu.memory_space<vmem>>, %arg4: memref<32x1xf32, #tpu.memory_space<vmem>>, %arg5: memref<1x32x128xf32, #tpu.memory_space<vmem>>, %arg6: memref<1x32x1xf32, #tpu.memory_space<vmem>>, %arg7: memref<1x32x1xf32, #tpu.memory_space<vmem>>) attributes {dimension_semantics = [#tpu.dimension_semantics<parallel>, #tpu.dimension_semantics<arbitrary>], iteration_bounds = array<i64: 4, 1>, scalar_prefetch = 0 : i64, scratch_operands = 0 : i64, tpu.core_type = #tpu.core_type<tc>, window_params = [{transform_indices = @transform_0, window_bounds = array<i64: 1, 32, 256>}, {transform_indices = @transform_1, window_bounds = array<i64: 1, 256, 128>}, {pipeline_mode = #tpu.pipeline_mode<synchronous>, transform_indices = @transform_2, window_bounds = array<i64: 32, 1>}, {transform_indices = @transform_3, window_bounds = array<i64: 1, 32, 128>}, {transform_indices = @transform_4, window_bounds = array<i64: 1, 32, 1>}, {transform_indices = @transform_5, window_bounds = array<i64: 1, 32, 1>}]} {
    %c0 = arith.constant 0 : index
    %c0_0 = arith.constant 0 : index
    %c0_1 = arith.constant 0 : index
    %0 = vector.load %arg2[%c0, %c0_0, %c0_1] : memref<1x32x256xbf16, #tpu.memory_space<vmem>>, vector<1x32x256xbf16>
    %1 = vector.shape_cast %0 : vector<1x32x256xbf16> to vector<32x256xbf16>
    %c0_2 = arith.constant 0 : index
    %c0_3 = arith.constant 0 : index
    %c0_4 = arith.constant 0 : index
    %2 = vector.load %arg3[%c0_2, %c0_3, %c0_4] : memref<1x256x128xbf16, #tpu.memory_space<vmem>>, vector<1x256x128xbf16>
    %3 = vector.shape_cast %2 : vector<1x256x128xbf16> to vector<256x128xbf16>
    %cst = arith.constant dense<0.000000e+00> : vector<32x128xf32>
    %4 = tpu.matmul %1, %3, %cst {dimension_numbers = #tpu.dot_dimension_numbers<[1], [0], [0], [1], [0, 0, 1, 1], [], []>} : vector<32x256xbf16>, vector<256x128xbf16>, vector<32x128xf32> -> vector<32x128xf32>
    %c0_5 = arith.constant 0 : index
    %c0_6 = arith.constant 0 : index
    %5 = vector.load %arg4[%c0_5, %c0_6] : memref<32x1xf32, #tpu.memory_space<vmem>>, vector<32x1xf32>
    %6 = vector.broadcast %5 : vector<32x1xf32> to vector<32x128xf32>
    %7 = arith.addf %4, %6 : vector<32x128xf32>
    %c0_7 = arith.constant 0 : index
    %c0_8 = arith.constant 0 : index
    %c0_9 = arith.constant 0 : index
    %8 = vector.load %arg5[%c0_7, %c0_8, %c0_9] : memref<1x32x128xf32, #tpu.memory_space<vmem>>, vector<1x32x128xf32>
    %9 = vector.shape_cast %8 : vector<1x32x128xf32> to vector<32x128xf32>
    %10 = vector.shape_cast %7 : vector<32x128xf32> to vector<1x32x128xf32>
    tpu.vector_store %arg5[%c0_7, %c0_8, %c0_9], %10 {strides = array<i32>} : memref<1x32x128xf32, #tpu.memory_space<vmem>>, vector<1x32x128xf32>,
    %c0_i32 = arith.constant 0 : i32
    %11 = arith.cmpi eq, %arg1, %c0_i32 : i32
    %12 = arith.extui %11 : i1 to i32
    %c0_i32_10 = arith.constant 0 : i32
    %13 = arith.cmpi ne, %12, %c0_i32_10 : i32
    scf.if %13 {
      %cst_25 = arith.constant 0.000000e+00 : f32
      %31 = vector.broadcast %cst_25 : f32 to vector<1x32x1xf32>
      %c0_26 = arith.constant 0 : index
      %c0_27 = arith.constant 0 : index
      %c0_28 = arith.constant 0 : index
      %32 = vector.load %arg6[%c0_26, %c0_27, %c0_28] : memref<1x32x1xf32, #tpu.memory_space<vmem>>, vector<1x32x1xf32>
      tpu.vector_store %arg6[%c0_26, %c0_27, %c0_28], %31 {strides = array<i32>} : memref<1x32x1xf32, #tpu.memory_space<vmem>>, vector<1x32x1xf32>,
      %cst_29 = arith.constant 0.000000e+00 : f32
      %33 = vector.broadcast %cst_29 : f32 to vector<1x32x1xf32>
      %c0_30 = arith.constant 0 : index
      %c0_31 = arith.constant 0 : index
      %c0_32 = arith.constant 0 : index
      %34 = vector.load %arg7[%c0_30, %c0_31, %c0_32] : memref<1x32x1xf32, #tpu.memory_space<vmem>>, vector<1x32x1xf32>
      tpu.vector_store %arg7[%c0_30, %c0_31, %c0_32], %33 {strides = array<i32>} : memref<1x32x1xf32, #tpu.memory_space<vmem>>, vector<1x32x1xf32>,
    } else {
    }
    %c0_11 = arith.constant 0 : index
    %c0_12 = arith.constant 0 : index
    %c0_13 = arith.constant 0 : index
    %14 = vector.load %arg6[%c0_11, %c0_12, %c0_13] : memref<1x32x1xf32, #tpu.memory_space<vmem>>, vector<1x32x1xf32>
    %15 = vector.shape_cast %14 : vector<1x32x1xf32> to vector<32x1xf32>
    %cst_14 = arith.constant dense<0.000000e+00> : vector<32xf32>
    %16 = vector.multi_reduction <add>, %7, %cst_14 [1] : vector<32x128xf32> to vector<32xf32>
    %17 = vector.shape_cast %16 : vector<32xf32> to vector<32x1xf32>
    %18 = arith.addf %15, %17 : vector<32x1xf32>
    %c0_15 = arith.constant 0 : index
    %c0_16 = arith.constant 0 : index
    %c0_17 = arith.constant 0 : index
    %19 = vector.load %arg6[%c0_15, %c0_16, %c0_17] : memref<1x32x1xf32, #tpu.memory_space<vmem>>, vector<1x32x1xf32>
    %20 = vector.shape_cast %19 : vector<1x32x1xf32> to vector<32x1xf32>
    %21 = vector.shape_cast %18 : vector<32x1xf32> to vector<1x32x1xf32>
    tpu.vector_store %arg6[%c0_15, %c0_16, %c0_17], %21 {strides = array<i32>} : memref<1x32x1xf32, #tpu.memory_space<vmem>>, vector<1x32x1xf32>,
    %c0_18 = arith.constant 0 : index
    %c0_19 = arith.constant 0 : index
    %c0_20 = arith.constant 0 : index
    %22 = vector.load %arg7[%c0_18, %c0_19, %c0_20] : memref<1x32x1xf32, #tpu.memory_space<vmem>>, vector<1x32x1xf32>
    %23 = vector.shape_cast %22 : vector<1x32x1xf32> to vector<32x1xf32>
    %24 = arith.mulf %7, %7 : vector<32x128xf32>
    %cst_21 = arith.constant dense<0.000000e+00> : vector<32xf32>
    %25 = vector.multi_reduction <add>, %24, %cst_21 [1] : vector<32x128xf32> to vector<32xf32>
    %26 = vector.shape_cast %25 : vector<32xf32> to vector<32x1xf32>
    %27 = arith.addf %23, %26 : vector<32x1xf32>
    %c0_22 = arith.constant 0 : index
    %c0_23 = arith.constant 0 : index
    %c0_24 = arith.constant 0 : index
    %28 = vector.load %arg7[%c0_22, %c0_23, %c0_24] : memref<1x32x1xf32, #tpu.memory_space<vmem>>, vector<1x32x1xf32>
    %29 = vector.shape_cast %28 : vector<1x32x1xf32> to vector<32x1xf32>
    %30 = vector.shape_cast %27 : vector<32x1xf32> to vector<1x32x1xf32>
    tpu.vector_store %arg7[%c0_22, %c0_23, %c0_24], %30 {strides = array<i32>} : memref<1x32x1xf32, #tpu.memory_space<vmem>>, vector<1x32x1xf32>,
    return
  }
  func.func @transform_0(%arg0: i32, %arg1: i32) -> (i32, i32, i32) {
    %c0_i32 = arith.constant 0 : i32
    %c0_i32_0 = arith.constant 0 : i32
    %c0_i32_1 = arith.constant 0 : i32
    return %arg0, %c0_i32, %c0_i32_0 : i32, i32, i32
  }
  func.func @transform_1(%arg0: i32, %arg1: i32) -> (i32, i32, i32) {
    %c0_i32 = arith.constant 0 : i32
    %c0_i32_0 = arith.constant 0 : i32
    return %arg0, %c0_i32, %arg1 : i32, i32, i32
  }
  func.func @transform_2(%arg0: i32, %arg1: i32) -> (i32, i32) {
    %c0_i32 = arith.constant 0 : i32
    %c0_i32_0 = arith.constant 0 : i32
    %c0_i32_1 = arith.constant 0 : i32
    return %c0_i32, %c0_i32_0 : i32, i32
  }
  func.func @transform_3(%arg0: i32, %arg1: i32) -> (i32, i32, i32) {
    %c0_i32 = arith.constant 0 : i32
    %c0_i32_0 = arith.constant 0 : i32
    return %arg0, %c0_i32, %arg1 : i32, i32, i32
  }
  func.func @transform_4(%arg0: i32, %arg1: i32) -> (i32, i32, i32) {
    %c0_i32 = arith.constant 0 : i32
    %c0_i32_0 = arith.constant 0 : i32
    %c0_i32_1 = arith.constant 0 : i32
    return %arg0, %c0_i32, %c0_i32_0 : i32, i32, i32
  }
  func.func @transform_5(%arg0: i32, %arg1: i32) -> (i32, i32, i32) {
    %c0_i32 = arith.constant 0 : i32
    %c0_i32_0 = arith.constant 0 : i32
    %c0_i32_1 = arith.constant 0 : i32
    return %arg0, %c0_i32, %c0_i32_0 : i32, i32, i32
  }
}

module attributes {stable_mosaic.version = 11 : i64} {
  func.func @convT_fused_kernel(%arg0: i32, %arg1: i32, %arg2: memref<1x16x128xbf16, #tpu.memory_space<vmem>>, %arg3: memref<1x128x384xbf16, #tpu.memory_space<vmem>>, %arg4: memref<16x1xf32, #tpu.memory_space<vmem>>, %arg5: memref<1x16x384xf32, #tpu.memory_space<vmem>>, %arg6: memref<1x16x1xf32, #tpu.memory_space<vmem>>, %arg7: memref<1x16x1xf32, #tpu.memory_space<vmem>>) attributes {dimension_semantics = [#tpu.dimension_semantics<parallel>, #tpu.dimension_semantics<arbitrary>], iteration_bounds = array<i64: 4, 1>, scalar_prefetch = 0 : i64, scratch_operands = 0 : i64, tpu.core_type = #tpu.core_type<tc>, window_params = [{transform_indices = @transform_0, window_bounds = array<i64: 1, 16, 128>}, {transform_indices = @transform_1, window_bounds = array<i64: 1, 128, 384>}, {pipeline_mode = #tpu.pipeline_mode<synchronous>, transform_indices = @transform_2, window_bounds = array<i64: 16, 1>}, {transform_indices = @transform_3, window_bounds = array<i64: 1, 16, 384>}, {transform_indices = @transform_4, window_bounds = array<i64: 1, 16, 1>}, {transform_indices = @transform_5, window_bounds = array<i64: 1, 16, 1>}]} {
    %c0 = arith.constant 0 : index
    %c0_0 = arith.constant 0 : index
    %c0_1 = arith.constant 0 : index
    %0 = vector.load %arg2[%c0, %c0_0, %c0_1] : memref<1x16x128xbf16, #tpu.memory_space<vmem>>, vector<1x16x128xbf16>
    %1 = vector.shape_cast %0 : vector<1x16x128xbf16> to vector<16x128xbf16>
    %c0_2 = arith.constant 0 : index
    %c0_3 = arith.constant 0 : index
    %c0_4 = arith.constant 0 : index
    %2 = vector.load %arg3[%c0_2, %c0_3, %c0_4] : memref<1x128x384xbf16, #tpu.memory_space<vmem>>, vector<1x128x384xbf16>
    %3 = vector.shape_cast %2 : vector<1x128x384xbf16> to vector<128x384xbf16>
    %cst = arith.constant dense<0.000000e+00> : vector<16x384xf32>
    %4 = tpu.matmul %1, %3, %cst {dimension_numbers = #tpu.dot_dimension_numbers<[1], [0], [0], [1], [0, 0, 1, 1], [], []>} : vector<16x128xbf16>, vector<128x384xbf16>, vector<16x384xf32> -> vector<16x384xf32>
    %c0_5 = arith.constant 0 : index
    %c0_6 = arith.constant 0 : index
    %5 = vector.load %arg4[%c0_5, %c0_6] : memref<16x1xf32, #tpu.memory_space<vmem>>, vector<16x1xf32>
    %6 = vector.broadcast %5 : vector<16x1xf32> to vector<16x384xf32>
    %7 = arith.addf %4, %6 : vector<16x384xf32>
    %c0_7 = arith.constant 0 : index
    %c0_8 = arith.constant 0 : index
    %c0_9 = arith.constant 0 : index
    %8 = vector.load %arg5[%c0_7, %c0_8, %c0_9] : memref<1x16x384xf32, #tpu.memory_space<vmem>>, vector<1x16x384xf32>
    %9 = vector.shape_cast %8 : vector<1x16x384xf32> to vector<16x384xf32>
    %10 = vector.shape_cast %7 : vector<16x384xf32> to vector<1x16x384xf32>
    tpu.vector_store %arg5[%c0_7, %c0_8, %c0_9], %10 {strides = array<i32>} : memref<1x16x384xf32, #tpu.memory_space<vmem>>, vector<1x16x384xf32>,
    %c0_i32 = arith.constant 0 : i32
    %11 = arith.cmpi eq, %arg1, %c0_i32 : i32
    %12 = arith.extui %11 : i1 to i32
    %c0_i32_10 = arith.constant 0 : i32
    %13 = arith.cmpi ne, %12, %c0_i32_10 : i32
    scf.if %13 {
      %cst_25 = arith.constant 0.000000e+00 : f32
      %31 = vector.broadcast %cst_25 : f32 to vector<1x16x1xf32>
      %c0_26 = arith.constant 0 : index
      %c0_27 = arith.constant 0 : index
      %c0_28 = arith.constant 0 : index
      %32 = vector.load %arg6[%c0_26, %c0_27, %c0_28] : memref<1x16x1xf32, #tpu.memory_space<vmem>>, vector<1x16x1xf32>
      tpu.vector_store %arg6[%c0_26, %c0_27, %c0_28], %31 {strides = array<i32>} : memref<1x16x1xf32, #tpu.memory_space<vmem>>, vector<1x16x1xf32>,
      %cst_29 = arith.constant 0.000000e+00 : f32
      %33 = vector.broadcast %cst_29 : f32 to vector<1x16x1xf32>
      %c0_30 = arith.constant 0 : index
      %c0_31 = arith.constant 0 : index
      %c0_32 = arith.constant 0 : index
      %34 = vector.load %arg7[%c0_30, %c0_31, %c0_32] : memref<1x16x1xf32, #tpu.memory_space<vmem>>, vector<1x16x1xf32>
      tpu.vector_store %arg7[%c0_30, %c0_31, %c0_32], %33 {strides = array<i32>} : memref<1x16x1xf32, #tpu.memory_space<vmem>>, vector<1x16x1xf32>,
    } else {
    }
    %c0_11 = arith.constant 0 : index
    %c0_12 = arith.constant 0 : index
    %c0_13 = arith.constant 0 : index
    %14 = vector.load %arg6[%c0_11, %c0_12, %c0_13] : memref<1x16x1xf32, #tpu.memory_space<vmem>>, vector<1x16x1xf32>
    %15 = vector.shape_cast %14 : vector<1x16x1xf32> to vector<16x1xf32>
    %cst_14 = arith.constant dense<0.000000e+00> : vector<16xf32>
    %16 = vector.multi_reduction <add>, %7, %cst_14 [1] : vector<16x384xf32> to vector<16xf32>
    %17 = vector.shape_cast %16 : vector<16xf32> to vector<16x1xf32>
    %18 = arith.addf %15, %17 : vector<16x1xf32>
    %c0_15 = arith.constant 0 : index
    %c0_16 = arith.constant 0 : index
    %c0_17 = arith.constant 0 : index
    %19 = vector.load %arg6[%c0_15, %c0_16, %c0_17] : memref<1x16x1xf32, #tpu.memory_space<vmem>>, vector<1x16x1xf32>
    %20 = vector.shape_cast %19 : vector<1x16x1xf32> to vector<16x1xf32>
    %21 = vector.shape_cast %18 : vector<16x1xf32> to vector<1x16x1xf32>
    tpu.vector_store %arg6[%c0_15, %c0_16, %c0_17], %21 {strides = array<i32>} : memref<1x16x1xf32, #tpu.memory_space<vmem>>, vector<1x16x1xf32>,
    %c0_18 = arith.constant 0 : index
    %c0_19 = arith.constant 0 : index
    %c0_20 = arith.constant 0 : index
    %22 = vector.load %arg7[%c0_18, %c0_19, %c0_20] : memref<1x16x1xf32, #tpu.memory_space<vmem>>, vector<1x16x1xf32>
    %23 = vector.shape_cast %22 : vector<1x16x1xf32> to vector<16x1xf32>
    %24 = arith.mulf %7, %7 : vector<16x384xf32>
    %cst_21 = arith.constant dense<0.000000e+00> : vector<16xf32>
    %25 = vector.multi_reduction <add>, %24, %cst_21 [1] : vector<16x384xf32> to vector<16xf32>
    %26 = vector.shape_cast %25 : vector<16xf32> to vector<16x1xf32>
    %27 = arith.addf %23, %26 : vector<16x1xf32>
    %c0_22 = arith.constant 0 : index
    %c0_23 = arith.constant 0 : index
    %c0_24 = arith.constant 0 : index
    %28 = vector.load %arg7[%c0_22, %c0_23, %c0_24] : memref<1x16x1xf32, #tpu.memory_space<vmem>>, vector<1x16x1xf32>
    %29 = vector.shape_cast %28 : vector<1x16x1xf32> to vector<16x1xf32>
    %30 = vector.shape_cast %27 : vector<16x1xf32> to vector<1x16x1xf32>
    tpu.vector_store %arg7[%c0_22, %c0_23, %c0_24], %30 {strides = array<i32>} : memref<1x16x1xf32, #tpu.memory_space<vmem>>, vector<1x16x1xf32>,
    return
  }
  func.func @transform_0(%arg0: i32, %arg1: i32) -> (i32, i32, i32) {
    %c0_i32 = arith.constant 0 : i32
    %c0_i32_0 = arith.constant 0 : i32
    %c0_i32_1 = arith.constant 0 : i32
    return %arg0, %c0_i32, %c0_i32_0 : i32, i32, i32
  }
  func.func @transform_1(%arg0: i32, %arg1: i32) -> (i32, i32, i32) {
    %c0_i32 = arith.constant 0 : i32
    %c0_i32_0 = arith.constant 0 : i32
    return %arg0, %c0_i32, %arg1 : i32, i32, i32
  }
  func.func @transform_2(%arg0: i32, %arg1: i32) -> (i32, i32) {
    %c0_i32 = arith.constant 0 : i32
    %c0_i32_0 = arith.constant 0 : i32
    %c0_i32_1 = arith.constant 0 : i32
    return %c0_i32, %c0_i32_0 : i32, i32
  }
  func.func @transform_3(%arg0: i32, %arg1: i32) -> (i32, i32, i32) {
    %c0_i32 = arith.constant 0 : i32
    %c0_i32_0 = arith.constant 0 : i32
    return %arg0, %c0_i32, %arg1 : i32, i32, i32
  }
  func.func @transform_4(%arg0: i32, %arg1: i32) -> (i32, i32, i32) {
    %c0_i32 = arith.constant 0 : i32
    %c0_i32_0 = arith.constant 0 : i32
    %c0_i32_1 = arith.constant 0 : i32
    return %arg0, %c0_i32, %c0_i32_0 : i32, i32, i32
  }
  func.func @transform_5(%arg0: i32, %arg1: i32) -> (i32, i32, i32) {
    %c0_i32 = arith.constant 0 : i32
    %c0_i32_0 = arith.constant 0 : i32
    %c0_i32_1 = arith.constant 0 : i32
    return %arg0, %c0_i32, %c0_i32_0 : i32, i32, i32
  }
}

module attributes {stable_mosaic.version = 11 : i64} {
  func.func @bn_relu_kernel(%arg0: i32, %arg1: memref<1x16x384xf32, #tpu.memory_space<vmem>>, %arg2: memref<16x1xf32, #tpu.memory_space<vmem>>, %arg3: memref<16x1xf32, #tpu.memory_space<vmem>>, %arg4: memref<1x16x384xbf16, #tpu.memory_space<vmem>>) attributes {dimension_semantics = [#tpu.dimension_semantics<parallel>], iteration_bounds = array<i64: 4>, scalar_prefetch = 0 : i64, scratch_operands = 0 : i64, tpu.core_type = #tpu.core_type<tc>, window_params = [{transform_indices = @transform_0, window_bounds = array<i64: 1, 16, 384>}, {pipeline_mode = #tpu.pipeline_mode<synchronous>, transform_indices = @transform_1, window_bounds = array<i64: 16, 1>}, {pipeline_mode = #tpu.pipeline_mode<synchronous>, transform_indices = @transform_2, window_bounds = array<i64: 16, 1>}, {transform_indices = @transform_3, window_bounds = array<i64: 1, 16, 384>}]} {
    %c0 = arith.constant 0 : index
    %c0_0 = arith.constant 0 : index
    %c0_1 = arith.constant 0 : index
    %0 = vector.load %arg1[%c0, %c0_0, %c0_1] : memref<1x16x384xf32, #tpu.memory_space<vmem>>, vector<1x16x384xf32>
    %c0_2 = arith.constant 0 : index
    %c0_3 = arith.constant 0 : index
    %1 = vector.load %arg2[%c0_2, %c0_3] : memref<16x1xf32, #tpu.memory_space<vmem>>, vector<16x1xf32>
    %2 = vector.shape_cast %1 : vector<16x1xf32> to vector<1x16x1xf32>
    %3 = vector.broadcast %2 : vector<1x16x1xf32> to vector<1x16x384xf32>
    %4 = arith.mulf %0, %3 : vector<1x16x384xf32>
    %c0_4 = arith.constant 0 : index
    %c0_5 = arith.constant 0 : index
    %5 = vector.load %arg3[%c0_4, %c0_5] : memref<16x1xf32, #tpu.memory_space<vmem>>, vector<16x1xf32>
    %6 = vector.shape_cast %5 : vector<16x1xf32> to vector<1x16x1xf32>
    %7 = vector.broadcast %6 : vector<1x16x1xf32> to vector<1x16x384xf32>
    %8 = arith.addf %4, %7 : vector<1x16x384xf32>
    %cst = arith.constant 0.000000e+00 : f32
    %9 = vector.broadcast %cst : f32 to vector<1x16x384xf32>
    %10 = arith.maximumf %8, %9 : vector<1x16x384xf32>
    %11 = arith.truncf %10 : vector<1x16x384xf32> to vector<1x16x384xbf16>
    %c0_6 = arith.constant 0 : index
    %c0_7 = arith.constant 0 : index
    %c0_8 = arith.constant 0 : index
    %12 = vector.load %arg4[%c0_6, %c0_7, %c0_8] : memref<1x16x384xbf16, #tpu.memory_space<vmem>>, vector<1x16x384xbf16>
    tpu.vector_store %arg4[%c0_6, %c0_7, %c0_8], %11 {strides = array<i32>} : memref<1x16x384xbf16, #tpu.memory_space<vmem>>, vector<1x16x384xbf16>,
    return
  }
  func.func @transform_0(%arg0: i32) -> (i32, i32, i32) {
    %c0_i32 = arith.constant 0 : i32
    %c0_i32_0 = arith.constant 0 : i32
    %c0_i32_1 = arith.constant 0 : i32
    return %arg0, %c0_i32, %c0_i32_0 : i32, i32, i32
  }
  func.func @transform_1(%arg0: i32) -> (i32, i32) {
    %c0_i32 = arith.constant 0 : i32
    %c0_i32_0 = arith.constant 0 : i32
    %c0_i32_1 = arith.constant 0 : i32
    return %c0_i32, %c0_i32_0 : i32, i32
  }
  func.func @transform_2(%arg0: i32) -> (i32, i32) {
    %c0_i32 = arith.constant 0 : i32
    %c0_i32_0 = arith.constant 0 : i32
    %c0_i32_1 = arith.constant 0 : i32
    return %c0_i32, %c0_i32_0 : i32, i32
  }
  func.func @transform_3(%arg0: i32) -> (i32, i32, i32) {
    %c0_i32 = arith.constant 0 : i32
    %c0_i32_0 = arith.constant 0 : i32
    %c0_i32_1 = arith.constant 0 : i32
    return %arg0, %c0_i32, %c0_i32_0 : i32, i32, i32
  }
}

module attributes {stable_mosaic.version = 11 : i64} {
  func.func @convT_fused_kernel(%arg0: i32, %arg1: i32, %arg2: memref<1x8x64xbf16, #tpu.memory_space<vmem>>, %arg3: memref<1x64x1280xbf16, #tpu.memory_space<vmem>>, %arg4: memref<8x1xf32, #tpu.memory_space<vmem>>, %arg5: memref<1x8x1280xf32, #tpu.memory_space<vmem>>, %arg6: memref<1x8x1xf32, #tpu.memory_space<vmem>>, %arg7: memref<1x8x1xf32, #tpu.memory_space<vmem>>) attributes {dimension_semantics = [#tpu.dimension_semantics<parallel>, #tpu.dimension_semantics<arbitrary>], iteration_bounds = array<i64: 4, 1>, scalar_prefetch = 0 : i64, scratch_operands = 0 : i64, tpu.core_type = #tpu.core_type<tc>, window_params = [{transform_indices = @transform_0, window_bounds = array<i64: 1, 8, 64>}, {transform_indices = @transform_1, window_bounds = array<i64: 1, 64, 1280>}, {pipeline_mode = #tpu.pipeline_mode<synchronous>, transform_indices = @transform_2, window_bounds = array<i64: 8, 1>}, {transform_indices = @transform_3, window_bounds = array<i64: 1, 8, 1280>}, {transform_indices = @transform_4, window_bounds = array<i64: 1, 8, 1>}, {transform_indices = @transform_5, window_bounds = array<i64: 1, 8, 1>}]} {
    %c0 = arith.constant 0 : index
    %c0_0 = arith.constant 0 : index
    %c0_1 = arith.constant 0 : index
    %0 = vector.load %arg2[%c0, %c0_0, %c0_1] : memref<1x8x64xbf16, #tpu.memory_space<vmem>>, vector<1x8x64xbf16>
    %1 = vector.shape_cast %0 : vector<1x8x64xbf16> to vector<8x64xbf16>
    %c0_2 = arith.constant 0 : index
    %c0_3 = arith.constant 0 : index
    %c0_4 = arith.constant 0 : index
    %2 = vector.load %arg3[%c0_2, %c0_3, %c0_4] : memref<1x64x1280xbf16, #tpu.memory_space<vmem>>, vector<1x64x1280xbf16>
    %3 = vector.shape_cast %2 : vector<1x64x1280xbf16> to vector<64x1280xbf16>
    %cst = arith.constant dense<0.000000e+00> : vector<8x1280xf32>
    %4 = tpu.matmul %1, %3, %cst {dimension_numbers = #tpu.dot_dimension_numbers<[1], [0], [0], [1], [0, 0, 1, 1], [], []>} : vector<8x64xbf16>, vector<64x1280xbf16>, vector<8x1280xf32> -> vector<8x1280xf32>
    %c0_5 = arith.constant 0 : index
    %c0_6 = arith.constant 0 : index
    %5 = vector.load %arg4[%c0_5, %c0_6] : memref<8x1xf32, #tpu.memory_space<vmem>>, vector<8x1xf32>
    %6 = vector.broadcast %5 : vector<8x1xf32> to vector<8x1280xf32>
    %7 = arith.addf %4, %6 : vector<8x1280xf32>
    %c0_7 = arith.constant 0 : index
    %c0_8 = arith.constant 0 : index
    %c0_9 = arith.constant 0 : index
    %8 = vector.load %arg5[%c0_7, %c0_8, %c0_9] : memref<1x8x1280xf32, #tpu.memory_space<vmem>>, vector<1x8x1280xf32>
    %9 = vector.shape_cast %8 : vector<1x8x1280xf32> to vector<8x1280xf32>
    %10 = vector.shape_cast %7 : vector<8x1280xf32> to vector<1x8x1280xf32>
    tpu.vector_store %arg5[%c0_7, %c0_8, %c0_9], %10 {strides = array<i32>} : memref<1x8x1280xf32, #tpu.memory_space<vmem>>, vector<1x8x1280xf32>,
    %c0_i32 = arith.constant 0 : i32
    %11 = arith.cmpi eq, %arg1, %c0_i32 : i32
    %12 = arith.extui %11 : i1 to i32
    %c0_i32_10 = arith.constant 0 : i32
    %13 = arith.cmpi ne, %12, %c0_i32_10 : i32
    scf.if %13 {
      %cst_25 = arith.constant 0.000000e+00 : f32
      %31 = vector.broadcast %cst_25 : f32 to vector<1x8x1xf32>
      %c0_26 = arith.constant 0 : index
      %c0_27 = arith.constant 0 : index
      %c0_28 = arith.constant 0 : index
      %32 = vector.load %arg6[%c0_26, %c0_27, %c0_28] : memref<1x8x1xf32, #tpu.memory_space<vmem>>, vector<1x8x1xf32>
      tpu.vector_store %arg6[%c0_26, %c0_27, %c0_28], %31 {strides = array<i32>} : memref<1x8x1xf32, #tpu.memory_space<vmem>>, vector<1x8x1xf32>,
      %cst_29 = arith.constant 0.000000e+00 : f32
      %33 = vector.broadcast %cst_29 : f32 to vector<1x8x1xf32>
      %c0_30 = arith.constant 0 : index
      %c0_31 = arith.constant 0 : index
      %c0_32 = arith.constant 0 : index
      %34 = vector.load %arg7[%c0_30, %c0_31, %c0_32] : memref<1x8x1xf32, #tpu.memory_space<vmem>>, vector<1x8x1xf32>
      tpu.vector_store %arg7[%c0_30, %c0_31, %c0_32], %33 {strides = array<i32>} : memref<1x8x1xf32, #tpu.memory_space<vmem>>, vector<1x8x1xf32>,
    } else {
    }
    %c0_11 = arith.constant 0 : index
    %c0_12 = arith.constant 0 : index
    %c0_13 = arith.constant 0 : index
    %14 = vector.load %arg6[%c0_11, %c0_12, %c0_13] : memref<1x8x1xf32, #tpu.memory_space<vmem>>, vector<1x8x1xf32>
    %15 = vector.shape_cast %14 : vector<1x8x1xf32> to vector<8x1xf32>
    %cst_14 = arith.constant dense<0.000000e+00> : vector<8xf32>
    %16 = vector.multi_reduction <add>, %7, %cst_14 [1] : vector<8x1280xf32> to vector<8xf32>
    %17 = vector.shape_cast %16 : vector<8xf32> to vector<8x1xf32>
    %18 = arith.addf %15, %17 : vector<8x1xf32>
    %c0_15 = arith.constant 0 : index
    %c0_16 = arith.constant 0 : index
    %c0_17 = arith.constant 0 : index
    %19 = vector.load %arg6[%c0_15, %c0_16, %c0_17] : memref<1x8x1xf32, #tpu.memory_space<vmem>>, vector<1x8x1xf32>
    %20 = vector.shape_cast %19 : vector<1x8x1xf32> to vector<8x1xf32>
    %21 = vector.shape_cast %18 : vector<8x1xf32> to vector<1x8x1xf32>
    tpu.vector_store %arg6[%c0_15, %c0_16, %c0_17], %21 {strides = array<i32>} : memref<1x8x1xf32, #tpu.memory_space<vmem>>, vector<1x8x1xf32>,
    %c0_18 = arith.constant 0 : index
    %c0_19 = arith.constant 0 : index
    %c0_20 = arith.constant 0 : index
    %22 = vector.load %arg7[%c0_18, %c0_19, %c0_20] : memref<1x8x1xf32, #tpu.memory_space<vmem>>, vector<1x8x1xf32>
    %23 = vector.shape_cast %22 : vector<1x8x1xf32> to vector<8x1xf32>
    %24 = arith.mulf %7, %7 : vector<8x1280xf32>
    %cst_21 = arith.constant dense<0.000000e+00> : vector<8xf32>
    %25 = vector.multi_reduction <add>, %24, %cst_21 [1] : vector<8x1280xf32> to vector<8xf32>
    %26 = vector.shape_cast %25 : vector<8xf32> to vector<8x1xf32>
    %27 = arith.addf %23, %26 : vector<8x1xf32>
    %c0_22 = arith.constant 0 : index
    %c0_23 = arith.constant 0 : index
    %c0_24 = arith.constant 0 : index
    %28 = vector.load %arg7[%c0_22, %c0_23, %c0_24] : memref<1x8x1xf32, #tpu.memory_space<vmem>>, vector<1x8x1xf32>
    %29 = vector.shape_cast %28 : vector<1x8x1xf32> to vector<8x1xf32>
    %30 = vector.shape_cast %27 : vector<8x1xf32> to vector<1x8x1xf32>
    tpu.vector_store %arg7[%c0_22, %c0_23, %c0_24], %30 {strides = array<i32>} : memref<1x8x1xf32, #tpu.memory_space<vmem>>, vector<1x8x1xf32>,
    return
  }
  func.func @transform_0(%arg0: i32, %arg1: i32) -> (i32, i32, i32) {
    %c0_i32 = arith.constant 0 : i32
    %c0_i32_0 = arith.constant 0 : i32
    %c0_i32_1 = arith.constant 0 : i32
    return %arg0, %c0_i32, %c0_i32_0 : i32, i32, i32
  }
  func.func @transform_1(%arg0: i32, %arg1: i32) -> (i32, i32, i32) {
    %c0_i32 = arith.constant 0 : i32
    %c0_i32_0 = arith.constant 0 : i32
    return %arg0, %c0_i32, %arg1 : i32, i32, i32
  }
  func.func @transform_2(%arg0: i32, %arg1: i32) -> (i32, i32) {
    %c0_i32 = arith.constant 0 : i32
    %c0_i32_0 = arith.constant 0 : i32
    %c0_i32_1 = arith.constant 0 : i32
    return %c0_i32, %c0_i32_0 : i32, i32
  }
  func.func @transform_3(%arg0: i32, %arg1: i32) -> (i32, i32, i32) {
    %c0_i32 = arith.constant 0 : i32
    %c0_i32_0 = arith.constant 0 : i32
    return %arg0, %c0_i32, %arg1 : i32, i32, i32
  }
  func.func @transform_4(%arg0: i32, %arg1: i32) -> (i32, i32, i32) {
    %c0_i32 = arith.constant 0 : i32
    %c0_i32_0 = arith.constant 0 : i32
    %c0_i32_1 = arith.constant 0 : i32
    return %arg0, %c0_i32, %c0_i32_0 : i32, i32, i32
  }
  func.func @transform_5(%arg0: i32, %arg1: i32) -> (i32, i32, i32) {
    %c0_i32 = arith.constant 0 : i32
    %c0_i32_0 = arith.constant 0 : i32
    %c0_i32_1 = arith.constant 0 : i32
    return %arg0, %c0_i32, %c0_i32_0 : i32, i32, i32
  }
}

module attributes {stable_mosaic.version = 11 : i64} {
  func.func @bn_relu_kernel(%arg0: i32, %arg1: memref<1x8x1280xf32, #tpu.memory_space<vmem>>, %arg2: memref<8x1xf32, #tpu.memory_space<vmem>>, %arg3: memref<8x1xf32, #tpu.memory_space<vmem>>, %arg4: memref<1x8x1280xbf16, #tpu.memory_space<vmem>>) attributes {dimension_semantics = [#tpu.dimension_semantics<parallel>], iteration_bounds = array<i64: 4>, scalar_prefetch = 0 : i64, scratch_operands = 0 : i64, tpu.core_type = #tpu.core_type<tc>, window_params = [{transform_indices = @transform_0, window_bounds = array<i64: 1, 8, 1280>}, {pipeline_mode = #tpu.pipeline_mode<synchronous>, transform_indices = @transform_1, window_bounds = array<i64: 8, 1>}, {pipeline_mode = #tpu.pipeline_mode<synchronous>, transform_indices = @transform_2, window_bounds = array<i64: 8, 1>}, {transform_indices = @transform_3, window_bounds = array<i64: 1, 8, 1280>}]} {
    %c0 = arith.constant 0 : index
    %c0_0 = arith.constant 0 : index
    %c0_1 = arith.constant 0 : index
    %0 = vector.load %arg1[%c0, %c0_0, %c0_1] : memref<1x8x1280xf32, #tpu.memory_space<vmem>>, vector<1x8x1280xf32>
    %c0_2 = arith.constant 0 : index
    %c0_3 = arith.constant 0 : index
    %1 = vector.load %arg2[%c0_2, %c0_3] : memref<8x1xf32, #tpu.memory_space<vmem>>, vector<8x1xf32>
    %2 = vector.shape_cast %1 : vector<8x1xf32> to vector<1x8x1xf32>
    %3 = vector.broadcast %2 : vector<1x8x1xf32> to vector<1x8x1280xf32>
    %4 = arith.mulf %0, %3 : vector<1x8x1280xf32>
    %c0_4 = arith.constant 0 : index
    %c0_5 = arith.constant 0 : index
    %5 = vector.load %arg3[%c0_4, %c0_5] : memref<8x1xf32, #tpu.memory_space<vmem>>, vector<8x1xf32>
    %6 = vector.shape_cast %5 : vector<8x1xf32> to vector<1x8x1xf32>
    %7 = vector.broadcast %6 : vector<1x8x1xf32> to vector<1x8x1280xf32>
    %8 = arith.addf %4, %7 : vector<1x8x1280xf32>
    %cst = arith.constant 0.000000e+00 : f32
    %9 = vector.broadcast %cst : f32 to vector<1x8x1280xf32>
    %10 = arith.maximumf %8, %9 : vector<1x8x1280xf32>
    %11 = arith.truncf %10 : vector<1x8x1280xf32> to vector<1x8x1280xbf16>
    %c0_6 = arith.constant 0 : index
    %c0_7 = arith.constant 0 : index
    %c0_8 = arith.constant 0 : index
    %12 = vector.load %arg4[%c0_6, %c0_7, %c0_8] : memref<1x8x1280xbf16, #tpu.memory_space<vmem>>, vector<1x8x1280xbf16>
    tpu.vector_store %arg4[%c0_6, %c0_7, %c0_8], %11 {strides = array<i32>} : memref<1x8x1280xbf16, #tpu.memory_space<vmem>>, vector<1x8x1280xbf16>,
    return
  }
  func.func @transform_0(%arg0: i32) -> (i32, i32, i32) {
    %c0_i32 = arith.constant 0 : i32
    %c0_i32_0 = arith.constant 0 : i32
    %c0_i32_1 = arith.constant 0 : i32
    return %arg0, %c0_i32, %c0_i32_0 : i32, i32, i32
  }
  func.func @transform_1(%arg0: i32) -> (i32, i32) {
    %c0_i32 = arith.constant 0 : i32
    %c0_i32_0 = arith.constant 0 : i32
    %c0_i32_1 = arith.constant 0 : i32
    return %c0_i32, %c0_i32_0 : i32, i32
  }
  func.func @transform_2(%arg0: i32) -> (i32, i32) {
    %c0_i32 = arith.constant 0 : i32
    %c0_i32_0 = arith.constant 0 : i32
    %c0_i32_1 = arith.constant 0 : i32
    return %c0_i32, %c0_i32_0 : i32, i32
  }
  func.func @transform_3(%arg0: i32) -> (i32, i32, i32) {
    %c0_i32 = arith.constant 0 : i32
    %c0_i32_0 = arith.constant 0 : i32
    %c0_i32_1 = arith.constant 0 : i32
    return %arg0, %c0_i32, %c0_i32_0 : i32, i32, i32
  }
}

module attributes {stable_mosaic.version = 11 : i64} {
  func.func @convT_fused_kernel(%arg0: i32, %arg1: i32, %arg2: memref<1x3x32xbf16, #tpu.memory_space<vmem>>, %arg3: memref<1x32x5120xbf16, #tpu.memory_space<vmem>>, %arg4: memref<3x1xf32, #tpu.memory_space<vmem>>, %arg5: memref<1x3x5120xf32, #tpu.memory_space<vmem>>) attributes {dimension_semantics = [#tpu.dimension_semantics<parallel>, #tpu.dimension_semantics<parallel>], iteration_bounds = array<i64: 4, 1>, scalar_prefetch = 0 : i64, scratch_operands = 0 : i64, tpu.core_type = #tpu.core_type<tc>, window_params = [{transform_indices = @transform_0, window_bounds = array<i64: 1, 3, 32>}, {transform_indices = @transform_1, window_bounds = array<i64: 1, 32, 5120>}, {pipeline_mode = #tpu.pipeline_mode<synchronous>, transform_indices = @transform_2, window_bounds = array<i64: 3, 1>}, {transform_indices = @transform_3, window_bounds = array<i64: 1, 3, 5120>}]} {
    %c0 = arith.constant 0 : index
    %c0_0 = arith.constant 0 : index
    %c0_1 = arith.constant 0 : index
    %0 = vector.load %arg2[%c0, %c0_0, %c0_1] : memref<1x3x32xbf16, #tpu.memory_space<vmem>>, vector<1x3x32xbf16>
    %1 = vector.shape_cast %0 : vector<1x3x32xbf16> to vector<3x32xbf16>
    %c0_2 = arith.constant 0 : index
    %c0_3 = arith.constant 0 : index
    %c0_4 = arith.constant 0 : index
    %2 = vector.load %arg3[%c0_2, %c0_3, %c0_4] : memref<1x32x5120xbf16, #tpu.memory_space<vmem>>, vector<1x32x5120xbf16>
    %3 = vector.shape_cast %2 : vector<1x32x5120xbf16> to vector<32x5120xbf16>
    %cst = arith.constant dense<0.000000e+00> : vector<3x5120xf32>
    %4 = tpu.matmul %1, %3, %cst {dimension_numbers = #tpu.dot_dimension_numbers<[1], [0], [0], [1], [0, 0, 1, 1], [], []>} : vector<3x32xbf16>, vector<32x5120xbf16>, vector<3x5120xf32> -> vector<3x5120xf32>
    %c0_5 = arith.constant 0 : index
    %c0_6 = arith.constant 0 : index
    %5 = vector.load %arg4[%c0_5, %c0_6] : memref<3x1xf32, #tpu.memory_space<vmem>>, vector<3x1xf32>
    %6 = vector.broadcast %5 : vector<3x1xf32> to vector<3x5120xf32>
    %7 = arith.addf %4, %6 : vector<3x5120xf32>
    %8 = math.tanh %7 : vector<3x5120xf32>
    %c0_7 = arith.constant 0 : index
    %c0_8 = arith.constant 0 : index
    %c0_9 = arith.constant 0 : index
    %9 = vector.load %arg5[%c0_7, %c0_8, %c0_9] : memref<1x3x5120xf32, #tpu.memory_space<vmem>>, vector<1x3x5120xf32>
    %10 = vector.shape_cast %9 : vector<1x3x5120xf32> to vector<3x5120xf32>
    %11 = vector.shape_cast %8 : vector<3x5120xf32> to vector<1x3x5120xf32>
    tpu.vector_store %arg5[%c0_7, %c0_8, %c0_9], %11 {strides = array<i32>} : memref<1x3x5120xf32, #tpu.memory_space<vmem>>, vector<1x3x5120xf32>,
    return
  }
  func.func @transform_0(%arg0: i32, %arg1: i32) -> (i32, i32, i32) {
    %c0_i32 = arith.constant 0 : i32
    %c0_i32_0 = arith.constant 0 : i32
    %c0_i32_1 = arith.constant 0 : i32
    return %arg0, %c0_i32, %c0_i32_0 : i32, i32, i32
  }
  func.func @transform_1(%arg0: i32, %arg1: i32) -> (i32, i32, i32) {
    %c0_i32 = arith.constant 0 : i32
    %c0_i32_0 = arith.constant 0 : i32
    return %arg0, %c0_i32, %arg1 : i32, i32, i32
  }
  func.func @transform_2(%arg0: i32, %arg1: i32) -> (i32, i32) {
    %c0_i32 = arith.constant 0 : i32
    %c0_i32_0 = arith.constant 0 : i32
    %c0_i32_1 = arith.constant 0 : i32
    return %c0_i32, %c0_i32_0 : i32, i32
  }
  func.func @transform_3(%arg0: i32, %arg1: i32) -> (i32, i32, i32) {
    %c0_i32 = arith.constant 0 : i32
    %c0_i32_0 = arith.constant 0 : i32
    return %arg0, %c0_i32, %arg1 : i32, i32, i32
  }
}

</mosaic_0001>

<bundles_post_ra>
// kernel: generator_forward.10
= control target key start
LH: loop header
LB: loop body
LE: loop exit
PB: predicated region body
PF: predicated region fallthrough
CT: control target
= control target key end

     0   :  { %v228_v0 = vmov 0   ;;  %s333_s1 = inlined_call_operand.vmem [shape: f32[64,1], index: 1, kind: input, shape index: {}]   ;;  %s334_s2 = inlined_call_operand.vmem [shape: f32[64,1], index: 2, kind: input, shape index: {}]   ;;  %s335_s0 = inlined_call_operand.vmem [shape: f32[1,64,128], index: 0, kind: input, shape index: {}]   ;;  %s336_s3 = inlined_call_operand.vmem [shape: bf16[1,64,128], index: 3, kind: output, shape index: {}]  }
   0x1   :  { %227 = vset.pattern.permute.xlu1 %v228_v0  ;;  %226 = vset.pattern.permute.xlu0 %v228_v0  ;;  %v24_v1 = vld [vmem:[%s333_s1 + $0x10] sm:$0xff]  ;;  %v22_v2 = vld [vmem:[%s333_s1] sm:$0xff]  ;;  %v25_v3 = vld [vmem:[%s333_s1 + $0x18] sm:$0xff] }
   0x2   :  { %42 = vperm.xlu1 %227, %v24_v1   ;;  %32 = vperm.xlu0 %226, %v22_v2   ;;  %v23_v4 = vld [vmem:[%s333_s1 + $0x8] sm:$0xff]  ;;  %v26_v6 = vld [vmem:[%s333_s1 + $0x20] sm:$0xff]  ;;  %v29_v7 = vld [vmem:[%s333_s1 + $0x38] sm:$0xff] }
   0x3   :  { %v27_v5 = vld [vmem:[%s333_s1 + $0x28] sm:$0xff]  ;;  %v28_v8 = vld [vmem:[%s333_s1 + $0x30] sm:$0xff]  ;;  %v78_v10 = vld [vmem:[%s334_s2] sm:$0xff] }
   0x4   :  { %v79_v9 = vld [vmem:[%s334_s2 + $0x8] sm:$0xff]  ;;  %v81_v11 = vld [vmem:[%s334_s2 + $0x18] sm:$0xff]  ;;  %v80_v12 = vld [vmem:[%s334_s2 + $0x10] sm:$0xff] }
   0x5   :  { %v83_v13 = vld [vmem:[%s334_s2 + $0x28] sm:$0xff]  ;;  %v82_v14 = vld [vmem:[%s334_s2 + $0x20] sm:$0xff]  ;;  %v85_v15 = vld [vmem:[%s334_s2 + $0x38] sm:$0xff] }
   0x6   :  { %47 = vperm.xlu1 %227, %v25_v3   ;;  %37 = vperm.xlu0 %226, %v23_v4   ;;  %v84_v16 = vld [vmem:[%s334_s2 + $0x30] sm:$0xff]  ;;  %v14_v23 = vld [vmem:[%s335_s0] sm:$0xff]  ;;  %v15_v24 = vld [vmem:[%s335_s0 + $0x8] sm:$0xff] }
   0x7   :  { %v16_v29 = vld [vmem:[%s335_s0 + $0x10] sm:$0xff]  ;;  %v17_v30 = vld [vmem:[%s335_s0 + $0x18] sm:$0xff]  ;;  %v19_v39 = vld [vmem:[%s335_s0 + $0x28] sm:$0xff] }
   0x8   :  { %v18_v40 = vld [vmem:[%s335_s0 + $0x20] sm:$0xff]  ;;  %v21_v50 = vld [vmem:[%s335_s0 + $0x38] sm:$0xff]  ;;  %v20_v51 = vld [vmem:[%s335_s0 + $0x30] sm:$0xff] }
   0xa   :  { %57 = vperm.xlu1 %227, %v27_v5   ;;  %52 = vperm.xlu0 %226, %v26_v6  }
   0xe   :  { %67 = vperm.xlu1 %227, %v29_v7   ;;  %62 = vperm.xlu0 %226, %v28_v8  }
  0x12   :  { %93 = vperm.xlu1 %227, %v79_v9   ;;  %88 = vperm.xlu0 %226, %v78_v10  }
  0x16   :  { %103 = vperm.xlu1 %227, %v81_v11   ;;  %98 = vperm.xlu0 %226, %v80_v12  }
  0x1a   :  { %113 = vperm.xlu1 %227, %v83_v13   ;;  %108 = vperm.xlu0 %226, %v82_v14  }
  0x1e   :  { %123 = vperm.xlu1 %227, %v85_v15   ;;  %118 = vperm.xlu0 %226, %v84_v16  }
  0x81   :  { %v43_v17 = vpop.permute.xlu1 %42  ;;  %v33_v18 = vpop.permute.xlu0 %32 }
  0x82   :  { %v70_v27 = vmul.f32 %v33_v18, %v14_v23  ;;  %v72_v35 = vmul.f32 %v43_v17, %v16_v29 }
  0x85   :  { %v48_v19 = vpop.permute.xlu1 %47  ;;  %v38_v20 = vpop.permute.xlu0 %37 }
  0x86   :  { %v71_v28 = vmul.f32 %v38_v20, %v15_v24  ;;  %v73_v36 = vmul.f32 %v48_v19, %v17_v30 }
  0x89   :  { %v58_v21 = vpop.permute.xlu1 %57  ;;  %v53_v22 = vpop.permute.xlu0 %52 }
  0x8a   :  { %v75_v46 = vmul.f32 %v58_v21, %v19_v39  ;;  %v74_v47 = vmul.f32 %v53_v22, %v18_v40 }
  0x8d   :  { %v68_v25 = vpop.permute.xlu1 %67  ;;  %v63_v26 = vpop.permute.xlu0 %62 }
  0x8e   :  { %v77_v57 = vmul.f32 %v68_v25, %v21_v50  ;;  %v76_v58 = vmul.f32 %v63_v26, %v20_v51 }
  0x91   :  { %v94_v31 = vpop.permute.xlu1 %93  ;;  %v89_v32 = vpop.permute.xlu0 %88 }
  0x92   :  { %v127_v33 = vadd.f32 %v94_v31, %v71_v28  ;;  %v126_v34 = vadd.f32 %v89_v32, %v70_v27 }
  0x94   :  { %v135_v37 = vmax.f32 %v127_v33, 0.0  ;;  %v134_v38 = vmax.f32 %v126_v34, 0.0 }
  0x95   :  { %v104_v41 = vpop.permute.xlu1 %103  ;;  %v99_v42 = vpop.permute.xlu0 %98 }
  0x96   :  { %v205_v43 = vpack.c.bf16 %v135_v37, %v134_v38  ;;  %v129_v44 = vadd.f32 %v104_v41, %v73_v36  ;;  %v128_v45 = vadd.f32 %v99_v42, %v72_v35 }
  0x98   :  { %206 = vst [vmem:[%s336_s3] sm:$0xff] %v205_v43   ;;  %v137_v48 = vmax.f32 %v129_v44, 0.0  ;;  %v136_v49 = vmax.f32 %v128_v45, 0.0 }
  0x99   :  { %v114_v52 = vpop.permute.xlu1 %113  ;;  %v109_v53 = vpop.permute.xlu0 %108 }
  0x9a   :  { %v210_v54 = vpack.c.bf16 %v137_v48, %v136_v49  ;;  %v131_v55 = vadd.f32 %v114_v52, %v75_v46  ;;  %v130_v56 = vadd.f32 %v109_v53, %v74_v47 }
  0x9c   :  { %222 = vst [vmem:[%s336_s3 + $0x8] sm:$0xff] %v210_v54   ;;  %v139_v59 = vmax.f32 %v131_v55, 0.0  ;;  %v138_v60 = vmax.f32 %v130_v56, 0.0 }
  0x9d   :  { %v124_v61 = vpop.permute.xlu1 %123  ;;  %v119_v62 = vpop.permute.xlu0 %118 }
  0x9e   :  { %v215_v63 = vpack.c.bf16 %v139_v59, %v138_v60  ;;  %v133_v0 = vadd.f32 %v124_v61, %v77_v57  ;;  %v132_v1 = vadd.f32 %v119_v62, %v76_v58 }
  0xa0   :  { %223 = vst [vmem:[%s336_s3 + $0x10] sm:$0xff] %v215_v63   ;;  %v141_v2 = vmax.f32 %v133_v0, 0.0  ;;  %v140_v3 = vmax.f32 %v132_v1, 0.0 }
  0xa2   :  { %v220_v4 = vpack.c.bf16 %v141_v2, %v140_v3 }
  0xa4   :  { %224 = vst [vmem:[%s336_s3 + $0x18] sm:$0xff] %v220_v4  }

// kernel: generator_forward.9
= control target key start
LH: loop header
LB: loop body
LE: loop exit
PB: predicated region body
PF: predicated region fallthrough
CT: control target
= control target key end

     0   :  { %v1056_v1 = vmov 0   ;;  %vm478_vm0 = vcmask 523264   ;;  %vm698_vm1 = vcmask 7168   ;;  %s1503_s1 = inlined_call_operand.vmem [shape: bf16[1,576,128], index: 1, kind: input, shape index: {}]   ;;  %s1504_s0 = inlined_call_operand.vmem [shape: bf16[1,64,576], index: 0, kind: input, shape index: {}]   ;;  %s1505_s2 = inlined_call_operand.vmem [shape: f32[64,1], index: 2, kind: input, shape index: {}]   ;;  %s1506_s4 = inlined_call_operand.vmem [shape: f32[1,64,1], index: 4, kind: output, shape index: {1}]   ;;  %s1507_s3 = inlined_call_operand.vmem [shape: f32[1,64,128], index: 3, kind: output, shape index: {0}]   ;;  %s1508_s5 = inlined_call_operand.vmem [shape: f32[1,64,1], index: 5, kind: output, shape index: {2}]  }
   0x1   :  { %v992_v0 = vld [vmem:[%s1503_s1 + $0x40] sm:$0xff]   ;;  %990 = vset.pattern.permute.xlu0 %v1056_v1  ;;  %991 = vset.pattern.permute.xlu1 %v1056_v1  ;;  %v996_v5 = vld [vmem:[%s1503_s1 + $0x48] sm:$0xff]   ;;  %v1000_v9 = vld [vmem:[%s1503_s1 + $0x50] sm:$0xff]   ;;  %v1057_v1 = vmov 0.0  }
   0x2   :  { %v993_v2 = vld [vmem:[%s1503_s1 + $0xc0] sm:$0xff]   ;;  %876 = vmatprep.subr.bf16.mxu0 %v992_v0  ;;  %v997_v6 = vld [vmem:[%s1503_s1 + $0xc8] sm:$0xff]   ;;  %v1001_v10 = vld [vmem:[%s1503_s1 + $0xd0] sm:$0xff]   ;;  %705 = vst.msk [vmem:[%s1506_s4 + $0x30] sm:$0xff] %vm698_vm1, %v1057_v1 }
   0x3   :  { %v994_v3 = vld [vmem:[%s1503_s1] sm:$0xff]   ;;  %916 = vmatprep.subr.bf16.mxu1 %v993_v2  ;;  %v998_v7 = vld [vmem:[%s1503_s1 + $0x8] sm:$0xff]   ;;  %v1002_v11 = vld [vmem:[%s1503_s1 + $0x10] sm:$0xff]   ;;  %699 = vst.msk [vmem:[%s1506_s4] sm:$0xff] %vm698_vm1, %v1057_v1 }
   0x4   :  { %v995_v4 = vld [vmem:[%s1503_s1 + $0x80] sm:$0xff]   ;;  %877 = vmatpush3.bf16.msra.mxu0 %v994_v3  ;;  %v999_v8 = vld [vmem:[%s1503_s1 + $0x88] sm:$0xff]   ;;  %v1003_v12 = vld [vmem:[%s1503_s1 + $0x90] sm:$0xff]   ;;  %700 = vst.msk [vmem:[%s1506_s4 + $0x8] sm:$0xff] %vm698_vm1, %v1057_v1 }
   0x5   :  { %917 = vmatpush3.bf16.msra.mxu1 %v995_v4  ;;  %878 = vmatprep.subr.bf16.mxu0 %v996_v5  ;;  %v1004_v13 = vld [vmem:[%s1503_s1 + $0x58] sm:$0xff]   ;;  %v1008_v17 = vld [vmem:[%s1503_s1 + $0x60] sm:$0xff]   ;;  %v1012_v21 = vld [vmem:[%s1503_s1 + $0x68] sm:$0xff]   ;;  %701 = vst.msk [vmem:[%s1506_s4 + $0x10] sm:$0xff] %vm698_vm1, %v1057_v1 }
   0x6   :  { %918 = vmatprep.subr.bf16.mxu1 %v997_v6  ;;  %v1005_v14 = vld [vmem:[%s1503_s1 + $0xd8] sm:$0xff]   ;;  %v1009_v18 = vld [vmem:[%s1503_s1 + $0xe0] sm:$0xff]   ;;  %v1013_v22 = vld [vmem:[%s1503_s1 + $0xe8] sm:$0xff]   ;;  %702 = vst.msk [vmem:[%s1506_s4 + $0x18] sm:$0xff] %vm698_vm1, %v1057_v1 }
   0x7   :  { %v1006_v15 = vld [vmem:[%s1503_s1 + $0x18] sm:$0xff]   ;;  %v1010_v19 = vld [vmem:[%s1503_s1 + $0x20] sm:$0xff]   ;;  %v1014_v23 = vld [vmem:[%s1503_s1 + $0x28] sm:$0xff]   ;;  %703 = vst.msk [vmem:[%s1506_s4 + $0x20] sm:$0xff] %vm698_vm1, %v1057_v1 }
   0x8   :  { %879 = vmatpush3.bf16.msra.mxu0 %v998_v7  ;;  %v1007_v16 = vld [vmem:[%s1503_s1 + $0x98] sm:$0xff]   ;;  %v1011_v20 = vld [vmem:[%s1503_s1 + $0xa0] sm:$0xff]   ;;  %v1015_v24 = vld [vmem:[%s1503_s1 + $0xa8] sm:$0xff]   ;;  %704 = vst.msk [vmem:[%s1506_s4 + $0x28] sm:$0xff] %vm698_vm1, %v1057_v1 }
   0x9   :  { %919 = vmatpush3.bf16.msra.mxu1 %v999_v8  ;;  %880 = vmatprep.subr.bf16.mxu0 %v1000_v9  ;;  %v1016_v25 = vld [vmem:[%s1503_s1 + $0x70] sm:$0xff]   ;;  %v1020_v29 = vld [vmem:[%s1503_s1 + $0x78] sm:$0xff]   ;;  %v1029_v36 = vld [vmem:[%s1504_s0 + $0xc] ss:$20 sps:$4 sm:$0xff]   ;;  %706 = vst.msk [vmem:[%s1506_s4 + $0x38] sm:$0xff] %vm698_vm1, %v1057_v1 }
   0xa   :  { %920 = vmatprep.subr.bf16.mxu1 %v1001_v10  ;;  %v1017_v26 = vld [vmem:[%s1503_s1 + $0xf0] sm:$0xff]   ;;  %v1021_v30 = vld [vmem:[%s1503_s1 + $0xf8] sm:$0xff]   ;;  %v1030_v37 = vld [vmem:[%s1503_s1 + $0x100] sm:$0xff]   ;;  %588 = vmatprep.mubr.bf16.mxu1 %v1029_v36  ;;  %709 = vst.msk [vmem:[%s1508_s5 + $0x10] sm:$0xff] %vm698_vm1, %v1057_v1 }
   0xb   :  { %v1018_v27 = vld [vmem:[%s1503_s1 + $0x30] sm:$0xff]   ;;  %v1022_v31 = vld [vmem:[%s1503_s1 + $0x38] sm:$0xff]   ;;  %v1031_v38 = vld [vmem:[%s1504_s0 + $0x2c] ss:$20 sps:$4 sm:$0xff]   ;;  %707 = vst.msk [vmem:[%s1508_s5] sm:$0xff] %vm698_vm1, %v1057_v1 }
   0xc   :  { %881 = vmatpush3.bf16.msra.mxu0 %v1002_v11  ;;  %v1019_v28 = vld [vmem:[%s1503_s1 + $0xb0] sm:$0xff]   ;;  %v1023_v32 = vld [vmem:[%s1503_s1 + $0xb8] sm:$0xff]   ;;  %v1037_v40 = vld [vmem:[%s1503_s1 + $0x108] sm:$0xff]   ;;  %708 = vst.msk [vmem:[%s1508_s5 + $0x8] sm:$0xff] %vm698_vm1, %v1057_v1 }
   0xd   :  { %921 = vmatpush3.bf16.msra.mxu1 %v1003_v12  ;;  %882 = vmatprep.subr.bf16.mxu0 %v1004_v13  ;;  %v1024_v33 = vld [vmem:[%s1504_s0] ss:$20 sps:$4 sm:$0xff]   ;;  %v1026_v34 = vld [vmem:[%s1504_s0 + $0x4] ss:$20 sps:$4 sm:$0xff]   ;;  %v1027_v35 = vld [vmem:[%s1504_s0 + $0x8] ss:$20 sps:$4 sm:$0xff]  }
   0xe   :  { %922 = vmatprep.subr.bf16.mxu1 %v1005_v14  ;;  %523 = vmatprep.mubr.bf16.mxu0 %v1026_v34  ;;  %v1033_v39 = vld [vmem:[%s1504_s0 + $0x34] ss:$20 sps:$4 sm:$0xff]   ;;  %v1036_v42 = vld [vmem:[%s1504_s0 + $0x30] ss:$20 sps:$4 sm:$0xff]   ;;  %v1051_v46 = vld [vmem:[%s1503_s1 + $0x118] sm:$0xff]   ;;  %710 = vst.msk [vmem:[%s1508_s5 + $0x18] sm:$0xff] %vm698_vm1, %v1057_v1 }
   0xf   :  { %v1035_v41 = vld [vmem:[%s1504_s0 + $0x28] ss:$20 sps:$4 sm:$0xff]   ;;  %v1044_v45 = vld [vmem:[%s1503_s1 + $0x110] sm:$0xff]   ;;  %v1043_v48 = vld [vmem:[%s1504_s0 + $0x58] ss:$20 sps:$4 sm:$0xff]   ;;  %711 = vst.msk [vmem:[%s1508_s5 + $0x20] sm:$0xff] %vm698_vm1, %v1057_v1 }
  0x10   :  { %883 = vmatpush3.bf16.msra.mxu0 %v1006_v15  ;;  %v1038_v43 = vld [vmem:[%s1504_s0 + $0x54] ss:$20 sps:$4 sm:$0xff]   ;;  %v1040_v44 = vld [vmem:[%s1504_s0 + $0x5c] ss:$20 sps:$4 sm:$0xff]   ;;  %v1047_v50 = vld [vmem:[%s1504_s0 + $0x84] ss:$20 sps:$4 sm:$0xff]  }
  0x11   :  { %923 = vmatpush3.bf16.msra.mxu1 %v1007_v16  ;;  %884 = vmatprep.subr.bf16.mxu0 %v1008_v17  ;;  %v1042_v47 = vld [vmem:[%s1504_s0 + $0x50] ss:$20 sps:$4 sm:$0xff]   ;;  %v115_v53 = vld [vmem:[%s1505_s2 + $0x8] sm:$0xff]  ;;  %v117_v55 = vld [vmem:[%s1505_s2 + $0x18] sm:$0xff]  ;;  %712 = vst.msk [vmem:[%s1508_s5 + $0x28] sm:$0xff] %vm698_vm1, %v1057_v1 }
  0x12   :  { %924 = vmatprep.subr.bf16.mxu1 %v1009_v18  ;;  %v1045_v49 = vld [vmem:[%s1504_s0 + $0x7c] ss:$20 sps:$4 sm:$0xff]   ;;  %v114_v51 = vld [vmem:[%s1505_s2] sm:$0xff]  ;;  %v1049_v54 = vld [vmem:[%s1504_s0 + $0x78] ss:$20 sps:$4 sm:$0xff]   ;;  %713 = vst.msk [vmem:[%s1508_s5 + $0x30] sm:$0xff] %vm698_vm1, %v1057_v1 }
  0x13   :  { %124 = vperm.xlu0 %990, %v114_v51   ;;  %v116_v52 = vld [vmem:[%s1505_s2 + $0x10] sm:$0xff]  ;;  %v118_v58 = vld [vmem:[%s1505_s2 + $0x20] sm:$0xff]  ;;  %v119_v60 = vld [vmem:[%s1505_s2 + $0x28] sm:$0xff]  ;;  %714 = vst.msk [vmem:[%s1508_s5 + $0x38] sm:$0xff] %vm698_vm1, %v1057_v1 }
  0x14   :  { %885 = vmatpush3.bf16.msra.mxu0 %v1010_v19  ;;  %134 = vperm.xlu1 %991, %v116_v52   ;;  %v1050_v56 = vld [vmem:[%s1504_s0 + $0x80] ss:$20 sps:$4 sm:$0xff]   ;;  %v1052_v57 = vld [vmem:[%s1504_s0 + $0x10] ss:$20 sps:$4 sm:$0xff]   ;;  %v1054_v62 = vld [vmem:[%s1504_s0 + $0x38] ss:$20 sps:$4 sm:$0xff]  }
  0x15   :  { %925 = vmatpush3.bf16.msra.mxu1 %v1011_v20  ;;  %886 = vmatprep.subr.bf16.mxu0 %v1012_v21  ;;  %v1053_v59 = vld [vmem:[%s1504_s0 + $0x60] ss:$20 sps:$4 sm:$0xff]   ;;  %v121_v63 = vld [vmem:[%s1505_s2 + $0x38] sm:$0xff] }
  0x16   :  { %926 = vmatprep.subr.bf16.mxu1 %v1013_v22  ;;  %v120_v61 = vld [vmem:[%s1505_s2 + $0x30] sm:$0xff]  ;;  %v1055_v0 = vld [vmem:[%s1504_s0 + $0x88] ss:$20 sps:$4 sm:$0xff]  }
  0x17   :  { %129 = vperm.xlu0 %990, %v115_v53   ;;  %v721_v1 = vld [vmem:[%s1506_s4 + $0x30] sm:$0xff] }
  0x18   :  { %887 = vmatpush3.bf16.msra.mxu0 %v1014_v23  ;;  %139 = vperm.xlu1 %991, %v117_v55  }
  0x19   :  { %927 = vmatpush3.bf16.msra.mxu1 %v1015_v24  ;;  %888 = vmatprep.subr.bf16.mxu0 %v1016_v25 }
  0x1a   :  { %928 = vmatprep.subr.bf16.mxu1 %v1017_v26 }
  0x1b   :  { %144 = vperm.xlu0 %990, %v118_v58  }
  0x1c   :  { %889 = vmatpush3.bf16.msra.mxu0 %v1018_v27  ;;  %149 = vperm.xlu1 %991, %v119_v60  }
  0x1d   :  { %929 = vmatpush3.bf16.msra.mxu1 %v1019_v28  ;;  %890 = vmatprep.subr.bf16.mxu0 %v1020_v29 }
  0x1e   :  { %930 = vmatprep.subr.bf16.mxu1 %v1021_v30 }
  0x1f   :  { %154 = vperm.xlu0 %990, %v120_v61  }
  0x20   :  { %891 = vmatpush3.bf16.msra.mxu0 %v1022_v31  ;;  %159 = vperm.xlu1 %991, %v121_v63  }
  0x21   :  { %931 = vmatpush3.bf16.msra.mxu1 %v1023_v32  ;;  %964 = vmatprep.subr.bf16.mxu0 %v1030_v37 }
  0x22   :  { %980 = vmatprep.subr.bf16.mxu1 %v1030_v37 }
  0x23   :  { %524 = vmatmul.mubr.bf16.vlgmr.msra.gmra.mrb[0].mxu0 %v1024_v33 }
  0x24   :  { %589 = vmatmul.mubr.bf16.vlgmr.msra.gmra.mrb[0].mxu1 %v1027_v35  ;;  %965 = vmatpush3.bf16.msra.mxu0 %v1030_v37 }
  0x25   :  { %531 = vmatprep.mubr.bf16.mxu0 %v1031_v38  ;;  %596 = vmatprep.mubr.bf16.mxu1 %v1033_v39 }
  0x26   :  { %984 = vmatpush3.bf16.msra.mxu1 %v1030_v37  ;;  %966 = vmatprep.subr.bf16.mxu0 %v1037_v40 }
  0x27   :  { %981 = vmatprep.subr.bf16.mxu1 %v1037_v40 }
  0x28   :  { %967 = vmatpush3.bf16.msra.mxu0 %v1037_v40 }
  0x29   :  { %968 = vmatprep.subr.bf16.mxu0 %v1044_v45 }
  0x2a   :  { %985 = vmatpush3.bf16.msra.mxu1 %v1037_v40 }
  0x2b   :  { %532 = vmatmul.mubr.bf16.gmra.mrb[4].mxu0 %v1035_v41  ;;  %982 = vmatprep.subr.bf16.mxu1 %v1044_v45 }
  0x2c   :  { %597 = vmatmul.mubr.bf16.gmra.mrb[4].mxu1 %v1036_v42  ;;  %539 = vmatprep.mubr.bf16.mxu0 %v1038_v43 }
  0x2d   :  { %604 = vmatprep.mubr.bf16.mxu1 %v1040_v44  ;;  %969 = vmatpush3.bf16.msra.mxu0 %v1044_v45 }
  0x2e   :  { %970 = vmatprep.subr.bf16.mxu0 %v1051_v46  ;;  %986 = vmatpush3.bf16.msra.mxu1 %v1044_v45 }
  0x2f   :  { %983 = vmatprep.subr.bf16.mxu1 %v1051_v46 }
  0x31   :  { %971 = vmatpush3.bf16.msra.mxu0 %v1051_v46 }
  0x32   :  { %987 = vmatpush3.bf16.msra.mxu1 %v1051_v46 }
  0x33   :  { %540 = vmatmul.mubr.bf16.gmra.mrb[8].mxu0 %v1042_v47 }
  0x34   :  { %605 = vmatmul.mubr.bf16.gmra.mrb[8].mxu1 %v1043_v48  ;;  %547 = vmatprep.mubr.bf16.mxu0 %v1045_v49 }
  0x35   :  { %612 = vmatprep.mubr.bf16.mxu1 %v1047_v50 }
  0x3b   :  { %548 = vmatmul.mubr.bf16.gmra.mrb[12].mxu0 %v1049_v54 }
  0x3c   :  { %613 = vmatmul.mubr.bf16.gmra.mrb[12].mxu1 %v1050_v56  ;;  %972 = vmatprep.mubr.msk.bf16.mxu0 %vm478_vm0, %v1052_v57 }
  0x3d   :  { %976 = vmatprep.mubr.msk.bf16.mxu1 %vm478_vm0, %v1053_v59 }
  0x43   :  { %973 = vmatmul.mubr.msk.bf16.vlgmr.msra.gmra.mrb[16].mxu0 %vm478_vm0, %v1054_v62 }
  0x44   :  { %977 = vmatmul.mubr.msk.bf16.vlgmr.msra.gmra.mrb[16].mxu1 %vm478_vm0, %v1055_v0 }
  0x92   :  { %v125_v2 = vpop.permute.xlu0 %124 }
  0x93   :  { %v135_v3 = vpop.permute.xlu1 %134 }
  0x96   :  { %v130_v5 = vpop.permute.xlu0 %129 }
  0x97   :  { %v140_v21 = vpop.permute.xlu1 %139 }
  0x9a   :  { %v145_v37 = vpop.permute.xlu0 %144 }
  0x9b   :  { %v150_v39 = vpop.permute.xlu1 %149 }
  0x9e   :  { %v155_v55 = vpop.permute.xlu0 %154 }
  0x9f   :  { %v160_v57 = vpop.permute.xlu1 %159 }
  0xf6   :  { %v892_v4 = vpop.f32.mrb[0].mxu0 }
  0xf7   :  { %v893_v6 = vpop.f32.mrb[1].mxu0  ;;  %v932_v7 = vpop.f32.mrb[0].mxu1 }
  0xf8   :  { %v894_v8 = vadd.f32 %v893_v6, %v892_v4  ;;  %v895_v9 = vpop.f32.mrb[2].mxu0  ;;  %v933_v10 = vpop.f32.mrb[1].mxu1 }
  0xf9   :  { %v896_v11 = vpop.f32.mrb[3].mxu0  ;;  %v934_v12 = vadd.f32 %v933_v10, %v932_v7  ;;  %v935_v13 = vpop.f32.mrb[2].mxu1 }
  0xfa   :  { %v526_v14 = vadd.f32 %v894_v8, %v125_v2  ;;  %v897_v15 = vadd.f32 %v896_v11, %v895_v9  ;;  %v936_v16 = vpop.f32.mrb[3].mxu1 }
  0xfb   :  { %v937_v17 = vadd.f32 %v936_v16, %v935_v13 }
  0xfc   :  { %v529_v18 = vadd.f32 %v897_v15, %v130_v5  ;;  %v591_v19 = vadd.f32 %v934_v12, %v526_v14 }
  0xfe   :  { %v898_v20 = vpop.f32.mrb[4].mxu0  ;;  %v1324_v22 = vadd.f32 %v937_v17, %v529_v18 }
  0xff   :  { %v899_v23 = vpop.f32.mrb[5].mxu0  ;;  %v938_v24 = vpop.f32.mrb[4].mxu1 }
 0x100   :  { %v900_v25 = vadd.f32 %v899_v23, %v898_v20  ;;  %v901_v26 = vpop.f32.mrb[6].mxu0  ;;  %v939_v27 = vpop.f32.mrb[5].mxu1 }
 0x101   :  { %v902_v28 = vpop.f32.mrb[7].mxu0  ;;  %v940_v29 = vadd.f32 %v939_v27, %v938_v24  ;;  %v941_v30 = vpop.f32.mrb[6].mxu1 }
 0x102   :  { %v534_v31 = vadd.f32 %v900_v25, %v135_v3  ;;  %v903_v32 = vadd.f32 %v902_v28, %v901_v26  ;;  %v942_v33 = vpop.f32.mrb[7].mxu1 }
 0x103   :  { %v943_v34 = vadd.f32 %v942_v33, %v941_v30 }
 0x104   :  { %v537_v35 = vadd.f32 %v903_v32, %v140_v21  ;;  %v599_v36 = vadd.f32 %v940_v29, %v534_v31 }
 0x106   :  { %v904_v38 = vpop.f32.mrb[8].mxu0  ;;  %v602_v40 = vadd.f32 %v943_v34, %v537_v35  ;;  %v717_v35 = vld [vmem:[%s1506_s4 + $0x10] sm:$0xff] }
 0x107   :  { %v905_v41 = vpop.f32.mrb[9].mxu0  ;;  %v944_v42 = vpop.f32.mrb[8].mxu1 }
 0x108   :  { %v906_v43 = vadd.f32 %v905_v41, %v904_v38  ;;  %v907_v44 = vpop.f32.mrb[10].mxu0  ;;  %v945_v45 = vpop.f32.mrb[9].mxu1  ;;  %v719_v41 = vld [vmem:[%s1506_s4 + $0x20] sm:$0xff] }
 0x109   :  { %v908_v46 = vpop.f32.mrb[11].mxu0  ;;  %v946_v47 = vadd.f32 %v945_v45, %v944_v42  ;;  %v947_v48 = vpop.f32.mrb[10].mxu1 }
 0x10a   :  { %v542_v49 = vadd.f32 %v906_v43, %v145_v37  ;;  %v909_v50 = vadd.f32 %v908_v46, %v907_v44  ;;  %v948_v51 = vpop.f32.mrb[11].mxu1  ;;  %v718_v46 = vld [vmem:[%s1506_s4 + $0x18] sm:$0xff] }
 0x10b   :  { %v949_v52 = vadd.f32 %v948_v51, %v947_v48 }
 0x10c   :  { %v545_v53 = vadd.f32 %v909_v50, %v150_v39  ;;  %v607_v54 = vadd.f32 %v946_v47, %v542_v49  ;;  %v758_v47 = vld [vmem:[%s1508_s5 + $0x10] sm:$0xff] }
 0x10e   :  { %v910_v56 = vpop.f32.mrb[12].mxu0  ;;  %v610_v58 = vadd.f32 %v949_v52, %v545_v53  ;;  %v722_v52 = vld [vmem:[%s1506_s4 + $0x38] sm:$0xff]  ;;  %v716_v53 = vld [vmem:[%s1506_s4 + $0x8] sm:$0xff] }
 0x10f   :  { %v911_v59 = vpop.f32.mrb[13].mxu0  ;;  %v950_v60 = vpop.f32.mrb[12].mxu1 }
 0x110   :  { %v912_v61 = vadd.f32 %v911_v59, %v910_v56  ;;  %v913_v62 = vpop.f32.mrb[14].mxu0  ;;  %v951_v63 = vpop.f32.mrb[13].mxu1  ;;  %v756_v59 = vld [vmem:[%s1508_s5] sm:$0xff] }
 0x111   :  { %v914_v0 = vpop.f32.mrb[15].mxu0  ;;  %v952_v2 = vadd.f32 %v951_v63, %v950_v60  ;;  %v953_v3 = vpop.f32.mrb[14].mxu1 }
 0x112   :  { %v550_v4 = vadd.f32 %v912_v61, %v155_v55  ;;  %v915_v5 = vadd.f32 %v914_v0, %v913_v62  ;;  %v954_v6 = vpop.f32.mrb[15].mxu1  ;;  %v759_v0 = vld [vmem:[%s1508_s5 + $0x18] sm:$0xff] }
 0x113   :  { %v955_v7 = vadd.f32 %v954_v6, %v953_v3 }
 0x114   :  { %v553_v8 = vadd.f32 %v915_v5, %v160_v57  ;;  %v615_v9 = vadd.f32 %v952_v2, %v550_v4  ;;  %v760_v2 = vld [vmem:[%s1508_s5 + $0x20] sm:$0xff] }
 0x116   :  { %v974_v10 = vpop.f32.mrb[16].mxu0  ;;  %v618_v11 = vadd.f32 %v955_v7, %v553_v8  ;;  %v757_v7 = vld [vmem:[%s1508_s5 + $0x8] sm:$0xff]  ;;  %v762_v8 = vld [vmem:[%s1508_s5 + $0x30] sm:$0xff] }
 0x117   :  { %v664_v12 = vadd.f32 %v974_v10, %v599_v36  ;;  %v978_v13 = vpop.f32.mrb[16].mxu1  ;;  %v655_v14 = vpop.f32.mrb[17].mxu0 }
 0x118   :  { %v680_v15 = vadd.f32 %v978_v13, %v615_v9  ;;  %v656_v16 = vadd.f32 %v655_v14, %v591_v19  ;;  %v671_v17 = vpop.f32.mrb[17].mxu1  ;;  %v975_v18 = vpop.f32.mrb[18].mxu0  ;;  %v761_v13 = vld [vmem:[%s1508_s5 + $0x28] sm:$0xff] }
 0x119   :  { %688 = vst [vmem:[%s1507_s3 + $0x10] sm:$0xff] %v664_v12  ;;  %v672_v20 = vadd.f32 %v671_v17, %v607_v54  ;;  %v667_v21 = vadd.f32 %v975_v18, %v602_v40  ;;  %v979_v23 = vpop.f32.mrb[18].mxu1  ;;  %v658_v24 = vpop.f32.mrb[19].mxu0  ;;  %727 = vadd.xlane.f32.xlu0 %v664_v12  ;;  %v715_v40 = vld [vmem:[%s1506_s4] sm:$0xff] }
 0x11a   :  { %692 = vst [vmem:[%s1507_s3 + $0x30] sm:$0xff] %v680_v15  ;;  %686 = vst [vmem:[%s1507_s3] sm:$0xff] %v656_v16  ;;  %v683_v19 = vadd.f32 %v979_v23, %v618_v11  ;;  %v659_v25 = vadd.f32 %v658_v24, %v1324_v22  ;;  %v674_v26 = vpop.f32.mrb[19].mxu1  ;;  %735 = vadd.xlane.f32.xlu1 %v680_v15  ;;  %v766_v22 = vmul.f32 %v664_v12, %v664_v12 }
 0x11b   :  { %690 = vst [vmem:[%s1507_s3 + $0x20] sm:$0xff] %v672_v20  ;;  %689 = vst [vmem:[%s1507_s3 + $0x18] sm:$0xff] %v667_v21  ;;  %v675_v27 = vadd.f32 %v674_v26, %v610_v58  ;;  %v764_v28 = vmul.f32 %v656_v16, %v656_v16  ;;  %v767_v29 = vmul.f32 %v667_v21, %v667_v21  ;;  %v720_v58 = vld [vmem:[%s1506_s4 + $0x28] sm:$0xff] }
 0x11c   :  { %693 = vst [vmem:[%s1507_s3 + $0x38] sm:$0xff] %v683_v19  ;;  %687 = vst [vmem:[%s1507_s3 + $0x8] sm:$0xff] %v659_v25  ;;  %v768_v30 = vmul.f32 %v672_v20, %v672_v20  ;;  %v765_v31 = vmul.f32 %v659_v25, %v659_v25  ;;  %v770_v32 = vmul.f32 %v680_v15, %v680_v15 }
 0x11d   :  { %691 = vst [vmem:[%s1507_s3 + $0x28] sm:$0xff] %v675_v27  ;;  %723 = vadd.xlane.f32.xlu0 %v656_v16  ;;  %v769_v33 = vmul.f32 %v675_v27, %v675_v27  ;;  %v771_v34 = vmul.f32 %v683_v19, %v683_v19  ;;  %v763_v16 = vld [vmem:[%s1508_s5 + $0x38] sm:$0xff] }
 0x11e   :  { %731 = vadd.xlane.f32.xlu1 %v672_v20 }
 0x121   :  { %729 = vadd.xlane.f32.xlu0 %v667_v21 }
 0x122   :  { %776 = vadd.xlane.f32.xlu1 %v766_v22 }
 0x125   :  { %737 = vadd.xlane.f32.xlu0 %v683_v19 }
 0x126   :  { %725 = vadd.xlane.f32.xlu1 %v659_v25 }
 0x129   :  { %733 = vadd.xlane.f32.xlu0 %v675_v27 }
 0x12a   :  { %772 = vadd.xlane.f32.xlu1 %v764_v28 }
 0x12d   :  { %778 = vadd.xlane.f32.xlu0 %v767_v29 }
 0x12e   :  { %780 = vadd.xlane.f32.xlu1 %v768_v30 }
 0x131   :  { %774 = vadd.xlane.f32.xlu0 %v765_v31 }
 0x132   :  { %784 = vadd.xlane.f32.xlu1 %v770_v32 }
 0x135   :  { %782 = vadd.xlane.f32.xlu0 %v769_v33 }
 0x139   :  { %786 = vadd.xlane.f32.xlu0 %v771_v34 }
 0x1a6   :  { %v728_v36 = vpop.xlane.xlu0 %727 }
 0x1a7   :  { %v736_v37 = vpop.xlane.xlu1 %735  ;;  %v741_v38 = vadd.f32 %v728_v36, %v717_v35 }
 0x1a8   :  { %v745_v39 = vadd.f32 %v736_v37, %v721_v1 }
 0x1a9   :  { %750 = vst.msk [vmem:[%s1506_s4 + $0x10] sm:$0xff] %vm698_vm1, %v741_v38 }
 0x1aa   :  { %754 = vst.msk [vmem:[%s1506_s4 + $0x30] sm:$0xff] %vm698_vm1, %v745_v39  ;;  %v724_v42 = vpop.xlane.xlu0 %723 }
 0x1ab   :  { %v732_v43 = vpop.xlane.xlu1 %731  ;;  %v739_v44 = vadd.f32 %v724_v42, %v715_v40 }
 0x1ac   :  { %v743_v45 = vadd.f32 %v732_v43, %v719_v41 }
 0x1ad   :  { %748 = vst.msk [vmem:[%s1506_s4] sm:$0xff] %vm698_vm1, %v739_v44 }
 0x1ae   :  { %752 = vst.msk [vmem:[%s1506_s4 + $0x20] sm:$0xff] %vm698_vm1, %v743_v45  ;;  %v730_v48 = vpop.xlane.xlu0 %729 }
 0x1af   :  { %v777_v49 = vpop.xlane.xlu1 %776  ;;  %v742_v50 = vadd.f32 %v730_v48, %v718_v46 }
 0x1b0   :  { %v790_v51 = vadd.f32 %v777_v49, %v758_v47 }
 0x1b1   :  { %751 = vst.msk [vmem:[%s1506_s4 + $0x18] sm:$0xff] %vm698_vm1, %v742_v50 }
 0x1b2   :  { %798 = vst.msk [vmem:[%s1508_s5 + $0x10] sm:$0xff] %vm698_vm1, %v790_v51  ;;  %v738_v54 = vpop.xlane.xlu0 %737 }
 0x1b3   :  { %v726_v55 = vpop.xlane.xlu1 %725  ;;  %v746_v56 = vadd.f32 %v738_v54, %v722_v52 }
 0x1b4   :  { %v740_v57 = vadd.f32 %v726_v55, %v716_v53 }
 0x1b5   :  { %755 = vst.msk [vmem:[%s1506_s4 + $0x38] sm:$0xff] %vm698_vm1, %v746_v56 }
 0x1b6   :  { %749 = vst.msk [vmem:[%s1506_s4 + $0x8] sm:$0xff] %vm698_vm1, %v740_v57  ;;  %v734_v60 = vpop.xlane.xlu0 %733 }
 0x1b7   :  { %v744_v61 = vadd.f32 %v734_v60, %v720_v58  ;;  %v773_v62 = vpop.xlane.xlu1 %772 }
 0x1b8   :  { %v788_v63 = vadd.f32 %v773_v62, %v756_v59 }
 0x1b9   :  { %753 = vst.msk [vmem:[%s1506_s4 + $0x28] sm:$0xff] %vm698_vm1, %v744_v61 }
 0x1ba   :  { %796 = vst.msk [vmem:[%s1508_s5] sm:$0xff] %vm698_vm1, %v788_v63  ;;  %v779_v3 = vpop.xlane.xlu0 %778 }
 0x1bb   :  { %v791_v4 = vadd.f32 %v779_v3, %v759_v0  ;;  %v781_v5 = vpop.xlane.xlu1 %780 }
 0x1bc   :  { %v792_v6 = vadd.f32 %v781_v5, %v760_v2 }
 0x1bd   :  { %799 = vst.msk [vmem:[%s1508_s5 + $0x18] sm:$0xff] %vm698_vm1, %v791_v4 }
 0x1be   :  { %800 = vst.msk [vmem:[%s1508_s5 + $0x20] sm:$0xff] %vm698_vm1, %v792_v6  ;;  %v775_v9 = vpop.xlane.xlu0 %774 }
 0x1bf   :  { %v789_v10 = vadd.f32 %v775_v9, %v757_v7  ;;  %v785_v11 = vpop.xlane.xlu1 %784 }
 0x1c0   :  { %v794_v12 = vadd.f32 %v785_v11, %v762_v8 }
 0x1c1   :  { %797 = vst.msk [vmem:[%s1508_s5 + $0x8] sm:$0xff] %vm698_vm1, %v789_v10 }
 0x1c2   :  { %802 = vst.msk [vmem:[%s1508_s5 + $0x30] sm:$0xff] %vm698_vm1, %v794_v12  ;;  %v783_v14 = vpop.xlane.xlu0 %782 }
 0x1c3   :  { %v793_v15 = vadd.f32 %v783_v14, %v761_v13 }
 0x1c5   :  { %801 = vst.msk [vmem:[%s1508_s5 + $0x28] sm:$0xff] %vm698_vm1, %v793_v15 }
 0x1c6   :  { %v787_v17 = vpop.xlane.xlu0 %786 }
 0x1c7   :  { %v795_v18 = vadd.f32 %v787_v17, %v763_v16 }
 0x1c9   :  { %803 = vst.msk [vmem:[%s1508_s5 + $0x38] sm:$0xff] %vm698_vm1, %v795_v18 }

// kernel: generator_forward.12
= control target key start
LH: loop header
LB: loop body
LE: loop exit
PB: predicated region body
PF: predicated region fallthrough
CT: control target
= control target key end

     0   :  { %s382_s12 = smov 0   ;;  %s423_s0 = inlined_call_operand.vmem [shape: f32[4,32,128], index: 0, kind: input, shape index: {}]   ;;  %s424_s1 = inlined_call_operand.vmem [shape: f32[32,1], index: 1, kind: input, shape index: {}]   ;;  %s425_s2 = inlined_call_operand.vmem [shape: f32[32,1], index: 2, kind: input, shape index: {}]   ;;  %s426_s3 = inlined_call_operand.vmem [shape: bf16[4,32,128], index: 3, kind: output, shape index: {}]  }
   0x1 LB: > { %s310_s13 = sadd.s32 4294967295, %s359_s12   ;;  %p314_p0 = scmp.ge.s32.totalorder %s359_s12, 1  ;;  %s359_s12 = sphi %s382_s12, %s13_s12  }
   0x2   : > { %p137_p1 = scmp.lt.s32.totalorder %s359_s12, 5 }
   0x4   : > { %p138_p2 = pnand %p314_p0, %p137_p1 }
   0x5   : > { %v177_v0 = vld [vmem:[%s424_s1 + $0x10] sm:$0xff] (!%p138_p2)  ;;  %v175_v1 = vld [vmem:[%s424_s1] sm:$0xff] (!%p138_p2)  ;;  %v361_v2 = vmov (!%p138_p2), 0   ;;  %v178_v3 = vld [vmem:[%s424_s1 + $0x18] sm:$0xff] (!%p138_p2)  ;;  %p161_p3 = scmp.lt.s32.totalorder (!%p138_p2), %s310_s13, 3 }
   0x6   : > { %141 = sbr.rel (%p138_p2) target bundleno = 154 (0x9a), region = 32  ;;  %352 = vset.pattern.permute.xlu1 (!%p138_p2), %v361_v2  ;;  %351 = vset.pattern.permute.xlu0 (!%p138_p2), %v361_v2  ;;  %v176_v4 = vld [vmem:[%s424_s1 + $0x8] sm:$0xff] (!%p138_p2)  ;;  %v203_v6 = vld [vmem:[%s425_s2] sm:$0xff] (!%p138_p2)  ;;  %v206_v7 = vld [vmem:[%s425_s2 + $0x18] sm:$0xff] (!%p138_p2) }
   0x7   : > { %191 = vperm.xlu1 (!%p138_p2), %352, %v177_v0   ;;  %181 = vperm.xlu0 (!%p138_p2), %351, %v175_v1   ;;  %v204_v5 = vld [vmem:[%s425_s2 + $0x8] sm:$0xff] (!%p138_p2)  ;;  %v205_v8 = vld [vmem:[%s425_s2 + $0x10] sm:$0xff] (!%p138_p2) }
   0xb   : > { %196 = vperm.xlu1 (!%p138_p2), %352, %v178_v3   ;;  %186 = vperm.xlu0 (!%p138_p2), %351, %v176_v4  }
   0xd   : > { %s428_s13 = smov (!%p161_p3, %s310_s13), 3 }
   0xe   : > { %s325_s30 = sshll.u32 %s428_s13, 5  ;;  %s326_s7 = sshll.u32 %s428_s13, 4 }
   0xf   : > { %214 = vperm.xlu1 %352, %v204_v5   ;;  %209 = vperm.xlu0 %351, %v203_v6   ;;  %s165_s6 = scalar_lea.vmem %s423_s0, %s325_s30  ;;  %s170_s10 = scalar_lea.vmem %s426_s3, %s326_s7 }
  0x10   : > { %v171_v11 = vld [vmem:[%s165_s6] sm:$0xff]  ;;  %v172_v14 = vld [vmem:[%s165_s6 + $0x8] sm:$0xff]  ;;  %v173_v17 = vld [vmem:[%s165_s6 + $0x10] sm:$0xff] }
  0x11   : > { %v174_v18 = vld [vmem:[%s165_s6 + $0x18] sm:$0xff] }
  0x13   : > { %224 = vperm.xlu1 %352, %v206_v7   ;;  %219 = vperm.xlu0 %351, %v205_v8  }
  0x86   : > { %v192_v9 = vpop.permute.xlu1 %191  ;;  %v182_v10 = vpop.permute.xlu0 %181 }
  0x87   : > { %v199_v15 = vmul.f32 %v182_v10, %v171_v11  ;;  %v201_v23 = vmul.f32 %v192_v9, %v173_v17 }
  0x8a   : > { %v197_v12 = vpop.permute.xlu1 %196  ;;  %v187_v13 = vpop.permute.xlu0 %186 }
  0x8b   : > { %v200_v16 = vmul.f32 %v187_v13, %v172_v14  ;;  %v202_v24 = vmul.f32 %v197_v12, %v174_v18 }
  0x8e   : > { %v215_v19 = vpop.permute.xlu1 %214  ;;  %v210_v20 = vpop.permute.xlu0 %209 }
  0x8f   : > { %v228_v21 = vadd.f32 %v215_v19, %v200_v16  ;;  %v227_v22 = vadd.f32 %v210_v20, %v199_v15 }
  0x91   : > { %v232_v25 = vmax.f32 %v228_v21, 0.0  ;;  %v231_v26 = vmax.f32 %v227_v22, 0.0 }
  0x92   : > { %v225_v27 = vpop.permute.xlu1 %224  ;;  %v220_v28 = vpop.permute.xlu0 %219 }
  0x93   : > { %v334_v29 = vpack.c.bf16 %v232_v25, %v231_v26  ;;  %v230_v30 = vadd.f32 %v225_v27, %v202_v24  ;;  %v229_v31 = vadd.f32 %v220_v28, %v201_v23 }
  0x95   : > { %335 = vst [vmem:[%s170_s10] sm:$0xff] %v334_v29   ;;  %v234_v32 = vmax.f32 %v230_v30, 0.0  ;;  %v233_v33 = vmax.f32 %v229_v31, 0.0 }
  0x97   : > { %v339_v34 = vpack.c.bf16 %v234_v32, %v233_v33 }
  0x99   : > { %341 = vst [vmem:[%s170_s10 + $0x8] sm:$0xff] %v339_v34  }
  0x9a PF: > { %s13_s12 = sadd.s32 1, %s359_s12  }
  0x9b   : > { %p10_p4 = scmp.ge.s32.totalorder %s13_s12, 6  }
  0x9d   :  { %12 = sbr.rel (!%p10_p4) target bundleno = 1 (0x1), region = 62 }

// kernel: generator_forward.11
= control target key start
LH: loop header
LB: loop body
LE: loop exit
PB: predicated region body
PF: predicated region fallthrough
CT: control target
= control target key end

     0   :  { %s942_s18 = smov 0   ;;  %s944_s19 = smov 0   ;;  %s1064_s0 = inlined_call_operand.vmem [shape: bf16[4,32,256], index: 0, kind: input, shape index: {}]   ;;  %s1065_s1 = inlined_call_operand.vmem [shape: bf16[4,256,128], index: 1, kind: input, shape index: {}]   ;;  %s1066_s2 = inlined_call_operand.vmem [shape: f32[32,1], index: 2, kind: input, shape index: {}]   ;;  %s1067_s3 = inlined_call_operand.vmem [shape: f32[4,32,128], index: 3, kind: output, shape index: {0}]   ;;  %s1068_s4 = inlined_call_operand.vmem [shape: f32[4,32,1], index: 4, kind: output, shape index: {1}]   ;;  %s1069_s5 = inlined_call_operand.vmem [shape: f32[4,32,1], index: 5, kind: output, shape index: {2}]  }
   0x1   :  { %s946_s20 = smov 0  }
   0x2 LB: > { %s28_s21 = sadd.s32 1, %s904_s19  ;;  %p754_p0 = scmp.ge.s32.totalorder %s908_s20, 1  ;;  %s908_s20 = sphi %s946_s20, %s16_s20   ;;  %s904_s19 = sphi %s944_s19, %s1071_s19   ;;  %s900_s18 = sphi %s942_s18, %s1070_s18  }
   0x3   : > { %p30_p1 = scmp.ge.s32.totalorder %s28_s21, 4  ;;  %p221_p2 = scmp.lt.s32.totalorder %s908_s20, 5 }
   0x5   : > { %s1073_s21 = smov (%p30_p1, %s28_s21), 0  ;;  %p222_p3 = pnand %p754_p0, %p221_p2 }
   0x6   : > { %p270_p4 = scmp.lt.s32.totalorder (!%p222_p3), %s900_s18, 3  ;;  %v338_v0 = vld [vmem:[%s1066_s2] sm:$0xff] (!%p222_p3)  ;;  %v340_v1 = vld [vmem:[%s1066_s2 + $0x10] sm:$0xff] (!%p222_p3)  ;;  %v910_v2 = vmov (!%p222_p3), 0   ;;  %v339_v3 = vld [vmem:[%s1066_s2 + $0x8] sm:$0xff] (!%p222_p3)  ;;  %vm535_vm0 = vcmask (!%p222_p3), 7168  }
   0x7   : > { %225 = sbr.rel (%p222_p3) target bundleno = 428 (0x1ac), region = 32  ;;  %862 = vset.pattern.permute.xlu0 (!%p222_p3), %v910_v2  ;;  %863 = vset.pattern.permute.xlu1 (!%p222_p3), %v910_v2  ;;  %v341_v4 = vld [vmem:[%s1066_s2 + $0x18] sm:$0xff] (!%p222_p3)  ;;  %v911_v25 = vmov (!%p222_p3), 0.0  }
   0x8   : > { %344 = vperm.xlu0 (!%p222_p3), %862, %v338_v0   ;;  %354 = vperm.xlu1 (!%p222_p3), %863, %v340_v1  }
   0xc   : > { %349 = vperm.xlu0 (!%p222_p3), %862, %v339_v3   ;;  %359 = vperm.xlu1 (!%p222_p3), %863, %v341_v4  }
   0xe   : > { %s1075_s18 = smov (!%p270_p4, %s900_s18), 3 }
   0xf   : > { %s788_s30 = sshll.u32 %s1075_s18, 7  ;;  %s985_s9 = sshll.u32 %s1075_s18, 5 }
  0x10   : > { %s975_s8 = scalar_lea.vmem %s1065_s1, %s788_s30  ;;  %s274_s12 = scalar_lea.vmem %s1064_s0, %s985_s9 }
  0x11   : > { %v864_v5 = vld [vmem:[%s975_s8 + $0x40] sm:$0xff]   ;;  %v866_v7 = vld [vmem:[%s975_s8 + $0x48] sm:$0xff]   ;;  %v868_v9 = vld [vmem:[%s975_s8 + $0x50] sm:$0xff]   ;;  %s1003_s15 = scalar_lea.vmem %s1068_s4, %s985_s9  ;;  %s1009_s18 = scalar_lea.vmem %s1069_s5, %s985_s9 }
  0x12   : > { %v865_v6 = vld [vmem:[%s975_s8] sm:$0xff]   ;;  %792 = vmatprep.subr.bf16.mxu0 %v864_v5  ;;  %820 = vmatprep.subr.bf16.mxu1 %v864_v5  ;;  %v867_v8 = vld [vmem:[%s975_s8 + $0x8] sm:$0xff]   ;;  %v869_v10 = vld [vmem:[%s975_s8 + $0x10] sm:$0xff]   ;;  %536 = vst.msk [vmem:[%s1003_s15] sm:$0xff] %vm535_vm0, %v911_v25  ;;  %s290_s24 = scalar_lea.vmem %s1067_s3, %s985_s9 }
  0x13   : > { %793 = vmatpush3.bf16.msra.mxu0 %v865_v6  ;;  %828 = vmatpush3.bf16.msra.mxu1 %v865_v6  ;;  %v870_v11 = vld [vmem:[%s975_s8 + $0x58] sm:$0xff]   ;;  %v872_v13 = vld [vmem:[%s975_s8 + $0x60] sm:$0xff]   ;;  %v874_v15 = vld [vmem:[%s975_s8 + $0x68] sm:$0xff]   ;;  %537 = vst.msk [vmem:[%s1003_s15 + $0x8] sm:$0xff] %vm535_vm0, %v911_v25 }
  0x14   : > { %794 = vmatprep.subr.bf16.mxu0 %v866_v7  ;;  %821 = vmatprep.subr.bf16.mxu1 %v866_v7  ;;  %v871_v12 = vld [vmem:[%s975_s8 + $0x18] sm:$0xff]   ;;  %v873_v14 = vld [vmem:[%s975_s8 + $0x20] sm:$0xff]   ;;  %v875_v18 = vld [vmem:[%s975_s8 + $0x28] sm:$0xff]   ;;  %538 = vst.msk [vmem:[%s1003_s15 + $0x10] sm:$0xff] %vm535_vm0, %v911_v25 }
  0x15   : > { %v882_v16 = vld [vmem:[%s274_s12 + $0x4] ss:$8 sps:$4 sm:$0xff]   ;;  %v885_v17 = vld [vmem:[%s274_s12 + $0x14] ss:$8 sps:$4 sm:$0xff]   ;;  %v880_v23 = vld [vmem:[%s274_s12] ss:$8 sps:$4 sm:$0xff]  }
  0x16   : > { %v876_v19 = vld [vmem:[%s975_s8 + $0x70] sm:$0xff]   ;;  %510 = vmatprep.mubr.bf16.mxu0 %v882_v16  ;;  %518 = vmatprep.mubr.bf16.mxu1 %v885_v17  ;;  %v878_v21 = vld [vmem:[%s975_s8 + $0x78] sm:$0xff]   ;;  %539 = vst.msk [vmem:[%s1003_s15 + $0x18] sm:$0xff] %vm535_vm0, %v911_v25  ;;  %540 = vst.msk [vmem:[%s1009_s18] sm:$0xff] %vm535_vm0, %v911_v25 }
  0x17   : > { %795 = vmatpush3.bf16.msra.mxu0 %v867_v8  ;;  %829 = vmatpush3.bf16.msra.mxu1 %v867_v8  ;;  %v877_v20 = vld [vmem:[%s975_s8 + $0x30] sm:$0xff]   ;;  %v879_v22 = vld [vmem:[%s975_s8 + $0x38] sm:$0xff]   ;;  %541 = vst.msk [vmem:[%s1009_s18 + $0x8] sm:$0xff] %vm535_vm0, %v911_v25  ;;  %542 = vst.msk [vmem:[%s1009_s18 + $0x10] sm:$0xff] %vm535_vm0, %v911_v25 }
  0x18   : > { %796 = vmatprep.subr.bf16.mxu0 %v868_v9  ;;  %822 = vmatprep.subr.bf16.mxu1 %v868_v9  ;;  %v883_v24 = vld [vmem:[%s274_s12 + $0x10] ss:$8 sps:$4 sm:$0xff]   ;;  %543 = vst.msk [vmem:[%s1009_s18 + $0x18] sm:$0xff] %vm535_vm0, %v911_v25 }
  0x19   : > { %v544_v50 = vld [vmem:[%s1003_s15] sm:$0xff] }
  0x1a   : > { %v545_v52 = vld [vmem:[%s1003_s15 + $0x8] sm:$0xff] }
  0x1b   : > { %797 = vmatpush3.bf16.msra.mxu0 %v869_v10  ;;  %830 = vmatpush3.bf16.msra.mxu1 %v869_v10  ;;  %v546_v55 = vld [vmem:[%s1003_s15 + $0x10] sm:$0xff] }
  0x1c   : > { %798 = vmatprep.subr.bf16.mxu0 %v870_v11  ;;  %823 = vmatprep.subr.bf16.mxu1 %v870_v11 }
  0x1d   : > { %v565_v58 = vld [vmem:[%s1009_s18] sm:$0xff]  ;;  %v547_v61 = vld [vmem:[%s1003_s15 + $0x18] sm:$0xff] }
  0x1e   : > { %v567_v0 = vld [vmem:[%s1009_s18 + $0x10] sm:$0xff]  ;;  %v566_v3 = vld [vmem:[%s1009_s18 + $0x8] sm:$0xff] }
  0x1f   : > { %799 = vmatpush3.bf16.msra.mxu0 %v871_v12  ;;  %831 = vmatpush3.bf16.msra.mxu1 %v871_v12  ;;  %v568_v7 = vld [vmem:[%s1009_s18 + $0x18] sm:$0xff] }
  0x20   : > { %800 = vmatprep.subr.bf16.mxu0 %v872_v13  ;;  %824 = vmatprep.subr.bf16.mxu1 %v872_v13 }
  0x23   : > { %801 = vmatpush3.bf16.msra.mxu0 %v873_v14  ;;  %832 = vmatpush3.bf16.msra.mxu1 %v873_v14 }
  0x24   : > { %802 = vmatprep.subr.bf16.mxu0 %v874_v15  ;;  %825 = vmatprep.subr.bf16.mxu1 %v874_v15 }
  0x27   : > { %803 = vmatpush3.bf16.msra.mxu0 %v875_v18  ;;  %833 = vmatpush3.bf16.msra.mxu1 %v875_v18 }
  0x28   : > { %804 = vmatprep.subr.bf16.mxu0 %v876_v19  ;;  %826 = vmatprep.subr.bf16.mxu1 %v876_v19 }
  0x2b   : > { %805 = vmatpush3.bf16.msra.mxu0 %v877_v20  ;;  %834 = vmatpush3.bf16.msra.mxu1 %v877_v20 }
  0x2c   : > { %806 = vmatprep.subr.bf16.mxu0 %v878_v21  ;;  %827 = vmatprep.subr.bf16.mxu1 %v878_v21 }
  0x2f   : > { %807 = vmatpush3.bf16.msra.mxu0 %v879_v22  ;;  %835 = vmatpush3.bf16.msra.mxu1 %v879_v22 }
  0x32   : > { %511 = vmatmul.mubr.bf16.vlgmr.msra.gmra.mrb[0].mxu0 %v880_v23  ;;  %519 = vmatmul.mubr.bf16.vlgmr.msra.gmra.mrb[0].mxu1 %v883_v24 }
  0x87   : > { %v355_v26 = vpop.permute.xlu1 %354  ;;  %v345_v27 = vpop.permute.xlu0 %344 }
  0x8b   : > { %v360_v28 = vpop.permute.xlu1 %359  ;;  %v350_v43 = vpop.permute.xlu0 %349 }
 0x105   : > { %v808_v29 = vpop.f32.mrb[0].mxu0  ;;  %v814_v30 = vpop.f32.mrb[0].mxu1 }
 0x106   : > { %v809_v31 = vpop.f32.mrb[1].mxu0  ;;  %v815_v32 = vpop.f32.mrb[1].mxu1 }
 0x107   : > { %v810_v33 = vadd.f32 %v809_v31, %v808_v29  ;;  %v811_v34 = vpop.f32.mrb[2].mxu0  ;;  %v816_v35 = vadd.f32 %v815_v32, %v814_v30  ;;  %v817_v36 = vpop.f32.mrb[2].mxu1 }
 0x108   : > { %v812_v37 = vpop.f32.mrb[3].mxu0  ;;  %v818_v38 = vpop.f32.mrb[3].mxu1 }
 0x109   : > { %v513_v39 = vadd.f32 %v810_v33, %v345_v27  ;;  %v521_v40 = vadd.f32 %v816_v35, %v355_v26  ;;  %v813_v41 = vadd.f32 %v812_v37, %v811_v34  ;;  %v819_v42 = vadd.f32 %v818_v38, %v817_v36 }
 0x10b   : > { %527 = vst [vmem:[%s290_s24] sm:$0xff] %v513_v39  ;;  %529 = vst [vmem:[%s290_s24 + $0x10] sm:$0xff] %v521_v40  ;;  %v516_v44 = vadd.f32 %v813_v41, %v350_v43  ;;  %v524_v45 = vadd.f32 %v819_v42, %v360_v28  ;;  %548 = vadd.xlane.f32.xlu0 %v513_v39  ;;  %v569_v46 = vmul.f32 %v513_v39, %v513_v39 }
 0x10c   : > { %v571_v47 = vmul.f32 %v521_v40, %v521_v40 }
 0x10d   : > { %528 = vst [vmem:[%s290_s24 + $0x8] sm:$0xff] %v516_v44  ;;  %530 = vst [vmem:[%s290_s24 + $0x18] sm:$0xff] %v524_v45  ;;  %550 = vadd.xlane.f32.xlu1 %v516_v44  ;;  %v570_v48 = vmul.f32 %v516_v44, %v516_v44  ;;  %v572_v49 = vmul.f32 %v524_v45, %v524_v45 }
 0x10f   : > { %552 = vadd.xlane.f32.xlu0 %v521_v40 }
 0x111   : > { %573 = vadd.xlane.f32.xlu1 %v569_v46 }
 0x113   : > { %554 = vadd.xlane.f32.xlu0 %v524_v45 }
 0x115   : > { %577 = vadd.xlane.f32.xlu1 %v571_v47 }
 0x117   : > { %575 = vadd.xlane.f32.xlu0 %v570_v48 }
 0x11b   : > { %579 = vadd.xlane.f32.xlu0 %v572_v49 }
 0x198   : > { %v549_v51 = vpop.xlane.xlu0 %548 }
 0x199   : > { %v556_v53 = vadd.f32 %v549_v51, %v544_v50 }
 0x19a   : > { %v551_v54 = vpop.xlane.xlu1 %550 }
 0x19b   : > { %561 = vst.msk [vmem:[%s1003_s15] sm:$0xff] %vm535_vm0, %v556_v53  ;;  %v557_v56 = vadd.f32 %v551_v54, %v545_v52 }
 0x19c   : > { %v553_v57 = vpop.xlane.xlu0 %552 }
 0x19d   : > { %562 = vst.msk [vmem:[%s1003_s15 + $0x8] sm:$0xff] %vm535_vm0, %v557_v56  ;;  %v558_v59 = vadd.f32 %v553_v57, %v546_v55 }
 0x19e   : > { %v574_v60 = vpop.xlane.xlu1 %573 }
 0x19f   : > { %563 = vst.msk [vmem:[%s1003_s15 + $0x10] sm:$0xff] %vm535_vm0, %v558_v59  ;;  %v581_v62 = vadd.f32 %v574_v60, %v565_v58 }
 0x1a0   : > { %v555_v63 = vpop.xlane.xlu0 %554 }
 0x1a1   : > { %585 = vst.msk [vmem:[%s1009_s18] sm:$0xff] %vm535_vm0, %v581_v62  ;;  %v559_v1 = vadd.f32 %v555_v63, %v547_v61 }
 0x1a2   : > { %v578_v2 = vpop.xlane.xlu1 %577 }
 0x1a3   : > { %564 = vst.msk [vmem:[%s1003_s15 + $0x18] sm:$0xff] %vm535_vm0, %v559_v1  ;;  %v583_v4 = vadd.f32 %v578_v2, %v567_v0 }
 0x1a4   : > { %v576_v5 = vpop.xlane.xlu0 %575 }
 0x1a5   : > { %587 = vst.msk [vmem:[%s1009_s18 + $0x10] sm:$0xff] %vm535_vm0, %v583_v4  ;;  %v582_v6 = vadd.f32 %v576_v5, %v566_v3 }
 0x1a7   : > { %586 = vst.msk [vmem:[%s1009_s18 + $0x8] sm:$0xff] %vm535_vm0, %v582_v6 }
 0x1a8   : > { %v580_v8 = vpop.xlane.xlu0 %579 }
 0x1a9   : > { %v584_v9 = vadd.f32 %v580_v8, %v568_v7 }
 0x1ab   : > { %588 = vst.msk [vmem:[%s1009_s18 + $0x18] sm:$0xff] %vm535_vm0, %v584_v9 }
 0x1ac PF: > { %s16_s20 = sadd.s32 1, %s908_s20   ;;  %s1070_s18 = smov %s904_s19 }
 0x1ad   : > { %p13_p5 = scmp.ge.s32.totalorder %s16_s20, 6   ;;  %s1071_s19 = smov %s1073_s21 }
 0x1af   :  { %15 = sbr.rel (!%p13_p5) target bundleno = 2 (0x2), region = 93 }

// kernel: generator_forward.13
= control target key start
LH: loop header
LB: loop body
LE: loop exit
PB: predicated region body
PF: predicated region fallthrough
CT: control target
= control target key end

     0   :  { %s981_s18 = smov 0   ;;  %s983_s19 = smov 0   ;;  %s1097_s0 = inlined_call_operand.vmem [shape: bf16[4,16,128], index: 0, kind: input, shape index: {}]   ;;  %s1098_s1 = inlined_call_operand.vmem [shape: bf16[4,128,384], index: 1, kind: input, shape index: {}]   ;;  %s1099_s2 = inlined_call_operand.vmem [shape: f32[16,1], index: 2, kind: input, shape index: {}]   ;;  %s1100_s3 = inlined_call_operand.vmem [shape: f32[4,16,384], index: 3, kind: output, shape index: {0}]   ;;  %s1101_s4 = inlined_call_operand.vmem [shape: f32[4,16,1], index: 4, kind: output, shape index: {1}]   ;;  %s1102_s5 = inlined_call_operand.vmem [shape: f32[4,16,1], index: 5, kind: output, shape index: {2}]  }
   0x1   :  { %s985_s20 = smov 0  }
   0x2 LB: > { %s28_s21 = sadd.s32 1, %s942_s19  ;;  %p793_p0 = scmp.ge.s32.totalorder %s946_s20, 1  ;;  %s946_s20 = sphi %s985_s20, %s16_s20   ;;  %s942_s19 = sphi %s983_s19, %s1104_s19   ;;  %s938_s18 = sphi %s981_s18, %s1103_s18  }
   0x3   : > { %p30_p1 = scmp.ge.s32.totalorder %s28_s21, 4  ;;  %p223_p2 = scmp.lt.s32.totalorder %s946_s20, 5 }
   0x5   : > { %s1106_s21 = smov (%p30_p1, %s28_s21), 0  ;;  %p224_p3 = pnand %p793_p0, %p223_p2 }
   0x6   : > { %p274_p4 = scmp.lt.s32.totalorder (!%p224_p3), %s938_s18, 3  ;;  %v344_v0 = vld [vmem:[%s1099_s2] sm:$0xff] (!%p224_p3)  ;;  %v948_v1 = vmov (!%p224_p3), 0.0   ;;  %vm949_vm0 = vmmov (!%p224_p3), 0   ;;  %v950_v2 = vmov (!%p224_p3), 0   ;;  %v345_v3 = vld [vmem:[%s1099_s2 + $0x8] sm:$0xff] (!%p224_p3) }
   0x7   : > { %227 = sbr.rel (%p224_p3) target bundleno = 423 (0x1a7), region = 32  ;;  %841 = vmatprep.subr.bf16.mxu1 (!%p224_p3), %v948_v1  ;;  %857 = vmatprep.mubr.msk.bf16.mxu1 (!%p224_p3), %vm949_vm0, %v948_v1  ;;  %vm584_vm1 = vcmask (!%p224_p3), 7168  }
   0x8   : > { %522 = vmatprep.mubr.bf16.mxu0 (!%p224_p3), %v950_v2  ;;  %890 = vset.pattern.permute.xlu0 (!%p224_p3), %v950_v2 }
   0x9   : > { %348 = vperm.xlu0 (!%p224_p3), %890, %v344_v0  }
   0xd   : > { %353 = vperm.xlu0 (!%p224_p3), %890, %v345_v3  }
   0xe   : > { %s1108_s18 = smov (!%p274_p4, %s938_s18), 3 }
   0xf   : > { %s861_s24 = smul.u32 192, %s1108_s18  ;;  %s829_s25 = sshll.u32 %s1108_s18, 3 }
  0x10   : > { %s1014_s30 = scalar_lea.vmem %s1097_s0, %s829_s25  ;;  %s830_s9 = sshll.u32 %s1108_s18, 4 }
  0x11   : > { %s1019_s8 = scalar_lea.vmem %s1098_s1, %s861_s24  ;;  %v923_v28 = vld [vmem:[%s1014_s30] sm:$0xff]   ;;  %s1059_s12 = scalar_lea.vmem %s1101_s4, %s830_s9 }
  0x12   : > { %v891_v4 = vld [vmem:[%s1019_s8 + $0x4] ss:$12 sps:$4 sm:$0xff]   ;;  %v893_v5 = vld [vmem:[%s1019_s8 + $0x8] ss:$12 sps:$4 sm:$0xff]   ;;  %v894_v6 = vld [vmem:[%s1019_s8] ss:$12 sps:$4 sm:$0xff]   ;;  %s308_s23 = scalar_lea.vmem %s1102_s5, %s830_s9 }
  0x13   : > { %490 = vmatprep.subr.bf16.mxu0 %v891_v4  ;;  %842 = vmatpush3.bf16.msra.mxu1 %v893_v5  ;;  %v895_v7 = vld [vmem:[%s1019_s8 + $0x1c] ss:$12 sps:$4 sm:$0xff]   ;;  %v897_v8 = vld [vmem:[%s1019_s8 + $0x20] ss:$12 sps:$4 sm:$0xff]   ;;  %v898_v9 = vld [vmem:[%s1019_s8 + $0x18] ss:$12 sps:$4 sm:$0xff]  }
  0x14   : > { %491 = vmatpush1.bf16.msra.mxu0 %v894_v6  ;;  %843 = vmatprep.subr.bf16.mxu1 %v948_v1  ;;  %v899_v10 = vld [vmem:[%s1019_s8 + $0x34] ss:$12 sps:$4 sm:$0xff]   ;;  %v901_v11 = vld [vmem:[%s1019_s8 + $0x38] ss:$12 sps:$4 sm:$0xff]   ;;  %v902_v12 = vld [vmem:[%s1019_s8 + $0x30] ss:$12 sps:$4 sm:$0xff]  }
  0x15   : > { %492 = vmatprep.subr.bf16.mxu0 %v895_v7  ;;  %v903_v13 = vld [vmem:[%s1019_s8 + $0x4c] ss:$12 sps:$4 sm:$0xff]   ;;  %v905_v14 = vld [vmem:[%s1019_s8 + $0x50] ss:$12 sps:$4 sm:$0xff]   ;;  %v906_v15 = vld [vmem:[%s1019_s8 + $0x48] ss:$12 sps:$4 sm:$0xff]  }
  0x16   : > { %v907_v16 = vld [vmem:[%s1019_s8 + $0x64] ss:$12 sps:$4 sm:$0xff]   ;;  %v909_v17 = vld [vmem:[%s1019_s8 + $0x68] ss:$12 sps:$4 sm:$0xff]   ;;  %v910_v18 = vld [vmem:[%s1019_s8 + $0x60] ss:$12 sps:$4 sm:$0xff]  }
  0x17   : > { %844 = vmatpush3.bf16.msra.mxu1 %v897_v8  ;;  %v911_v19 = vld [vmem:[%s1019_s8 + $0x7c] ss:$12 sps:$4 sm:$0xff]   ;;  %v913_v20 = vld [vmem:[%s1019_s8 + $0x80] ss:$12 sps:$4 sm:$0xff]   ;;  %v914_v21 = vld [vmem:[%s1019_s8 + $0x78] ss:$12 sps:$4 sm:$0xff]  }
  0x18   : > { %493 = vmatpush1.bf16.msra.mxu0 %v898_v9  ;;  %845 = vmatprep.subr.bf16.mxu1 %v948_v1  ;;  %v915_v22 = vld [vmem:[%s1019_s8 + $0x94] ss:$12 sps:$4 sm:$0xff]   ;;  %v917_v23 = vld [vmem:[%s1019_s8 + $0x98] ss:$12 sps:$4 sm:$0xff]   ;;  %v918_v24 = vld [vmem:[%s1019_s8 + $0x90] ss:$12 sps:$4 sm:$0xff]  }
  0x19   : > { %494 = vmatprep.subr.bf16.mxu0 %v899_v10  ;;  %v919_v25 = vld [vmem:[%s1019_s8 + $0xac] ss:$12 sps:$4 sm:$0xff]   ;;  %v921_v26 = vld [vmem:[%s1019_s8 + $0xb0] ss:$12 sps:$4 sm:$0xff]   ;;  %v922_v27 = vld [vmem:[%s1019_s8 + $0xa8] ss:$12 sps:$4 sm:$0xff]  }
  0x1a   : > { %585 = vst.msk [vmem:[%s1059_s12] sm:$0xff] %vm584_vm1, %v948_v1  ;;  %586 = vst.msk [vmem:[%s1059_s12 + $0x8] sm:$0xff] %vm584_vm1, %v948_v1  ;;  %s862_s13 = smul.u32 48, %s1108_s18 }
  0x1b   : > { %846 = vmatpush3.bf16.msra.mxu1 %v901_v11  ;;  %587 = vst.msk [vmem:[%s308_s23] sm:$0xff] %vm584_vm1, %v948_v1  ;;  %588 = vst.msk [vmem:[%s308_s23 + $0x8] sm:$0xff] %vm584_vm1, %v948_v1 }
  0x1c   : > { %495 = vmatpush1.bf16.msra.mxu0 %v902_v12  ;;  %847 = vmatprep.subr.bf16.mxu1 %v948_v1  ;;  %s297_s16 = scalar_lea.vmem %s1100_s3, %s862_s13 }
  0x1d   : > { %496 = vmatprep.subr.bf16.mxu0 %v903_v13 }
  0x1f   : > { %848 = vmatpush3.bf16.msra.mxu1 %v905_v14 }
  0x20   : > { %497 = vmatpush1.bf16.msra.mxu0 %v906_v15  ;;  %849 = vmatprep.subr.bf16.mxu1 %v948_v1 }
  0x21   : > { %498 = vmatprep.subr.bf16.mxu0 %v907_v16  ;;  %v589_v59 = vld [vmem:[%s1059_s12] sm:$0xff]  ;;  %v590_v0 = vld [vmem:[%s1059_s12 + $0x8] sm:$0xff] }
  0x22   : > { %v604_v61 = vld [vmem:[%s308_s23] sm:$0xff]  ;;  %v605_v5 = vld [vmem:[%s308_s23 + $0x8] sm:$0xff] }
  0x23   : > { %850 = vmatpush3.bf16.msra.mxu1 %v909_v17 }
  0x24   : > { %499 = vmatpush1.bf16.msra.mxu0 %v910_v18  ;;  %851 = vmatprep.subr.bf16.mxu1 %v948_v1 }
  0x25   : > { %500 = vmatprep.subr.bf16.mxu0 %v911_v19 }
  0x27   : > { %852 = vmatpush3.bf16.msra.mxu1 %v913_v20 }
  0x28   : > { %501 = vmatpush1.bf16.msra.mxu0 %v914_v21  ;;  %853 = vmatprep.subr.bf16.mxu1 %v948_v1 }
  0x29   : > { %502 = vmatprep.subr.bf16.mxu0 %v915_v22 }
  0x2b   : > { %854 = vmatpush3.bf16.msra.mxu1 %v917_v23 }
  0x2c   : > { %503 = vmatpush1.bf16.msra.mxu0 %v918_v24  ;;  %855 = vmatprep.subr.bf16.mxu1 %v948_v1 }
  0x2d   : > { %504 = vmatprep.subr.bf16.mxu0 %v919_v25 }
  0x2f   : > { %856 = vmatpush3.bf16.msra.mxu1 %v921_v26 }
  0x30   : > { %505 = vmatpush1.bf16.msra.mxu0 %v922_v27 }
  0x32   : > { %858 = vmatmul.mubr.bf16.vlgmr.msra.gmra.mrb[0].mxu1 %v923_v28 }
  0x33   : > { %523 = vmatmul.mubr.bf16.vlgmr.msra.gmra.mrb[0].mxu0 %v923_v28 }
  0x88   : > { %v349_v29 = vpop.permute.xlu0 %348 }
  0x8c   : > { %v354_v31 = vpop.permute.xlu0 %353 }
 0x105   : > { %v567_v30 = vpop.f32.mrb[0].mxu1 }
 0x106   : > { %v568_v32 = vadd.f32 %v567_v30, %v349_v29  ;;  %v524_v33 = vpop.f32.mrb[0].mxu0  ;;  %v859_v34 = vpop.f32.mrb[1].mxu1 }
 0x107   : > { %v525_v35 = vadd.f32 %v524_v33, %v349_v29  ;;  %v526_v36 = vpop.f32.mrb[1].mxu0  ;;  %v570_v37 = vpop.f32.mrb[2].mxu1 }
 0x108   : > { %576 = vst [vmem:[%s297_s16 + $0x10] sm:$0xff] %v568_v32  ;;  %v527_v38 = vadd.f32 %v526_v36, %v349_v29  ;;  %v571_v39 = vadd.f32 %v570_v37, %v354_v31  ;;  %v528_v40 = vpop.f32.mrb[2].mxu0  ;;  %v860_v41 = vpop.f32.mrb[3].mxu1  ;;  %v608_v49 = vmul.f32 %v568_v32, %v568_v32 }
 0x109   : > { %574 = vst [vmem:[%s297_s16] sm:$0xff] %v525_v35  ;;  %v606_v42 = vmul.f32 %v525_v35, %v525_v35  ;;  %v529_v43 = vadd.f32 %v528_v40, %v354_v31  ;;  %v530_v44 = vpop.f32.mrb[3].mxu0 }
 0x10a   : > { %575 = vst [vmem:[%s297_s16 + $0x8] sm:$0xff] %v527_v38  ;;  %v607_v45 = vmul.f32 %v527_v38, %v527_v38  ;;  %579 = vst [vmem:[%s297_s16 + $0x28] sm:$0xff] %v571_v39  ;;  %v531_v46 = vadd.f32 %v530_v44, %v354_v31  ;;  %v591_v47 = vadd.f32 %v527_v38, %v525_v35 }
 0x10b   : > { %577 = vst [vmem:[%s297_s16 + $0x18] sm:$0xff] %v529_v43  ;;  %v609_v48 = vmul.f32 %v529_v43, %v529_v43  ;;  %v611_v56 = vmul.f32 %v571_v39, %v571_v39 }
 0x10c   : > { %578 = vst [vmem:[%s297_s16 + $0x20] sm:$0xff] %v531_v46  ;;  %v610_v50 = vmul.f32 %v531_v46, %v531_v46  ;;  %v592_v51 = vadd.f32 %v591_v47, %v568_v32  ;;  %v612_v52 = vadd.f32 %v607_v45, %v606_v42  ;;  %v595_v53 = vadd.f32 %v531_v46, %v529_v43 }
 0x10e   : > { %593 = vadd.xlane.f32.xlu1 %v592_v51  ;;  %v613_v54 = vadd.f32 %v612_v52, %v608_v49  ;;  %v596_v55 = vadd.f32 %v595_v53, %v571_v39  ;;  %v616_v57 = vadd.f32 %v610_v50, %v609_v48 }
 0x110   : > { %614 = vadd.xlane.f32.xlu0 %v613_v54  ;;  %v617_v58 = vadd.f32 %v616_v57, %v611_v56 }
 0x112   : > { %597 = vadd.xlane.f32.xlu1 %v596_v55 }
 0x116   : > { %618 = vadd.xlane.f32.xlu1 %v617_v58 }
 0x19b   : > { %v594_v60 = vpop.xlane.xlu1 %593 }
 0x19c   : > { %v599_v62 = vadd.f32 %v594_v60, %v589_v59 }
 0x19d   : > { %v615_v63 = vpop.xlane.xlu0 %614 }
 0x19e   : > { %602 = vst.msk [vmem:[%s1059_s12] sm:$0xff] %vm584_vm1, %v599_v62  ;;  %v620_v2 = vadd.f32 %v615_v63, %v604_v61 }
 0x19f   : > { %v598_v3 = vpop.xlane.xlu1 %597 }
 0x1a0   : > { %622 = vst.msk [vmem:[%s308_s23] sm:$0xff] %vm584_vm1, %v620_v2  ;;  %v600_v4 = vadd.f32 %v598_v3, %v590_v0 }
 0x1a2   : > { %603 = vst.msk [vmem:[%s1059_s12 + $0x8] sm:$0xff] %vm584_vm1, %v600_v4 }
 0x1a3   : > { %v619_v6 = vpop.xlane.xlu1 %618 }
 0x1a4   : > { %v621_v7 = vadd.f32 %v619_v6, %v605_v5 }
 0x1a6   : > { %623 = vst.msk [vmem:[%s308_s23 + $0x8] sm:$0xff] %vm584_vm1, %v621_v7 }
 0x1a7 PF: > { %s16_s20 = sadd.s32 1, %s946_s20   ;;  %s1103_s18 = smov %s942_s19 }
 0x1a8   : > { %p13_p5 = scmp.ge.s32.totalorder %s16_s20, 6   ;;  %s1104_s19 = smov %s1106_s21 }
 0x1aa   :  { %15 = sbr.rel (!%p13_p5) target bundleno = 2 (0x2), region = 93 }

// kernel: generator_forward.14
= control target key start
LH: loop header
LB: loop body
LE: loop exit
PB: predicated region body
PF: predicated region fallthrough
CT: control target
= control target key end

     0   :  { %s357_s12 = smov 0   ;;  %s386_s0 = inlined_call_operand.vmem [shape: f32[4,16,384], index: 0, kind: input, shape index: {}]   ;;  %s387_s1 = inlined_call_operand.vmem [shape: f32[16,1], index: 1, kind: input, shape index: {}]   ;;  %s388_s2 = inlined_call_operand.vmem [shape: f32[16,1], index: 2, kind: input, shape index: {}]   ;;  %s389_s3 = inlined_call_operand.vmem [shape: bf16[4,16,384], index: 3, kind: output, shape index: {}]  }
   0x1 LB: > { %s298_s13 = sadd.s32 4294967295, %s334_s12   ;;  %p302_p0 = scmp.ge.s32.totalorder %s334_s12, 1  ;;  %s334_s12 = sphi %s357_s12, %s13_s12  }
   0x2   : > { %p137_p1 = scmp.lt.s32.totalorder %s334_s12, 5 }
   0x4   : > { %p138_p2 = pnand %p302_p0, %p137_p1 }
   0x5   : > { %v195_v0 = vld [vmem:[%s388_s2] sm:$0xff] (!%p138_p2)  ;;  %v336_v2 = vmov (!%p138_p2), 0   ;;  %v196_v3 = vld [vmem:[%s388_s2 + $0x8] sm:$0xff] (!%p138_p2)  ;;  %p161_p3 = scmp.lt.s32.totalorder (!%p138_p2), %s298_s13, 3 }
   0x6   : > { %141 = sbr.rel (%p138_p2) target bundleno = 149 (0x95), region = 32  ;;  %v177_v1 = vld [vmem:[%s387_s1] sm:$0xff] (!%p138_p2)  ;;  %327 = vset.pattern.permute.xlu1 (!%p138_p2), %v336_v2  ;;  %326 = vset.pattern.permute.xlu0 (!%p138_p2), %v336_v2  ;;  %v178_v4 = vld [vmem:[%s387_s1 + $0x8] sm:$0xff] (!%p138_p2) }
   0x7   : > { %199 = vperm.xlu1 (!%p138_p2), %327, %v195_v0   ;;  %181 = vperm.xlu0 (!%p138_p2), %326, %v177_v1  }
   0xb   : > { %204 = vperm.xlu1 (!%p138_p2), %327, %v196_v3   ;;  %186 = vperm.xlu0 (!%p138_p2), %326, %v178_v4  }
   0xd   : > { %s391_s13 = smov (!%p161_p3, %s298_s13), 3 }
   0xe   : > { %s315_s22 = smul.u32 48, %s391_s13 }
   0xf   : > { %s316_s26 = smul.u32 24, %s391_s13 }
  0x10   : > { %s165_s25 = scalar_lea.vmem %s386_s0, %s315_s22 }
  0x11   : > { %v171_v5 = vld [vmem:[%s165_s25] sm:$0xff]  ;;  %v172_v6 = vld [vmem:[%s165_s25 + $0x8] sm:$0xff]  ;;  %v173_v7 = vld [vmem:[%s165_s25 + $0x10] sm:$0xff]  ;;  %s170_s29 = scalar_lea.vmem %s389_s3, %s316_s26 }
  0x12   : > { %v174_v13 = vld [vmem:[%s165_s25 + $0x18] sm:$0xff]  ;;  %v175_v17 = vld [vmem:[%s165_s25 + $0x20] sm:$0xff]  ;;  %v176_v18 = vld [vmem:[%s165_s25 + $0x28] sm:$0xff] }
  0x86   : > { %v200_v8 = vpop.permute.xlu1 %199  ;;  %v182_v9 = vpop.permute.xlu0 %181 }
  0x87   : > { %v189_v10 = vmul.f32 %v182_v9, %v171_v5  ;;  %v190_v11 = vmul.f32 %v182_v9, %v172_v6  ;;  %v191_v12 = vmul.f32 %v182_v9, %v173_v7 }
  0x89   : > { %v207_v14 = vadd.f32 %v200_v8, %v189_v10  ;;  %v208_v15 = vadd.f32 %v200_v8, %v190_v11  ;;  %v209_v16 = vadd.f32 %v200_v8, %v191_v12 }
  0x8a   : > { %v187_v19 = vpop.permute.xlu0 %186  ;;  %v205_v24 = vpop.permute.xlu1 %204 }
  0x8b   : > { %v213_v20 = vmax.f32 %v207_v14, 0.0  ;;  %v214_v21 = vmax.f32 %v208_v15, 0.0  ;;  %v215_v22 = vmax.f32 %v209_v16, 0.0  ;;  %v192_v23 = vmul.f32 %v187_v19, %v174_v13 }
  0x8c   : > { %v193_v25 = vmul.f32 %v187_v19, %v175_v17  ;;  %v194_v26 = vmul.f32 %v187_v19, %v176_v18 }
  0x8d   : > { %v311_v27 = vpack.c.bf16 %v214_v21, %v213_v20  ;;  %v312_v28 = vpack.c.bf16 %v215_v22, %v215_v22  ;;  %v210_v29 = vadd.f32 %v205_v24, %v192_v23 }
  0x8e   : > { %v211_v30 = vadd.f32 %v205_v24, %v193_v25  ;;  %v212_v31 = vadd.f32 %v205_v24, %v194_v26 }
  0x8f   : > { %239 = vst [vmem:[%s170_s29] sm:$0xff] %v311_v27  ;;  %240 = vst [vmem:[%s170_s29 + $0x8] sm:$0xf] %v312_v28  ;;  %v216_v32 = vmax.f32 %v210_v29, 0.0 }
  0x90   : > { %v217_v33 = vmax.f32 %v211_v30, 0.0  ;;  %v218_v34 = vmax.f32 %v212_v31, 0.0 }
  0x92   : > { %v313_v35 = vpack.c.bf16 %v217_v33, %v216_v32  ;;  %v314_v36 = vpack.c.bf16 %v218_v34, %v218_v34 }
  0x94   : > { %241 = vst [vmem:[%s170_s29 + $0xc] sm:$0xff] %v313_v35  ;;  %242 = vst [vmem:[%s170_s29 + $0x14] sm:$0xf] %v314_v36 }
  0x95 PF: > { %s13_s12 = sadd.s32 1, %s334_s12  }
  0x96   : > { %p10_p4 = scmp.ge.s32.totalorder %s13_s12, 6  }
  0x98   :  { %12 = sbr.rel (!%p10_p4) target bundleno = 1 (0x1), region = 62 }

// kernel: generator_forward.16
= control target key start
LH: loop header
LB: loop body
LE: loop exit
PB: predicated region body
PF: predicated region fallthrough
CT: control target
= control target key end

     0   :  { %s383_s12 = smov 0   ;;  %s410_s0 = inlined_call_operand.vmem [shape: f32[4,8,1280], index: 0, kind: input, shape index: {}]   ;;  %s411_s1 = inlined_call_operand.vmem [shape: f32[8,1], index: 1, kind: input, shape index: {}]   ;;  %s412_s2 = inlined_call_operand.vmem [shape: f32[8,1], index: 2, kind: input, shape index: {}]   ;;  %s413_s3 = inlined_call_operand.vmem [shape: bf16[4,8,1280], index: 3, kind: output, shape index: {}]  }
   0x1 LB: > { %s323_s13 = sadd.s32 4294967295, %s360_s12   ;;  %p327_p0 = scmp.ge.s32.totalorder %s360_s12, 1  ;;  %s360_s12 = sphi %s383_s12, %s13_s12  }
   0x2   : > { %p137_p1 = scmp.lt.s32.totalorder %s360_s12, 5 }
   0x4   : > { %p138_p2 = pnand %p327_p0, %p137_p1 }
   0x5   : > { %v181_v0 = vld [vmem:[%s411_s1] sm:$0xff] (!%p138_p2)  ;;  %v362_v1 = vmov (!%p138_p2), 0   ;;  %p161_p3 = scmp.lt.s32.totalorder (!%p138_p2), %s323_s13, 3 }
   0x6   : > { %141 = sbr.rel (%p138_p2) target bundleno = 149 (0x95), region = 32  ;;  %353 = vset.pattern.permute.xlu0 (!%p138_p2), %v362_v1  ;;  %v197_v2 = vld [vmem:[%s412_s2] sm:$0xff] (!%p138_p2) }
   0x7   : > { %184 = vperm.xlu0 (!%p138_p2), %353, %v181_v0  }
   0xb   : > { %200 = vperm.xlu0 (!%p138_p2), %353, %v197_v2  }
   0xd   : > { %s415_s13 = smov (!%p161_p3, %s323_s13), 3 }
   0xe   : > { %s342_s18 = smul.u32 80, %s415_s13 }
   0xf   : > { %s343_s22 = smul.u32 40, %s415_s13 }
  0x10   : > { %s165_s21 = scalar_lea.vmem %s410_s0, %s342_s18 }
  0x11   : > { %v171_v3 = vld [vmem:[%s165_s21] sm:$0xff]  ;;  %v172_v4 = vld [vmem:[%s165_s21 + $0x8] sm:$0xff]  ;;  %v173_v5 = vld [vmem:[%s165_s21 + $0x10] sm:$0xff]  ;;  %s170_s25 = scalar_lea.vmem %s413_s3, %s343_s22 }
  0x12   : > { %v174_v6 = vld [vmem:[%s165_s21 + $0x18] sm:$0xff]  ;;  %v175_v8 = vld [vmem:[%s165_s21 + $0x20] sm:$0xff]  ;;  %v176_v9 = vld [vmem:[%s165_s21 + $0x28] sm:$0xff] }
  0x13   : > { %v177_v10 = vld [vmem:[%s165_s21 + $0x30] sm:$0xff]  ;;  %v178_v11 = vld [vmem:[%s165_s21 + $0x38] sm:$0xff]  ;;  %v179_v12 = vld [vmem:[%s165_s21 + $0x40] sm:$0xff] }
  0x14   : > { %v180_v13 = vld [vmem:[%s165_s21 + $0x48] sm:$0xff] }
  0x86   : > { %v185_v7 = vpop.permute.xlu0 %184 }
  0x87   : > { %v187_v14 = vmul.f32 %v185_v7, %v171_v3  ;;  %v188_v15 = vmul.f32 %v185_v7, %v172_v4  ;;  %v189_v16 = vmul.f32 %v185_v7, %v173_v5  ;;  %v190_v17 = vmul.f32 %v185_v7, %v174_v6 }
  0x88   : > { %v191_v18 = vmul.f32 %v185_v7, %v175_v8  ;;  %v192_v19 = vmul.f32 %v185_v7, %v176_v9  ;;  %v193_v21 = vmul.f32 %v185_v7, %v177_v10  ;;  %v194_v22 = vmul.f32 %v185_v7, %v178_v11 }
  0x89   : > { %v195_v23 = vmul.f32 %v185_v7, %v179_v12  ;;  %v196_v24 = vmul.f32 %v185_v7, %v180_v13 }
  0x8a   : > { %v201_v20 = vpop.permute.xlu0 %200 }
  0x8b   : > { %v203_v25 = vadd.f32 %v201_v20, %v187_v14  ;;  %v204_v26 = vadd.f32 %v201_v20, %v188_v15  ;;  %v205_v27 = vadd.f32 %v201_v20, %v189_v16  ;;  %v206_v28 = vadd.f32 %v201_v20, %v190_v17 }
  0x8c   : > { %v207_v29 = vadd.f32 %v201_v20, %v191_v18  ;;  %v208_v30 = vadd.f32 %v201_v20, %v192_v19  ;;  %v209_v31 = vadd.f32 %v201_v20, %v193_v21  ;;  %v210_v32 = vadd.f32 %v201_v20, %v194_v22 }
  0x8d   : > { %v211_v33 = vadd.f32 %v201_v20, %v195_v23  ;;  %v212_v34 = vadd.f32 %v201_v20, %v196_v24  ;;  %v213_v35 = vmax.f32 %v203_v25, 0.0  ;;  %v214_v36 = vmax.f32 %v204_v26, 0.0 }
  0x8e   : > { %v215_v37 = vmax.f32 %v205_v27, 0.0  ;;  %v216_v38 = vmax.f32 %v206_v28, 0.0  ;;  %v217_v39 = vmax.f32 %v207_v29, 0.0  ;;  %v218_v40 = vmax.f32 %v208_v30, 0.0 }
  0x8f   : > { %v219_v41 = vmax.f32 %v209_v31, 0.0  ;;  %v220_v42 = vmax.f32 %v210_v32, 0.0  ;;  %v221_v43 = vmax.f32 %v211_v33, 0.0  ;;  %v222_v44 = vmax.f32 %v212_v34, 0.0 }
  0x90   : > { %v337_v45 = vpack.c.bf16 %v214_v36, %v213_v35  ;;  %v338_v46 = vpack.c.bf16 %v216_v38, %v215_v37  ;;  %v339_v47 = vpack.c.bf16 %v218_v40, %v217_v39 }
  0x91   : > { %v340_v48 = vpack.c.bf16 %v220_v42, %v219_v41  ;;  %v341_v49 = vpack.c.bf16 %v222_v44, %v221_v43 }
  0x92   : > { %263 = vst [vmem:[%s170_s25] sm:$0xff] %v337_v45  ;;  %264 = vst [vmem:[%s170_s25 + $0x8] sm:$0xff] %v338_v46 }
  0x93   : > { %265 = vst [vmem:[%s170_s25 + $0x10] sm:$0xff] %v339_v47  ;;  %266 = vst [vmem:[%s170_s25 + $0x18] sm:$0xff] %v340_v48 }
  0x94   : > { %267 = vst [vmem:[%s170_s25 + $0x20] sm:$0xff] %v341_v49 }
  0x95 PF: > { %s13_s12 = sadd.s32 1, %s360_s12  }
  0x96   : > { %p10_p4 = scmp.ge.s32.totalorder %s13_s12, 6  }
  0x98   :  { %12 = sbr.rel (!%p10_p4) target bundleno = 1 (0x1), region = 62 }

// kernel: generator_forward.15
= control target key start
LH: loop header
LB: loop body
LE: loop exit
PB: predicated region body
PF: predicated region fallthrough
CT: control target
= control target key end

     0   :  { %s1178_s18 = smov 0   ;;  %s1180_s19 = smov 0   ;;  %s1309_s0 = inlined_call_operand.vmem [shape: bf16[4,8,64], index: 0, kind: input, shape index: {}]   ;;  %s1310_s1 = inlined_call_operand.vmem [shape: bf16[4,64,1280], index: 1, kind: input, shape index: {}]   ;;  %s1311_s2 = inlined_call_operand.vmem [shape: f32[8,1], index: 2, kind: input, shape index: {}]   ;;  %s1312_s3 = inlined_call_operand.vmem [shape: f32[4,8,1280], index: 3, kind: output, shape index: {0}]   ;;  %s1313_s4 = inlined_call_operand.vmem [shape: f32[4,8,1], index: 4, kind: output, shape index: {1}]   ;;  %s1314_s5 = inlined_call_operand.vmem [shape: f32[4,8,1], index: 5, kind: output, shape index: {2}]  }
   0x1   :  { %s1182_s20 = smov 0  }
   0x2 LB: > { %s28_s21 = sadd.s32 1, %s1140_s19  ;;  %p980_p0 = scmp.ge.s32.totalorder %s1144_s20, 1  ;;  %s1144_s20 = sphi %s1182_s20, %s16_s20   ;;  %s1140_s19 = sphi %s1180_s19, %s1316_s19   ;;  %s1136_s18 = sphi %s1178_s18, %s1315_s18  }
   0x3   : > { %p30_p1 = scmp.ge.s32.totalorder %s28_s21, 4  ;;  %p222_p2 = scmp.lt.s32.totalorder %s1144_s20, 5 }
   0x5   : > { %s1318_s21 = smov (%p30_p1, %s28_s21), 0  ;;  %p223_p3 = pnand %p980_p0, %p222_p2 }
   0x6   : > { %p270_p4 = scmp.lt.s32.totalorder (!%p223_p3), %s1136_s18, 3  ;;  %v344_v0 = vld [vmem:[%s1311_s2] sm:$0xff] (!%p223_p3)  ;;  %v1146_v1 = vmov (!%p223_p3), 0   ;;  %vm550_vm0 = vcmask (!%p223_p3), 523264   ;;  %vm773_vm1 = vcmask (!%p223_p3), 7168   ;;  %v1147_v43 = vmov (!%p223_p3), 0.0  }
   0x7   : > { %226 = sbr.rel (%p223_p3) target bundleno = 432 (0x1b0), region = 32  ;;  %586 = vmatprep.mubr.bf16.mxu0 (!%p223_p3), %v1146_v1  ;;  %627 = vmatprep.mubr.bf16.mxu1 (!%p223_p3), %v1146_v1 }
   0x8   : > { %1061 = vset.pattern.permute.xlu0 (!%p223_p3), %v1146_v1 }
   0x9   : > { %347 = vperm.xlu0 (!%p223_p3), %1061, %v344_v0  }
   0xe   : > { %s1320_s18 = smov (!%p270_p4, %s1136_s18), 3 }
   0xf   : > { %s1033_s24 = smul.u32 320, %s1320_s18  ;;  %s981_s28 = sshll.u32 %s1320_s18, 2 }
  0x10   : > { %s273_s6 = scalar_lea.vmem %s1309_s0, %s981_s28  ;;  %s984_s7 = sshll.u32 %s1320_s18, 3 }
  0x11   : > { %s1208_s27 = scalar_lea.vmem %s1310_s1, %s1033_s24  ;;  %v303_v20 = vld [vmem:[%s273_s6] sm:$0xf]  ;;  %s1268_s10 = scalar_lea.vmem %s1313_s4, %s984_s7 }
  0x12   : > { %v1062_v2 = vld [vmem:[%s1208_s27 + $0x4] ss:$40 sps:$4 sm:$0xff]   ;;  %v1064_v3 = vld [vmem:[%s1208_s27] ss:$40 sps:$4 sm:$0xff]   ;;  %v1068_v6 = vld [vmem:[%s1208_s27 + $0x54] ss:$40 sps:$4 sm:$0xff]   ;;  %s301_s17 = scalar_lea.vmem %s1314_s5, %s984_s7 }
  0x13   : > { %554 = vmatprep.subr.bf16.mxu0 %v1062_v2  ;;  %v1065_v4 = vld [vmem:[%s1208_s27 + $0xc] ss:$40 sps:$4 sm:$0xff]   ;;  %v1067_v5 = vld [vmem:[%s1208_s27 + $0x8] ss:$40 sps:$4 sm:$0xff]   ;;  %v1071_v8 = vld [vmem:[%s1208_s27 + $0x5c] ss:$40 sps:$4 sm:$0xff]  }
  0x14   : > { %555 = vmatpush1.bf16.msra.mxu0 %v1064_v3  ;;  %v1070_v7 = vld [vmem:[%s1208_s27 + $0x50] ss:$40 sps:$4 sm:$0xff]   ;;  %595 = vmatprep.subr.bf16.mxu1 %v1065_v4  ;;  %v1074_v10 = vld [vmem:[%s1208_s27 + $0xa4] ss:$40 sps:$4 sm:$0xff]   ;;  %v1076_v11 = vld [vmem:[%s1208_s27 + $0xa0] ss:$40 sps:$4 sm:$0xff]  }
  0x15   : > { %596 = vmatpush1.bf16.msra.mxu1 %v1067_v5  ;;  %556 = vmatprep.subr.bf16.mxu0 %v1068_v6  ;;  %v1073_v9 = vld [vmem:[%s1208_s27 + $0x58] ss:$40 sps:$4 sm:$0xff]   ;;  %v1077_v12 = vld [vmem:[%s1208_s27 + $0xac] ss:$40 sps:$4 sm:$0xff]   ;;  %v1079_v14 = vld [vmem:[%s1208_s27 + $0xa8] ss:$40 sps:$4 sm:$0xff]  }
  0x16   : > { %597 = vmatprep.subr.bf16.mxu1 %v1071_v8  ;;  %v1080_v13 = vld [vmem:[%s1208_s27 + $0xf4] ss:$40 sps:$4 sm:$0xff]   ;;  %v1082_v16 = vld [vmem:[%s1208_s27 + $0xf0] ss:$40 sps:$4 sm:$0xff]   ;;  %v1094_v22 = vld [vmem:[%s1208_s27 + $0x64] ss:$40 sps:$4 sm:$0xff]  }
  0x17   : > { %v1083_v15 = vld [vmem:[%s1208_s27 + $0xfc] ss:$40 sps:$4 sm:$0xff]   ;;  %v1085_v18 = vld [vmem:[%s1208_s27 + $0xf8] ss:$40 sps:$4 sm:$0xff]   ;;  %v1097_v24 = vld [vmem:[%s1208_s27 + $0x6c] ss:$40 sps:$4 sm:$0xff]  }
  0x18   : > { %557 = vmatpush1.bf16.msra.mxu0 %v1070_v7  ;;  %v1088_v17 = vld [vmem:[%s1208_s27 + $0x14] ss:$40 sps:$4 sm:$0xff]   ;;  %v1086_v21 = vld [vmem:[%s1208_s27 + $0x10] ss:$40 sps:$4 sm:$0xff]   ;;  %v1092_v25 = vld [vmem:[%s1208_s27 + $0x60] ss:$40 sps:$4 sm:$0xff]  }
  0x19   : > { %558 = vmatprep.subr.bf16.mxu0 %v1074_v10  ;;  %598 = vmatpush1.bf16.msra.mxu1 %v1073_v9  ;;  %v1091_v19 = vld [vmem:[%s1208_s27 + $0x1c] ss:$40 sps:$4 sm:$0xff]   ;;  %v1089_v23 = vld [vmem:[%s1208_s27 + $0x18] ss:$40 sps:$4 sm:$0xff]   ;;  %v1095_v27 = vld [vmem:[%s1208_s27 + $0x68] ss:$40 sps:$4 sm:$0xff]  }
  0x1a   : > { %599 = vmatprep.subr.bf16.mxu1 %v1077_v12  ;;  %v1100_v26 = vld [vmem:[%s1208_s27 + $0xb4] ss:$40 sps:$4 sm:$0xff]   ;;  %v1098_v29 = vld [vmem:[%s1208_s27 + $0xb0] ss:$40 sps:$4 sm:$0xff]   ;;  %v1106_v30 = vld [vmem:[%s1208_s27 + $0x104] ss:$40 sps:$4 sm:$0xff]  }
  0x1b   : > { %v1103_v28 = vld [vmem:[%s1208_s27 + $0xbc] ss:$40 sps:$4 sm:$0xff]   ;;  %v1101_v31 = vld [vmem:[%s1208_s27 + $0xb8] ss:$40 sps:$4 sm:$0xff]   ;;  %v1109_v32 = vld [vmem:[%s1208_s27 + $0x10c] ss:$40 sps:$4 sm:$0xff]  }
  0x1c   : > { %559 = vmatpush1.bf16.msra.mxu0 %v1076_v11  ;;  %v1104_v33 = vld [vmem:[%s1208_s27 + $0x100] ss:$40 sps:$4 sm:$0xff]   ;;  %v1112_v34 = vld [vmem:[%s1208_s27 + $0x24] ss:$40 sps:$4 sm:$0xff]   ;;  %v1115_v37 = vld [vmem:[%s1208_s27 + $0x74] ss:$40 sps:$4 sm:$0xff]  }
  0x1d   : > { %560 = vmatprep.subr.bf16.mxu0 %v1080_v13  ;;  %600 = vmatpush1.bf16.msra.mxu1 %v1079_v14  ;;  %v1107_v35 = vld [vmem:[%s1208_s27 + $0x108] ss:$40 sps:$4 sm:$0xff]   ;;  %v1118_v39 = vld [vmem:[%s1208_s27 + $0xc4] ss:$40 sps:$4 sm:$0xff]   ;;  %v1121_v41 = vld [vmem:[%s1208_s27 + $0x114] ss:$40 sps:$4 sm:$0xff]  }
  0x1e   : > { %601 = vmatprep.subr.bf16.mxu1 %v1083_v15  ;;  %v1110_v36 = vld [vmem:[%s1208_s27 + $0x20] ss:$40 sps:$4 sm:$0xff]   ;;  %v1113_v38 = vld [vmem:[%s1208_s27 + $0x70] ss:$40 sps:$4 sm:$0xff]   ;;  %774 = vst.msk [vmem:[%s1268_s10] sm:$0xff] %vm773_vm1, %v1147_v43  ;;  %s1034_s11 = smul.u32 80, %s1320_s18 }
  0x1f   : > { %v1116_v40 = vld [vmem:[%s1208_s27 + $0xc0] ss:$40 sps:$4 sm:$0xff]   ;;  %v1119_v42 = vld [vmem:[%s1208_s27 + $0x110] ss:$40 sps:$4 sm:$0xff]   ;;  %775 = vst.msk [vmem:[%s301_s17] sm:$0xff] %vm773_vm1, %v1147_v43 }
  0x20   : > { %561 = vmatpush1.bf16.msra.mxu0 %v1082_v16  ;;  %s1277_s14 = scalar_lea.vmem %s1312_s3, %s1034_s11 }
  0x21   : > { %636 = vmatprep.subr.bf16.mxu0 %v1088_v17  ;;  %602 = vmatpush1.bf16.msra.mxu1 %v1085_v18 }
  0x22   : > { %677 = vmatprep.subr.bf16.mxu1 %v1091_v19 }
  0x23   : > { %1026 = vmatmul.mubr.msk.bf16.vlgmr.msra.gmra.mrb[0].mxu0 %vm550_vm0, %v303_v20 }
  0x24   : > { %637 = vmatpush1.bf16.msra.mxu0 %v1086_v21  ;;  %668 = vmatprep.mubr.bf16.mxu0 %v1146_v1 }
  0x25   : > { %1027 = vmatmul.mubr.msk.bf16.vlgmr.msra.gmra.mrb[0].mxu1 %vm550_vm0, %v303_v20  ;;  %638 = vmatprep.subr.bf16.mxu0 %v1094_v22 }
  0x26   : > { %678 = vmatpush1.bf16.msra.mxu1 %v1089_v23  ;;  %709 = vmatprep.mubr.bf16.mxu1 %v1146_v1 }
  0x27   : > { %679 = vmatprep.subr.bf16.mxu1 %v1097_v24 }
  0x28   : > { %639 = vmatpush1.bf16.msra.mxu0 %v1092_v25 }
  0x29   : > { %640 = vmatprep.subr.bf16.mxu0 %v1100_v26 }
  0x2a   : > { %680 = vmatpush1.bf16.msra.mxu1 %v1095_v27 }
  0x2b   : > { %681 = vmatprep.subr.bf16.mxu1 %v1103_v28 }
  0x2c   : > { %641 = vmatpush1.bf16.msra.mxu0 %v1098_v29 }
  0x2d   : > { %642 = vmatprep.subr.bf16.mxu0 %v1106_v30 }
  0x2e   : > { %682 = vmatpush1.bf16.msra.mxu1 %v1101_v31 }
  0x2f   : > { %683 = vmatprep.subr.bf16.mxu1 %v1109_v32 }
  0x30   : > { %643 = vmatpush1.bf16.msra.mxu0 %v1104_v33 }
  0x31   : > { %718 = vmatprep.subr.bf16.mxu0 %v1112_v34 }
  0x32   : > { %684 = vmatpush1.bf16.msra.mxu1 %v1107_v35 }
  0x33   : > { %1028 = vmatmul.mubr.msk.bf16.vlgmr.msra.gmra.mrb[4].mxu0 %vm550_vm0, %v303_v20 }
  0x34   : > { %719 = vmatpush1.bf16.msra.mxu0 %v1110_v36  ;;  %750 = vmatprep.mubr.bf16.mxu0 %v1146_v1 }
  0x35   : > { %1029 = vmatmul.mubr.msk.bf16.vlgmr.msra.gmra.mrb[4].mxu1 %vm550_vm0, %v303_v20  ;;  %720 = vmatprep.subr.bf16.mxu0 %v1115_v37 }
  0x38   : > { %721 = vmatpush1.bf16.msra.mxu0 %v1113_v38 }
  0x39   : > { %722 = vmatprep.subr.bf16.mxu0 %v1118_v39  ;;  %v776_v39 = vld [vmem:[%s1268_s10] sm:$0xff] }
  0x3c   : > { %723 = vmatpush1.bf16.msra.mxu0 %v1116_v40 }
  0x3d   : > { %724 = vmatprep.subr.bf16.mxu0 %v1121_v41  ;;  %v791_v41 = vld [vmem:[%s301_s17] sm:$0xff] }
  0x40   : > { %725 = vmatpush1.bf16.msra.mxu0 %v1119_v42 }
  0x43   : > { %1030 = vmatmul.mubr.msk.bf16.vlgmr.msra.gmra.mrb[8].mxu0 %vm550_vm0, %v303_v20 }
  0x88   : > { %v348_v44 = vpop.permute.xlu0 %347 }
  0xf6   : > { %v588_v45 = vpop.f32.mrb[0].mxu0 }
  0xf7   : > { %v589_v46 = vadd.f32 %v588_v45, %v348_v44  ;;  %v590_v47 = vpop.f32.mrb[1].mxu0 }
  0xf8   : > { %v591_v48 = vadd.f32 %v590_v47, %v348_v44  ;;  %v592_v49 = vpop.f32.mrb[2].mxu0  ;;  %v629_v50 = vpop.f32.mrb[0].mxu1 }
  0xf9   : > { %759 = vst [vmem:[%s1277_s14] sm:$0xff] %v589_v46  ;;  %v792_v51 = vmul.f32 %v589_v46, %v589_v46  ;;  %v593_v52 = vpop.f32.mrb[3].mxu0  ;;  %v630_v53 = vadd.f32 %v629_v50, %v348_v44  ;;  %v631_v54 = vpop.f32.mrb[1].mxu1 }
  0xfa   : > { %760 = vst [vmem:[%s1277_s14 + $0x8] sm:$0xff] %v591_v48  ;;  %v777_v55 = vadd.f32 %v591_v48, %v589_v46  ;;  %v793_v56 = vmul.f32 %v591_v48, %v591_v48  ;;  %v632_v57 = vadd.f32 %v631_v54, %v348_v44  ;;  %v633_v58 = vpop.f32.mrb[2].mxu1 }
  0xfb   : > { %761 = vst [vmem:[%s1277_s14 + $0x10] sm:$0xff] %v630_v53  ;;  %v794_v59 = vmul.f32 %v630_v53, %v630_v53  ;;  %v634_v60 = vpop.f32.mrb[3].mxu1 }
  0xfc   : > { %v802_v61 = vadd.f32 %v793_v56, %v792_v51  ;;  %v778_v62 = vadd.f32 %v777_v55, %v630_v53  ;;  %762 = vst [vmem:[%s1277_s14 + $0x18] sm:$0xff] %v632_v57  ;;  %v795_v63 = vmul.f32 %v632_v57, %v632_v57 }
  0xfe   : > { %v803_v0 = vadd.f32 %v802_v61, %v794_v59  ;;  %v779_v1 = vadd.f32 %v778_v62, %v632_v57 }
 0x100   : > { %v804_v2 = vadd.f32 %v803_v0, %v795_v63 }
 0x106   : > { %v670_v3 = vpop.f32.mrb[4].mxu0 }
 0x107   : > { %v671_v4 = vadd.f32 %v670_v3, %v348_v44  ;;  %v672_v5 = vpop.f32.mrb[5].mxu0 }
 0x108   : > { %v673_v6 = vadd.f32 %v672_v5, %v348_v44  ;;  %v711_v7 = vpop.f32.mrb[4].mxu1  ;;  %v674_v8 = vpop.f32.mrb[6].mxu0 }
 0x109   : > { %763 = vst [vmem:[%s1277_s14 + $0x20] sm:$0xff] %v671_v4  ;;  %v780_v9 = vadd.f32 %v779_v1, %v671_v4  ;;  %v796_v10 = vmul.f32 %v671_v4, %v671_v4  ;;  %v712_v11 = vadd.f32 %v711_v7, %v348_v44  ;;  %v713_v12 = vpop.f32.mrb[5].mxu1  ;;  %v675_v13 = vpop.f32.mrb[7].mxu0 }
 0x10a   : > { %764 = vst [vmem:[%s1277_s14 + $0x28] sm:$0xff] %v673_v6  ;;  %v797_v14 = vmul.f32 %v673_v6, %v673_v6  ;;  %v714_v15 = vadd.f32 %v713_v12, %v348_v44  ;;  %v715_v16 = vpop.f32.mrb[6].mxu1 }
 0x10b   : > { %v805_v17 = vadd.f32 %v804_v2, %v796_v10  ;;  %v781_v18 = vadd.f32 %v780_v9, %v673_v6  ;;  %765 = vst [vmem:[%s1277_s14 + $0x30] sm:$0xff] %v712_v11  ;;  %v716_v19 = vpop.f32.mrb[7].mxu1  ;;  %v798_v22 = vmul.f32 %v712_v11, %v712_v11 }
 0x10c   : > { %766 = vst [vmem:[%s1277_s14 + $0x38] sm:$0xff] %v714_v15  ;;  %v799_v24 = vmul.f32 %v714_v15, %v714_v15 }
 0x10d   : > { %v806_v20 = vadd.f32 %v805_v17, %v797_v14  ;;  %v782_v21 = vadd.f32 %v781_v18, %v712_v11 }
 0x10f   : > { %v783_v23 = vadd.f32 %v782_v21, %v714_v15  ;;  %v807_v25 = vadd.f32 %v806_v20, %v798_v22 }
 0x111   : > { %v808_v26 = vadd.f32 %v807_v25, %v799_v24 }
 0x116   : > { %v752_v27 = vpop.f32.mrb[8].mxu0 }
 0x117   : > { %v753_v28 = vadd.f32 %v752_v27, %v348_v44  ;;  %v754_v29 = vpop.f32.mrb[9].mxu0 }
 0x118   : > { %v755_v30 = vadd.f32 %v754_v29, %v348_v44  ;;  %v756_v31 = vpop.f32.mrb[10].mxu0 }
 0x119   : > { %767 = vst [vmem:[%s1277_s14 + $0x40] sm:$0xff] %v753_v28  ;;  %v757_v32 = vpop.f32.mrb[11].mxu0  ;;  %v784_v33 = vadd.f32 %v783_v23, %v753_v28  ;;  %v800_v34 = vmul.f32 %v753_v28, %v753_v28 }
 0x11a   : > { %768 = vst [vmem:[%s1277_s14 + $0x48] sm:$0xff] %v755_v30  ;;  %v801_v35 = vmul.f32 %v755_v30, %v755_v30 }
 0x11b   : > { %v785_v36 = vadd.f32 %v784_v33, %v755_v30  ;;  %v809_v37 = vadd.f32 %v808_v26, %v800_v34 }
 0x11d   : > { %786 = vadd.xlane.f32.xlu0 %v785_v36  ;;  %v810_v38 = vadd.f32 %v809_v37, %v801_v35 }
 0x11f   : > { %811 = vadd.xlane.f32.xlu1 %v810_v38 }
 0x1aa   : > { %v787_v40 = vpop.xlane.xlu0 %786 }
 0x1ab   : > { %v788_v42 = vadd.f32 %v787_v40, %v776_v39 }
 0x1ac   : > { %v812_v44 = vpop.xlane.xlu1 %811 }
 0x1ad   : > { %790 = vst.msk [vmem:[%s1268_s10] sm:$0xff] %vm773_vm1, %v788_v42  ;;  %v813_v45 = vadd.f32 %v812_v44, %v791_v41 }
 0x1af   : > { %814 = vst.msk [vmem:[%s301_s17] sm:$0xff] %vm773_vm1, %v813_v45 }
 0x1b0 PF: > { %s16_s20 = sadd.s32 1, %s1144_s20   ;;  %s1315_s18 = smov %s1140_s19 }
 0x1b1   : > { %p13_p5 = scmp.ge.s32.totalorder %s16_s20, 6   ;;  %s1316_s19 = smov %s1318_s21 }
 0x1b3   :  { %15 = sbr.rel (!%p13_p5) target bundleno = 2 (0x2), region = 93 }

// kernel: generator_forward.17
= control target key start
LH: loop header
LB: loop body
LE: loop exit
PB: predicated region body
PF: predicated region fallthrough
CT: control target
= control target key end

     0   :  { %s2041_s12 = smov 0   ;;  %s2043_s13 = smov 0   ;;  %s2294_s0 = inlined_call_operand.vmem [shape: bf16[4,3,32], index: 0, kind: input, shape index: {}]   ;;  %s2295_s1 = inlined_call_operand.vmem [shape: bf16[4,32,5120], index: 1, kind: input, shape index: {}]   ;;  %s2296_s2 = inlined_call_operand.vmem [shape: f32[3,1], index: 2, kind: input, shape index: {}]   ;;  %s2297_s3 = inlined_call_operand.vmem [shape: f32[4,3,5120], index: 3, kind: output, shape index: {}]  }
   0x1   :  { %s2045_s14 = smov 0  }
   0x2 LB: > { %s25_s15 = sadd.s32 1, %s2014_s13  ;;  %p1782_p0 = scmp.ge.s32.totalorder %s2018_s14, 1  ;;  %s2018_s14 = sphi %s2045_s14, %s13_s14   ;;  %s2014_s13 = sphi %s2043_s13, %s2299_s13   ;;  %s2010_s12 = sphi %s2041_s12, %s2298_s12  }
   0x3   : > { %p27_p1 = scmp.ge.s32.totalorder %s25_s15, 4  ;;  %p167_p2 = scmp.lt.s32.totalorder %s2018_s14, 5 }
   0x5   : > { %s2301_s15 = smov (%p27_p1, %s25_s15), 0  ;;  %p168_p3 = pnand %p1782_p0, %p167_p2 }
   0x6   : > { %p203_p4 = scmp.lt.s32.totalorder (!%p168_p3), %s2010_s12, 3  ;;  %v309_v0 = vld [vmem:[%s2296_s2] sm:$0x7] (!%p168_p3)  ;;  %v2020_v1 = vmov (!%p168_p3), 0   ;;  %vm715_vm0 = vcmask (!%p168_p3), 261120  }
   0x7   : > { %171 = sbr.rel (%p168_p3) target bundleno = 333 (0x14d), region = 32  ;;  %751 = vmatprep.mubr.bf16.mxu0 (!%p168_p3), %v2020_v1  ;;  %792 = vmatprep.mubr.bf16.mxu1 (!%p168_p3), %v2020_v1 }
   0x8   : > { %1915 = vset.pattern.permute.xlu0 (!%p168_p3), %v2020_v1 }
   0x9   : > { %312 = vperm.xlu0 (!%p168_p3), %1915, %v309_v0  }
   0xe   : > { %s2303_s12 = smov (!%p203_p4, %s2010_s12), 3 }
   0xf   : > { %s1888_s18 = smul.u32 640, %s2303_s12  ;;  %s1783_s22 = sshll.u32 %s2303_s12, 1 }
  0x10   : > { %s206_s25 = scalar_lea.vmem %s2294_s0, %s1783_s22  ;;  %s1889_s26 = smul.u32 160, %s2303_s12 }
  0x11   : > { %s2071_s21 = scalar_lea.vmem %s2295_s1, %s1888_s18  ;;  %v2093_v28 = vld [vmem:[%s206_s25] sm:$0x3] }
  0x12   : > { %v229_v2 = vld [vmem:[%s2071_s21] sm:$0xff]  ;;  %v230_v4 = vld [vmem:[%s2071_s21 + $0x8] sm:$0xff]  ;;  %v231_v15 = vld [vmem:[%s2071_s21 + $0x10] sm:$0xff]  ;;  %s2231_s29 = scalar_lea.vmem %s2297_s3, %s1889_s26 }
  0x13   : > { %v249_v3 = vld [vmem:[%s2071_s21 + $0xa0] sm:$0xff]  ;;  %v250_v6 = vld [vmem:[%s2071_s21 + $0xa8] sm:$0xff]  ;;  %v251_v17 = vld [vmem:[%s2071_s21 + $0xb0] sm:$0xff] }
  0x14   : > { %v1787_v5 = vcombine.high %v229_v2, %v249_v3  ;;  %v1786_v7 = vcombine.low %v229_v2, %v249_v3  ;;  %v269_v8 = vld [vmem:[%s2071_s21 + $0x140] sm:$0xff]  ;;  %v1789_v10 = vcombine.high %v230_v4, %v250_v6  ;;  %v1788_v11 = vcombine.low %v230_v4, %v250_v6  ;;  %v270_v13 = vld [vmem:[%s2071_s21 + $0x148] sm:$0xff]  ;;  %v232_v18 = vld [vmem:[%s2071_s21 + $0x18] sm:$0xff] }
  0x15   : > { %v289_v9 = vld [vmem:[%s2071_s21 + $0x1e0] sm:$0xff]  ;;  %v290_v14 = vld [vmem:[%s2071_s21 + $0x1e8] sm:$0xff]  ;;  %v252_v19 = vld [vmem:[%s2071_s21 + $0xb8] sm:$0xff]  ;;  %v1791_v22 = vcombine.high %v231_v15, %v251_v17  ;;  %v1790_v29 = vcombine.low %v231_v15, %v251_v17 }
  0x16   : > { %v1827_v12 = vcombine.high %v269_v8, %v289_v9  ;;  %719 = vmatprep.subr.bf16.mxu0 %v1787_v5  ;;  %v1829_v16 = vcombine.high %v270_v13, %v290_v14  ;;  %760 = vmatprep.subr.bf16.mxu1 %v1789_v10  ;;  %v1826_v20 = vcombine.low %v269_v8, %v289_v9  ;;  %v271_v24 = vld [vmem:[%s2071_s21 + $0x150] sm:$0xff]  ;;  %v272_v26 = vld [vmem:[%s2071_s21 + $0x158] sm:$0xff]  ;;  %v233_v33 = vld [vmem:[%s2071_s21 + $0x20] sm:$0xff] }
  0x17   : > { %720 = vmatpush1.bf16.msra.mxu0 %v1786_v7  ;;  %761 = vmatpush1.bf16.msra.mxu1 %v1788_v11  ;;  %v1828_v21 = vcombine.low %v270_v13, %v290_v14  ;;  %v1793_v23 = vcombine.high %v232_v18, %v252_v19  ;;  %v291_v25 = vld [vmem:[%s2071_s21 + $0x1f0] sm:$0xff]  ;;  %v292_v27 = vld [vmem:[%s2071_s21 + $0x1f8] sm:$0xff]  ;;  %v1792_v30 = vcombine.low %v232_v18, %v252_v19  ;;  %v253_v34 = vld [vmem:[%s2071_s21 + $0xc0] sm:$0xff] }
  0x18   : > { %721 = vmatprep.subr.bf16.mxu0 %v1827_v12  ;;  %762 = vmatprep.subr.bf16.mxu1 %v1829_v16  ;;  %v1831_v31 = vcombine.high %v271_v24, %v291_v25  ;;  %v1833_v32 = vcombine.high %v272_v26, %v292_v27  ;;  %v234_v35 = vld [vmem:[%s2071_s21 + $0x28] sm:$0xff]  ;;  %v1830_v37 = vcombine.low %v271_v24, %v291_v25  ;;  %v273_v41 = vld [vmem:[%s2071_s21 + $0x160] sm:$0xff]  ;;  %v235_v49 = vld [vmem:[%s2071_s21 + $0x30] sm:$0xff] }
  0x19   : > { %v254_v36 = vld [vmem:[%s2071_s21 + $0xc8] sm:$0xff]  ;;  %v1832_v38 = vcombine.low %v272_v26, %v292_v27  ;;  %v1795_v39 = vcombine.high %v233_v33, %v253_v34  ;;  %v293_v42 = vld [vmem:[%s2071_s21 + $0x200] sm:$0xff]  ;;  %v1794_v45 = vcombine.low %v233_v33, %v253_v34  ;;  %v255_v50 = vld [vmem:[%s2071_s21 + $0xd0] sm:$0xff] }
  0x1a   : > { %v1797_v40 = vcombine.high %v234_v35, %v254_v36  ;;  %v274_v43 = vld [vmem:[%s2071_s21 + $0x168] sm:$0xff]  ;;  %v1796_v46 = vcombine.low %v234_v35, %v254_v36  ;;  %v1835_v47 = vcombine.high %v273_v41, %v293_v42  ;;  %v236_v51 = vld [vmem:[%s2071_s21 + $0x38] sm:$0xff]  ;;  %v1834_v53 = vcombine.low %v273_v41, %v293_v42  ;;  %v275_v57 = vld [vmem:[%s2071_s21 + $0x170] sm:$0xff] }
  0x1b   : > { %722 = vmatpush1.bf16.msra.mxu0 %v1826_v20  ;;  %763 = vmatpush1.bf16.msra.mxu1 %v1828_v21  ;;  %v294_v44 = vld [vmem:[%s2071_s21 + $0x208] sm:$0xff]  ;;  %v256_v52 = vld [vmem:[%s2071_s21 + $0xd8] sm:$0xff]  ;;  %v1799_v55 = vcombine.high %v235_v49, %v255_v50  ;;  %v295_v58 = vld [vmem:[%s2071_s21 + $0x210] sm:$0xff]  ;;  %v1798_v61 = vcombine.low %v235_v49, %v255_v50 }
  0x1c   : > { %801 = vmatprep.subr.bf16.mxu0 %v1791_v22  ;;  %842 = vmatprep.subr.bf16.mxu1 %v1793_v23  ;;  %v1837_v48 = vcombine.high %v274_v43, %v294_v44  ;;  %v1836_v54 = vcombine.low %v274_v43, %v294_v44  ;;  %v1801_v56 = vcombine.high %v236_v51, %v256_v52  ;;  %v276_v59 = vld [vmem:[%s2071_s21 + $0x178] sm:$0xff]  ;;  %v237_v2 = vld [vmem:[%s2071_s21 + $0x40] sm:$0xff]  ;;  %v238_v4 = vld [vmem:[%s2071_s21 + $0x48] sm:$0xff] }
  0x1d   : > { %v296_v60 = vld [vmem:[%s2071_s21 + $0x218] sm:$0xff]  ;;  %v1800_v62 = vcombine.low %v236_v51, %v256_v52  ;;  %v1839_v63 = vcombine.high %v275_v57, %v295_v58  ;;  %v257_v3 = vld [vmem:[%s2071_s21 + $0xe0] sm:$0xff]  ;;  %v258_v5 = vld [vmem:[%s2071_s21 + $0xe8] sm:$0xff]  ;;  %v1838_v6 = vcombine.low %v275_v57, %v295_v58 }
  0x1e   : > { %1866 = vmatmul.mubr.msk.bf16.vlgmr.msra.gmra.mrb[0].mxu0 %vm715_vm0, %v2093_v28  ;;  %1867 = vmatmul.mubr.msk.bf16.vlgmr.msra.gmra.mrb[0].mxu1 %vm715_vm0, %v2093_v28  ;;  %v1841_v0 = vcombine.high %v276_v59, %v296_v60  ;;  %v1840_v7 = vcombine.low %v276_v59, %v296_v60  ;;  %v1803_v8 = vcombine.high %v237_v2, %v257_v3  ;;  %v277_v10 = vld [vmem:[%s2071_s21 + $0x180] sm:$0xff]  ;;  %v278_v12 = vld [vmem:[%s2071_s21 + $0x188] sm:$0xff]  ;;  %v239_v18 = vld [vmem:[%s2071_s21 + $0x50] sm:$0xff] }
  0x1f   : > { %802 = vmatpush1.bf16.msra.mxu0 %v1790_v29  ;;  %843 = vmatpush1.bf16.msra.mxu1 %v1792_v30  ;;  %v1805_v9 = vcombine.high %v238_v4, %v258_v5  ;;  %v297_v11 = vld [vmem:[%s2071_s21 + $0x220] sm:$0xff]  ;;  %v298_v13 = vld [vmem:[%s2071_s21 + $0x228] sm:$0xff]  ;;  %v1802_v14 = vcombine.low %v237_v2, %v257_v3  ;;  %v1804_v15 = vcombine.low %v238_v4, %v258_v5  ;;  %v259_v19 = vld [vmem:[%s2071_s21 + $0xf0] sm:$0xff] }
  0x20   : > { %803 = vmatprep.subr.bf16.mxu0 %v1831_v31  ;;  %844 = vmatprep.subr.bf16.mxu1 %v1833_v32  ;;  %v1843_v16 = vcombine.high %v277_v10, %v297_v11  ;;  %v1845_v17 = vcombine.high %v278_v12, %v298_v13  ;;  %v240_v20 = vld [vmem:[%s2071_s21 + $0x58] sm:$0xff]  ;;  %v1842_v22 = vcombine.low %v277_v10, %v297_v11  ;;  %v279_v26 = vld [vmem:[%s2071_s21 + $0x190] sm:$0xff]  ;;  %v241_v35 = vld [vmem:[%s2071_s21 + $0x60] sm:$0xff] }
  0x21   : > { %833 = vmatprep.mubr.bf16.mxu0 %v2020_v1  ;;  %874 = vmatprep.mubr.bf16.mxu1 %v2020_v1  ;;  %v260_v21 = vld [vmem:[%s2071_s21 + $0xf8] sm:$0xff]  ;;  %v1844_v23 = vcombine.low %v278_v12, %v298_v13  ;;  %v1807_v24 = vcombine.high %v239_v18, %v259_v19  ;;  %v299_v27 = vld [vmem:[%s2071_s21 + $0x230] sm:$0xff]  ;;  %v1806_v31 = vcombine.low %v239_v18, %v259_v19  ;;  %v261_v36 = vld [vmem:[%s2071_s21 + $0x100] sm:$0xff] }
  0x22   : > { %v1809_v25 = vcombine.high %v240_v20, %v260_v21  ;;  %v280_v29 = vld [vmem:[%s2071_s21 + $0x198] sm:$0xff]  ;;  %v1808_v32 = vcombine.low %v240_v20, %v260_v21  ;;  %v1847_v33 = vcombine.high %v279_v26, %v299_v27  ;;  %v1811_v41 = vcombine.high %v241_v35, %v261_v36  ;;  %v281_v43 = vld [vmem:[%s2071_s21 + $0x1a0] sm:$0xff]  ;;  %v243_v51 = vld [vmem:[%s2071_s21 + $0x70] sm:$0xff] }
  0x23   : > { %804 = vmatpush1.bf16.msra.mxu0 %v1830_v37  ;;  %845 = vmatpush1.bf16.msra.mxu1 %v1832_v38  ;;  %v300_v30 = vld [vmem:[%s2071_s21 + $0x238] sm:$0xff]  ;;  %v242_v37 = vld [vmem:[%s2071_s21 + $0x68] sm:$0xff]  ;;  %v301_v44 = vld [vmem:[%s2071_s21 + $0x240] sm:$0xff] }
  0x24   : > { %883 = vmatprep.subr.bf16.mxu0 %v1795_v39  ;;  %924 = vmatprep.subr.bf16.mxu1 %v1797_v40  ;;  %v1849_v34 = vcombine.high %v280_v29, %v300_v30  ;;  %v262_v38 = vld [vmem:[%s2071_s21 + $0x108] sm:$0xff]  ;;  %v1846_v39 = vcombine.low %v279_v26, %v299_v27  ;;  %v1848_v40 = vcombine.low %v280_v29, %v300_v30  ;;  %v263_v52 = vld [vmem:[%s2071_s21 + $0x110] sm:$0xff]  ;;  %v245_v4 = vld [vmem:[%s2071_s21 + $0x80] sm:$0xff] }
  0x25   : > { %v1813_v42 = vcombine.high %v242_v37, %v262_v38  ;;  %v1851_v49 = vcombine.high %v281_v43, %v301_v44  ;;  %v1815_v57 = vcombine.high %v243_v51, %v263_v52  ;;  %v283_v59 = vld [vmem:[%s2071_s21 + $0x1b0] sm:$0xff]  ;;  %v265_v5 = vld [vmem:[%s2071_s21 + $0x120] sm:$0xff] }
  0x26   : > { %1868 = vmatmul.mubr.msk.bf16.vlgmr.msra.gmra.mrb[4].mxu0 %vm715_vm0, %v2093_v28  ;;  %1869 = vmatmul.mubr.msk.bf16.vlgmr.msra.gmra.mrb[4].mxu1 %vm715_vm0, %v2093_v28  ;;  %v303_v60 = vld [vmem:[%s2071_s21 + $0x250] sm:$0xff]  ;;  %v1819_v10 = vcombine.high %v245_v4, %v265_v5  ;;  %v285_v12 = vld [vmem:[%s2071_s21 + $0x1c0] sm:$0xff] }
  0x27   : > { %884 = vmatpush1.bf16.msra.mxu0 %v1794_v45  ;;  %925 = vmatpush1.bf16.msra.mxu1 %v1796_v46  ;;  %v282_v45 = vld [vmem:[%s2071_s21 + $0x1a8] sm:$0xff]  ;;  %v1855_v2 = vcombine.high %v283_v59, %v303_v60  ;;  %v305_v13 = vld [vmem:[%s2071_s21 + $0x260] sm:$0xff]  ;;  %v247_v20 = vld [vmem:[%s2071_s21 + $0x90] sm:$0xff] }
  0x28   : > { %885 = vmatprep.subr.bf16.mxu0 %v1835_v47  ;;  %926 = vmatprep.subr.bf16.mxu1 %v1837_v48  ;;  %v302_v46 = vld [vmem:[%s2071_s21 + $0x248] sm:$0xff]  ;;  %v1810_v47 = vcombine.low %v241_v35, %v261_v36  ;;  %v1812_v48 = vcombine.low %v242_v37, %v262_v38  ;;  %v1859_v18 = vcombine.high %v285_v12, %v305_v13  ;;  %v267_v21 = vld [vmem:[%s2071_s21 + $0x130] sm:$0xff] }
  0x29   : > { %915 = vmatprep.mubr.bf16.mxu0 %v2020_v1  ;;  %956 = vmatprep.mubr.bf16.mxu1 %v2020_v1  ;;  %v1853_v50 = vcombine.high %v282_v45, %v302_v46  ;;  %v1823_v26 = vcombine.high %v247_v20, %v267_v21  ;;  %v287_v29 = vld [vmem:[%s2071_s21 + $0x1d0] sm:$0xff] }
  0x2a   : > { %v307_v30 = vld [vmem:[%s2071_s21 + $0x270] sm:$0xff] }
  0x2b   : > { %886 = vmatpush1.bf16.msra.mxu0 %v1834_v53  ;;  %927 = vmatpush1.bf16.msra.mxu1 %v1836_v54  ;;  %v244_v53 = vld [vmem:[%s2071_s21 + $0x78] sm:$0xff]  ;;  %v1863_v35 = vcombine.high %v287_v29, %v307_v30  ;;  %v1862_v37 = vcombine.low %v287_v29, %v307_v30 }
  0x2c   : > { %965 = vmatprep.subr.bf16.mxu0 %v1799_v55  ;;  %1006 = vmatprep.subr.bf16.mxu1 %v1801_v56  ;;  %v264_v54 = vld [vmem:[%s2071_s21 + $0x118] sm:$0xff]  ;;  %v1850_v55 = vcombine.low %v281_v43, %v301_v44  ;;  %v1852_v56 = vcombine.low %v282_v45, %v302_v46 }
  0x2d   : > { %v1817_v58 = vcombine.high %v244_v53, %v264_v54 }
  0x2e   : > { %1870 = vmatmul.mubr.msk.bf16.vlgmr.msra.gmra.mrb[8].mxu0 %vm715_vm0, %v2093_v28  ;;  %1871 = vmatmul.mubr.msk.bf16.vlgmr.msra.gmra.mrb[8].mxu1 %vm715_vm0, %v2093_v28 }
  0x2f   : > { %966 = vmatpush1.bf16.msra.mxu0 %v1798_v61  ;;  %1007 = vmatpush1.bf16.msra.mxu1 %v1800_v62  ;;  %v284_v61 = vld [vmem:[%s2071_s21 + $0x1b8] sm:$0xff] }
  0x30   : > { %967 = vmatprep.subr.bf16.mxu0 %v1839_v63  ;;  %1008 = vmatprep.subr.bf16.mxu1 %v1841_v0  ;;  %v304_v62 = vld [vmem:[%s2071_s21 + $0x258] sm:$0xff]  ;;  %v1814_v63 = vcombine.low %v243_v51, %v263_v52  ;;  %v1816_v0 = vcombine.low %v244_v53, %v264_v54 }
  0x31   : > { %997 = vmatprep.mubr.bf16.mxu0 %v2020_v1  ;;  %1038 = vmatprep.mubr.bf16.mxu1 %v2020_v1  ;;  %v1857_v3 = vcombine.high %v284_v61, %v304_v62 }
  0x33   : > { %968 = vmatpush1.bf16.msra.mxu0 %v1838_v6  ;;  %1009 = vmatpush1.bf16.msra.mxu1 %v1840_v7  ;;  %v246_v6 = vld [vmem:[%s2071_s21 + $0x88] sm:$0xff] }
  0x34   : > { %1047 = vmatprep.subr.bf16.mxu0 %v1803_v8  ;;  %1088 = vmatprep.subr.bf16.mxu1 %v1805_v9  ;;  %v266_v7 = vld [vmem:[%s2071_s21 + $0x128] sm:$0xff]  ;;  %v1854_v8 = vcombine.low %v283_v59, %v303_v60  ;;  %v1856_v9 = vcombine.low %v284_v61, %v304_v62 }
  0x35   : > { %v1821_v11 = vcombine.high %v246_v6, %v266_v7 }
  0x36   : > { %1872 = vmatmul.mubr.msk.bf16.vlgmr.msra.gmra.mrb[12].mxu0 %vm715_vm0, %v2093_v28  ;;  %1873 = vmatmul.mubr.msk.bf16.vlgmr.msra.gmra.mrb[12].mxu1 %vm715_vm0, %v2093_v28 }
  0x37   : > { %1048 = vmatpush1.bf16.msra.mxu0 %v1802_v14  ;;  %1089 = vmatpush1.bf16.msra.mxu1 %v1804_v15  ;;  %v286_v14 = vld [vmem:[%s2071_s21 + $0x1c8] sm:$0xff] }
  0x38   : > { %1049 = vmatprep.subr.bf16.mxu0 %v1843_v16  ;;  %1090 = vmatprep.subr.bf16.mxu1 %v1845_v17  ;;  %v306_v15 = vld [vmem:[%s2071_s21 + $0x268] sm:$0xff]  ;;  %v1818_v16 = vcombine.low %v245_v4, %v265_v5  ;;  %v1820_v17 = vcombine.low %v246_v6, %v266_v7 }
  0x39   : > { %1079 = vmatprep.mubr.bf16.mxu0 %v2020_v1  ;;  %1120 = vmatprep.mubr.bf16.mxu1 %v2020_v1  ;;  %v1861_v19 = vcombine.high %v286_v14, %v306_v15 }
  0x3b   : > { %1050 = vmatpush1.bf16.msra.mxu0 %v1842_v22  ;;  %1091 = vmatpush1.bf16.msra.mxu1 %v1844_v23  ;;  %v248_v22 = vld [vmem:[%s2071_s21 + $0x98] sm:$0xff] }
  0x3c   : > { %1129 = vmatprep.subr.bf16.mxu0 %v1807_v24  ;;  %1170 = vmatprep.subr.bf16.mxu1 %v1809_v25  ;;  %v268_v23 = vld [vmem:[%s2071_s21 + $0x138] sm:$0xff]  ;;  %v1858_v24 = vcombine.low %v285_v12, %v305_v13  ;;  %v1860_v25 = vcombine.low %v286_v14, %v306_v15 }
  0x3d   : > { %v1825_v27 = vcombine.high %v248_v22, %v268_v23 }
  0x3e   : > { %1874 = vmatmul.mubr.msk.bf16.vlgmr.msra.gmra.mrb[16].mxu0 %vm715_vm0, %v2093_v28  ;;  %1875 = vmatmul.mubr.msk.bf16.vlgmr.msra.gmra.mrb[16].mxu1 %vm715_vm0, %v2093_v28 }
  0x3f   : > { %1130 = vmatpush1.bf16.msra.mxu0 %v1806_v31  ;;  %1171 = vmatpush1.bf16.msra.mxu1 %v1808_v32  ;;  %v288_v31 = vld [vmem:[%s2071_s21 + $0x1d8] sm:$0xff] }
  0x40   : > { %1131 = vmatprep.subr.bf16.mxu0 %v1847_v33  ;;  %1172 = vmatprep.subr.bf16.mxu1 %v1849_v34  ;;  %v308_v32 = vld [vmem:[%s2071_s21 + $0x278] sm:$0xff]  ;;  %v1822_v33 = vcombine.low %v247_v20, %v267_v21  ;;  %v1824_v34 = vcombine.low %v248_v22, %v268_v23 }
  0x41   : > { %1161 = vmatprep.mubr.bf16.mxu0 %v2020_v1  ;;  %1202 = vmatprep.mubr.bf16.mxu1 %v2020_v1  ;;  %v1865_v36 = vcombine.high %v288_v31, %v308_v32  ;;  %v1864_v38 = vcombine.low %v288_v31, %v308_v32 }
  0x43   : > { %1132 = vmatpush1.bf16.msra.mxu0 %v1846_v39  ;;  %1173 = vmatpush1.bf16.msra.mxu1 %v1848_v40 }
  0x44   : > { %1211 = vmatprep.subr.bf16.mxu0 %v1811_v41  ;;  %1252 = vmatprep.subr.bf16.mxu1 %v1813_v42 }
  0x46   : > { %1876 = vmatmul.mubr.msk.bf16.vlgmr.msra.gmra.mrb[20].mxu0 %vm715_vm0, %v2093_v28  ;;  %1877 = vmatmul.mubr.msk.bf16.vlgmr.msra.gmra.mrb[20].mxu1 %vm715_vm0, %v2093_v28 }
  0x47   : > { %1212 = vmatpush1.bf16.msra.mxu0 %v1810_v47  ;;  %1253 = vmatpush1.bf16.msra.mxu1 %v1812_v48 }
  0x48   : > { %1213 = vmatprep.subr.bf16.mxu0 %v1851_v49  ;;  %1254 = vmatprep.subr.bf16.mxu1 %v1853_v50 }
  0x49   : > { %1243 = vmatprep.mubr.bf16.mxu0 %v2020_v1  ;;  %1284 = vmatprep.mubr.bf16.mxu1 %v2020_v1 }
  0x4b   : > { %1214 = vmatpush1.bf16.msra.mxu0 %v1850_v55  ;;  %1255 = vmatpush1.bf16.msra.mxu1 %v1852_v56 }
  0x4c   : > { %1293 = vmatprep.subr.bf16.mxu0 %v1815_v57  ;;  %1334 = vmatprep.subr.bf16.mxu1 %v1817_v58 }
  0x4e   : > { %1878 = vmatmul.mubr.msk.bf16.vlgmr.msra.gmra.mrb[24].mxu0 %vm715_vm0, %v2093_v28  ;;  %1879 = vmatmul.mubr.msk.bf16.vlgmr.msra.gmra.mrb[24].mxu1 %vm715_vm0, %v2093_v28 }
  0x4f   : > { %1294 = vmatpush1.bf16.msra.mxu0 %v1814_v63  ;;  %1335 = vmatpush1.bf16.msra.mxu1 %v1816_v0 }
  0x50   : > { %1295 = vmatprep.subr.bf16.mxu0 %v1855_v2  ;;  %1336 = vmatprep.subr.bf16.mxu1 %v1857_v3 }
  0x51   : > { %1325 = vmatprep.mubr.bf16.mxu0 %v2020_v1  ;;  %1366 = vmatprep.mubr.bf16.mxu1 %v2020_v1 }
  0x53   : > { %1296 = vmatpush1.bf16.msra.mxu0 %v1854_v8  ;;  %1337 = vmatpush1.bf16.msra.mxu1 %v1856_v9 }
  0x54   : > { %1375 = vmatprep.subr.bf16.mxu0 %v1819_v10  ;;  %1416 = vmatprep.subr.bf16.mxu1 %v1821_v11 }
  0x56   : > { %1880 = vmatmul.mubr.msk.bf16.vlgmr.msra.gmra.mrb[28].mxu0 %vm715_vm0, %v2093_v28  ;;  %1881 = vmatmul.mubr.msk.bf16.vlgmr.msra.gmra.mrb[28].mxu1 %vm715_vm0, %v2093_v28 }
  0x57   : > { %1376 = vmatpush1.bf16.msra.mxu0 %v1818_v16  ;;  %1417 = vmatpush1.bf16.msra.mxu1 %v1820_v17 }
  0x58   : > { %1377 = vmatprep.subr.bf16.mxu0 %v1859_v18  ;;  %1418 = vmatprep.subr.bf16.mxu1 %v1861_v19 }
  0x59   : > { %1407 = vmatprep.mubr.bf16.mxu0 %v2020_v1  ;;  %1448 = vmatprep.mubr.bf16.mxu1 %v2020_v1 }
  0x5b   : > { %1378 = vmatpush1.bf16.msra.mxu0 %v1858_v24  ;;  %1419 = vmatpush1.bf16.msra.mxu1 %v1860_v25 }
  0x5c   : > { %1457 = vmatprep.subr.bf16.mxu0 %v1823_v26  ;;  %1498 = vmatprep.subr.bf16.mxu1 %v1825_v27 }
  0x5e   : > { %1882 = vmatmul.mubr.msk.bf16.vlgmr.msra.gmra.mrb[32].mxu0 %vm715_vm0, %v2093_v28  ;;  %1883 = vmatmul.mubr.msk.bf16.vlgmr.msra.gmra.mrb[32].mxu1 %vm715_vm0, %v2093_v28 }
  0x5f   : > { %1458 = vmatpush1.bf16.msra.mxu0 %v1822_v33  ;;  %1499 = vmatpush1.bf16.msra.mxu1 %v1824_v34 }
  0x60   : > { %1459 = vmatprep.subr.bf16.mxu0 %v1863_v35  ;;  %1500 = vmatprep.subr.bf16.mxu1 %v1865_v36 }
  0x61   : > { %1489 = vmatprep.mubr.bf16.mxu0 %v2020_v1  ;;  %1530 = vmatprep.mubr.bf16.mxu1 %v2020_v1 }
  0x63   : > { %1460 = vmatpush1.bf16.msra.mxu0 %v1862_v37  ;;  %1501 = vmatpush1.bf16.msra.mxu1 %v1864_v38 }
  0x66   : > { %1884 = vmatmul.mubr.msk.bf16.vlgmr.msra.gmra.mrb[36].mxu0 %vm715_vm0, %v2093_v28  ;;  %1885 = vmatmul.mubr.msk.bf16.vlgmr.msra.gmra.mrb[36].mxu1 %vm715_vm0, %v2093_v28 }
  0x88   : > { %v2217_v39 = vpop.permute.xlu0 %312 }
  0xf1   : > { %v753_v40 = vpop.f32.mrb[0].mxu0  ;;  %v794_v41 = vpop.f32.mrb[0].mxu1 }
  0xf2   : > { %v754_v42 = vadd.f32 %v753_v40, %v2217_v39  ;;  %v755_v43 = vpop.f32.mrb[1].mxu0  ;;  %v795_v1 = vadd.f32 %v794_v41, %v2217_v39  ;;  %v796_v45 = vpop.f32.mrb[1].mxu1 }
  0xf3   : > { %v756_v44 = vadd.f32 %v755_v43, %v2217_v39  ;;  %v757_v46 = vpop.f32.mrb[2].mxu0  ;;  %v797_v47 = vadd.f32 %v796_v45, %v2217_v39  ;;  %v798_v48 = vpop.f32.mrb[2].mxu1 }
  0xf4   : > { %1916 = vtanh.f32 %v754_v42  ;;  %v758_v49 = vpop.f32.mrb[3].mxu0  ;;  %v799_v28 = vpop.f32.mrb[3].mxu1 }
  0xf5   : > { %1918 = vtanh.f32 %v756_v44 }
  0xf6   : > { %1920 = vtanh.f32 %v795_v1 }
  0xf7   : > { %1922 = vtanh.f32 %v797_v47 }
  0xf9   : > { %v835_v50 = vpop.f32.mrb[4].mxu0  ;;  %v876_v52 = vpop.f32.mrb[4].mxu1 }
  0xfa   : > { %v836_v51 = vadd.f32 %v835_v50, %v2217_v39  ;;  %v837_v53 = vpop.f32.mrb[5].mxu0  ;;  %v877_v54 = vadd.f32 %v876_v52, %v2217_v39  ;;  %v878_v56 = vpop.f32.mrb[5].mxu1 }
  0xfb   : > { %v838_v55 = vadd.f32 %v837_v53, %v2217_v39  ;;  %v839_v57 = vpop.f32.mrb[6].mxu0  ;;  %v879_v58 = vadd.f32 %v878_v56, %v2217_v39  ;;  %v880_v59 = vpop.f32.mrb[6].mxu1 }
  0xfc   : > { %1924 = vtanh.f32 %v836_v51  ;;  %v840_v60 = vpop.f32.mrb[7].mxu0  ;;  %v881_v61 = vpop.f32.mrb[7].mxu1 }
  0xfd   : > { %1926 = vtanh.f32 %v877_v54 }
  0xfe   : > { %v1917_v62 = vpop.eup %1916  ;;  %1928 = vtanh.f32 %v838_v55 }
  0xff   : > { %v1919_v63 = vpop.eup %1918  ;;  %1930 = vtanh.f32 %v879_v58 }
 0x100   : > { %v1921_v0 = vpop.eup %1920  ;;  %v1619_v2 = vcombine.low %v1917_v62, %v1919_v63 }
 0x101   : > { %v1923_v3 = vpop.eup %1922  ;;  %v917_v4 = vpop.f32.mrb[8].mxu0 }
 0x102   : > { %1659 = vst [vmem:[%s2231_s29] sm:$0x77] %v1619_v2  ;;  %v1620_v5 = vcombine.low %v1921_v0, %v1923_v3  ;;  %v918_v6 = vadd.f32 %v917_v4, %v2217_v39  ;;  %v958_v7 = vpop.f32.mrb[8].mxu1  ;;  %v919_v8 = vpop.f32.mrb[9].mxu0 }
 0x103   : > { %v959_v9 = vadd.f32 %v958_v7, %v2217_v39  ;;  %v920_v10 = vadd.f32 %v919_v8, %v2217_v39  ;;  %v960_v11 = vpop.f32.mrb[9].mxu1  ;;  %v921_v12 = vpop.f32.mrb[10].mxu0 }
 0x104   : > { %1660 = vst [vmem:[%s2231_s29 + $0x8] sm:$0x77] %v1620_v5  ;;  %1932 = vtanh.f32 %v918_v6  ;;  %v961_v13 = vadd.f32 %v960_v11, %v2217_v39  ;;  %v962_v14 = vpop.f32.mrb[10].mxu1  ;;  %v922_v15 = vpop.f32.mrb[11].mxu0 }
 0x105   : > { %1934 = vtanh.f32 %v959_v9  ;;  %v963_v16 = vpop.f32.mrb[11].mxu1 }
 0x106   : > { %v1925_v17 = vpop.eup %1924  ;;  %1936 = vtanh.f32 %v920_v10 }
 0x107   : > { %v1927_v18 = vpop.eup %1926  ;;  %1938 = vtanh.f32 %v961_v13 }
 0x108   : > { %v1929_v19 = vpop.eup %1928 }
 0x109   : > { %v1931_v20 = vpop.eup %1930  ;;  %v1621_v21 = vcombine.low %v1925_v17, %v1929_v19  ;;  %v999_v22 = vpop.f32.mrb[12].mxu0 }
 0x10a   : > { %v1622_v23 = vcombine.low %v1927_v18, %v1931_v20  ;;  %v1000_v24 = vadd.f32 %v999_v22, %v2217_v39  ;;  %v1040_v25 = vpop.f32.mrb[12].mxu1  ;;  %v1001_v26 = vpop.f32.mrb[13].mxu0 }
 0x10b   : > { %1661 = vst [vmem:[%s2231_s29 + $0x10] sm:$0x77] %v1621_v21  ;;  %v1041_v27 = vadd.f32 %v1040_v25, %v2217_v39  ;;  %v1002_v29 = vadd.f32 %v1001_v26, %v2217_v39  ;;  %v1042_v30 = vpop.f32.mrb[13].mxu1  ;;  %v1003_v31 = vpop.f32.mrb[14].mxu0 }
 0x10c   : > { %1662 = vst [vmem:[%s2231_s29 + $0x18] sm:$0x77] %v1622_v23  ;;  %1940 = vtanh.f32 %v1000_v24  ;;  %v1043_v32 = vadd.f32 %v1042_v30, %v2217_v39  ;;  %v1044_v33 = vpop.f32.mrb[14].mxu1  ;;  %v1004_v34 = vpop.f32.mrb[15].mxu0 }
 0x10d   : > { %1942 = vtanh.f32 %v1041_v27  ;;  %v1045_v35 = vpop.f32.mrb[15].mxu1 }
 0x10e   : > { %v1933_v36 = vpop.eup %1932  ;;  %1944 = vtanh.f32 %v1002_v29 }
 0x10f   : > { %v1935_v37 = vpop.eup %1934  ;;  %1946 = vtanh.f32 %v1043_v32 }
 0x110   : > { %v1937_v38 = vpop.eup %1936 }
 0x111   : > { %v1939_v40 = vpop.eup %1938  ;;  %v1623_v41 = vcombine.low %v1933_v36, %v1937_v38  ;;  %v1081_v42 = vpop.f32.mrb[16].mxu0 }
 0x112   : > { %v1624_v43 = vcombine.low %v1935_v37, %v1939_v40  ;;  %v1082_v44 = vadd.f32 %v1081_v42, %v2217_v39  ;;  %v1122_v1 = vpop.f32.mrb[16].mxu1  ;;  %v1083_v45 = vpop.f32.mrb[17].mxu0 }
 0x113   : > { %1663 = vst [vmem:[%s2231_s29 + $0x20] sm:$0x77] %v1623_v41  ;;  %v1123_v46 = vadd.f32 %v1122_v1, %v2217_v39  ;;  %v1084_v47 = vadd.f32 %v1083_v45, %v2217_v39  ;;  %v1124_v48 = vpop.f32.mrb[17].mxu1  ;;  %v1085_v49 = vpop.f32.mrb[18].mxu0 }
 0x114   : > { %1664 = vst [vmem:[%s2231_s29 + $0x28] sm:$0x77] %v1624_v43  ;;  %1948 = vtanh.f32 %v1082_v44  ;;  %v1125_v28 = vadd.f32 %v1124_v48, %v2217_v39  ;;  %v1126_v50 = vpop.f32.mrb[18].mxu1  ;;  %v1086_v51 = vpop.f32.mrb[19].mxu0 }
 0x115   : > { %1950 = vtanh.f32 %v1123_v46  ;;  %v1127_v52 = vpop.f32.mrb[19].mxu1 }
 0x116   : > { %v1941_v53 = vpop.eup %1940  ;;  %1952 = vtanh.f32 %v1084_v47 }
 0x117   : > { %v1943_v54 = vpop.eup %1942  ;;  %1954 = vtanh.f32 %v1125_v28 }
 0x118   : > { %v1945_v55 = vpop.eup %1944 }
 0x119   : > { %v1947_v56 = vpop.eup %1946  ;;  %v1625_v57 = vcombine.low %v1941_v53, %v1945_v55  ;;  %v1163_v58 = vpop.f32.mrb[20].mxu0 }
 0x11a   : > { %v1626_v59 = vcombine.low %v1943_v54, %v1947_v56  ;;  %v1164_v60 = vadd.f32 %v1163_v58, %v2217_v39  ;;  %v1204_v61 = vpop.f32.mrb[20].mxu1  ;;  %v1165_v62 = vpop.f32.mrb[21].mxu0 }
 0x11b   : > { %1665 = vst [vmem:[%s2231_s29 + $0x30] sm:$0x77] %v1625_v57  ;;  %v1205_v63 = vadd.f32 %v1204_v61, %v2217_v39  ;;  %v1166_v0 = vadd.f32 %v1165_v62, %v2217_v39  ;;  %v1206_v2 = vpop.f32.mrb[21].mxu1  ;;  %v1167_v3 = vpop.f32.mrb[22].mxu0 }
 0x11c   : > { %1666 = vst [vmem:[%s2231_s29 + $0x38] sm:$0x77] %v1626_v59  ;;  %1956 = vtanh.f32 %v1164_v60  ;;  %v1207_v4 = vadd.f32 %v1206_v2, %v2217_v39  ;;  %v1208_v5 = vpop.f32.mrb[22].mxu1  ;;  %v1168_v6 = vpop.f32.mrb[23].mxu0 }
 0x11d   : > { %1958 = vtanh.f32 %v1205_v63  ;;  %v1209_v7 = vpop.f32.mrb[23].mxu1 }
 0x11e   : > { %v1949_v8 = vpop.eup %1948  ;;  %1960 = vtanh.f32 %v1166_v0 }
 0x11f   : > { %v1951_v9 = vpop.eup %1950  ;;  %1962 = vtanh.f32 %v1207_v4 }
 0x120   : > { %v1953_v10 = vpop.eup %1952 }
 0x121   : > { %v1955_v11 = vpop.eup %1954  ;;  %v1627_v12 = vcombine.low %v1949_v8, %v1953_v10  ;;  %v1245_v13 = vpop.f32.mrb[24].mxu0 }
 0x122   : > { %v1628_v14 = vcombine.low %v1951_v9, %v1955_v11  ;;  %v1246_v15 = vadd.f32 %v1245_v13, %v2217_v39  ;;  %v1286_v16 = vpop.f32.mrb[24].mxu1  ;;  %v1247_v17 = vpop.f32.mrb[25].mxu0 }
 0x123   : > { %1667 = vst [vmem:[%s2231_s29 + $0x40] sm:$0x77] %v1627_v12  ;;  %v1287_v18 = vadd.f32 %v1286_v16, %v2217_v39  ;;  %v1248_v19 = vadd.f32 %v1247_v17, %v2217_v39  ;;  %v1288_v20 = vpop.f32.mrb[25].mxu1  ;;  %v1249_v21 = vpop.f32.mrb[26].mxu0 }
 0x124   : > { %1668 = vst [vmem:[%s2231_s29 + $0x48] sm:$0x77] %v1628_v14  ;;  %1964 = vtanh.f32 %v1246_v15  ;;  %v1289_v22 = vadd.f32 %v1288_v20, %v2217_v39  ;;  %v1290_v23 = vpop.f32.mrb[26].mxu1  ;;  %v1250_v24 = vpop.f32.mrb[27].mxu0 }
 0x125   : > { %1966 = vtanh.f32 %v1287_v18  ;;  %v1291_v25 = vpop.f32.mrb[27].mxu1 }
 0x126   : > { %v1957_v26 = vpop.eup %1956  ;;  %1968 = vtanh.f32 %v1248_v19 }
 0x127   : > { %v1959_v27 = vpop.eup %1958  ;;  %1970 = vtanh.f32 %v1289_v22 }
 0x128   : > { %v1961_v29 = vpop.eup %1960 }
 0x129   : > { %v1963_v30 = vpop.eup %1962  ;;  %v1629_v31 = vcombine.low %v1957_v26, %v1961_v29  ;;  %v1327_v32 = vpop.f32.mrb[28].mxu0 }
 0x12a   : > { %v1630_v33 = vcombine.low %v1959_v27, %v1963_v30  ;;  %v1328_v34 = vadd.f32 %v1327_v32, %v2217_v39  ;;  %v1368_v35 = vpop.f32.mrb[28].mxu1  ;;  %v1329_v36 = vpop.f32.mrb[29].mxu0 }
 0x12b   : > { %1669 = vst [vmem:[%s2231_s29 + $0x50] sm:$0x77] %v1629_v31  ;;  %v1369_v37 = vadd.f32 %v1368_v35, %v2217_v39  ;;  %v1330_v38 = vadd.f32 %v1329_v36, %v2217_v39  ;;  %v1370_v40 = vpop.f32.mrb[29].mxu1  ;;  %v1331_v41 = vpop.f32.mrb[30].mxu0 }
 0x12c   : > { %1670 = vst [vmem:[%s2231_s29 + $0x58] sm:$0x77] %v1630_v33  ;;  %1972 = vtanh.f32 %v1328_v34  ;;  %v1371_v42 = vadd.f32 %v1370_v40, %v2217_v39  ;;  %v1372_v43 = vpop.f32.mrb[30].mxu1  ;;  %v1332_v44 = vpop.f32.mrb[31].mxu0 }
 0x12d   : > { %1974 = vtanh.f32 %v1369_v37  ;;  %v1373_v1 = vpop.f32.mrb[31].mxu1 }
 0x12e   : > { %v1965_v45 = vpop.eup %1964  ;;  %1976 = vtanh.f32 %v1330_v38 }
 0x12f   : > { %v1967_v46 = vpop.eup %1966  ;;  %1978 = vtanh.f32 %v1371_v42 }
 0x130   : > { %v1969_v47 = vpop.eup %1968 }
 0x131   : > { %v1971_v48 = vpop.eup %1970  ;;  %v1631_v49 = vcombine.low %v1965_v45, %v1969_v47  ;;  %v1409_v28 = vpop.f32.mrb[32].mxu0 }
 0x132   : > { %v1632_v50 = vcombine.low %v1967_v46, %v1971_v48  ;;  %v1410_v51 = vadd.f32 %v1409_v28, %v2217_v39  ;;  %v1450_v52 = vpop.f32.mrb[32].mxu1  ;;  %v1411_v53 = vpop.f32.mrb[33].mxu0 }
 0x133   : > { %1671 = vst [vmem:[%s2231_s29 + $0x60] sm:$0x77] %v1631_v49  ;;  %v1451_v54 = vadd.f32 %v1450_v52, %v2217_v39  ;;  %v1412_v55 = vadd.f32 %v1411_v53, %v2217_v39  ;;  %v1452_v56 = vpop.f32.mrb[33].mxu1  ;;  %v1413_v57 = vpop.f32.mrb[34].mxu0 }
 0x134   : > { %1672 = vst [vmem:[%s2231_s29 + $0x68] sm:$0x77] %v1632_v50  ;;  %1980 = vtanh.f32 %v1410_v51  ;;  %v1453_v58 = vadd.f32 %v1452_v56, %v2217_v39  ;;  %v1454_v59 = vpop.f32.mrb[34].mxu1  ;;  %v1414_v60 = vpop.f32.mrb[35].mxu0 }
 0x135   : > { %1982 = vtanh.f32 %v1451_v54  ;;  %v1455_v61 = vpop.f32.mrb[35].mxu1 }
 0x136   : > { %v1973_v62 = vpop.eup %1972  ;;  %1984 = vtanh.f32 %v1412_v55 }
 0x137   : > { %v1975_v63 = vpop.eup %1974  ;;  %1986 = vtanh.f32 %v1453_v58 }
 0x138   : > { %v1977_v0 = vpop.eup %1976 }
 0x139   : > { %v1979_v2 = vpop.eup %1978  ;;  %v1633_v3 = vcombine.low %v1973_v62, %v1977_v0  ;;  %v1491_v4 = vpop.f32.mrb[36].mxu0 }
 0x13a   : > { %v1634_v5 = vcombine.low %v1975_v63, %v1979_v2  ;;  %v1492_v6 = vadd.f32 %v1491_v4, %v2217_v39  ;;  %v1532_v7 = vpop.f32.mrb[36].mxu1  ;;  %v1493_v8 = vpop.f32.mrb[37].mxu0 }
 0x13b   : > { %1673 = vst [vmem:[%s2231_s29 + $0x70] sm:$0x77] %v1633_v3  ;;  %v1533_v9 = vadd.f32 %v1532_v7, %v2217_v39  ;;  %v1494_v10 = vadd.f32 %v1493_v8, %v2217_v39  ;;  %v1534_v11 = vpop.f32.mrb[37].mxu1  ;;  %v1495_v12 = vpop.f32.mrb[38].mxu0 }
 0x13c   : > { %1674 = vst [vmem:[%s2231_s29 + $0x78] sm:$0x77] %v1634_v5  ;;  %1988 = vtanh.f32 %v1492_v6  ;;  %v1535_v13 = vadd.f32 %v1534_v11, %v2217_v39  ;;  %v1536_v14 = vpop.f32.mrb[38].mxu1  ;;  %v1496_v15 = vpop.f32.mrb[39].mxu0 }
 0x13d   : > { %1990 = vtanh.f32 %v1533_v9  ;;  %v1537_v16 = vpop.f32.mrb[39].mxu1 }
 0x13e   : > { %v1981_v17 = vpop.eup %1980  ;;  %1992 = vtanh.f32 %v1494_v10 }
 0x13f   : > { %v1983_v18 = vpop.eup %1982  ;;  %1994 = vtanh.f32 %v1535_v13 }
 0x140   : > { %v1985_v19 = vpop.eup %1984 }
 0x141   : > { %v1987_v20 = vpop.eup %1986  ;;  %v1635_v21 = vcombine.low %v1981_v17, %v1985_v19 }
 0x142   : > { %v1636_v22 = vcombine.low %v1983_v18, %v1987_v20 }
 0x143   : > { %1675 = vst [vmem:[%s2231_s29 + $0x80] sm:$0x77] %v1635_v21 }
 0x144   : > { %1676 = vst [vmem:[%s2231_s29 + $0x88] sm:$0x77] %v1636_v22 }
 0x146   : > { %v1989_v23 = vpop.eup %1988 }
 0x147   : > { %v1991_v24 = vpop.eup %1990 }
 0x148   : > { %v1993_v25 = vpop.eup %1992 }
 0x149   : > { %v1995_v39 = vpop.eup %1994  ;;  %v1637_v26 = vcombine.low %v1989_v23, %v1993_v25 }
 0x14a   : > { %v1638_v27 = vcombine.low %v1991_v24, %v1995_v39 }
 0x14b   : > { %1677 = vst [vmem:[%s2231_s29 + $0x90] sm:$0x77] %v1637_v26 }
 0x14c   : > { %1678 = vst [vmem:[%s2231_s29 + $0x98] sm:$0x77] %v1638_v27 }
 0x14d PF: > { %s13_s14 = sadd.s32 1, %s2018_s14   ;;  %s2298_s12 = smov %s2014_s13 }
 0x14e   : > { %p10_p5 = scmp.ge.s32.totalorder %s13_s14, 6   ;;  %s2299_s13 = smov %s2301_s15 }
 0x150   :  { %12 = sbr.rel (!%p10_p5) target bundleno = 2 (0x2), region = 65 }

</bundles_post_ra>
